<compile_context>
chip_gen: v6e
topology: v6e:2x2x1
jax: 0.10.0
libtpu: 0.0.40
codegen_flags: <defaults>
</compile_context>

<pallas_src>
import functools

import jax
import jax.numpy as jnp
from jax import lax
from jax.experimental import pallas as pl
from jax.experimental.pallas import tpu as pltpu

_VMEM_LIMIT = 32 * 1024 * 1024


# ----------------------------- tiling helper -----------------------------

def _tile(dim, target, align):
    """Largest `align`-multiple that divides `dim` and is <= target; else full dim."""
    if dim <= target:
        return dim
    t = (min(target, dim) // align) * align
    while t >= align:
        if dim % t == 0:
            return t
        t -= align
    return dim  # full dim always satisfies the block-shape rule


# ----------------------------- Pallas kernels -----------------------------

def _ln_matmul_kernel(x_ref, g_ref, bln_ref, w_ref, b_ref, o_ref, y_ref, *, quick_gelu):
    """Fused LayerNorm (f32 stats) -> bf16 matmul -> bias (-> QuickGELU).

    The normalized, scaled activations are cached in a bf16 VMEM scratch and
    recomputed only when the row block changes (program_id(1) == 0), so the LN
    is not redone for every output-column tile.
    """
    @pl.when(pl.program_id(1) == 0)
    def _():
        x = x_ref[...].astype(jnp.float32)
        mean = jnp.mean(x, axis=-1, keepdims=True)
        var = jnp.mean(jnp.square(x - mean), axis=-1, keepdims=True)
        y = (x - mean) * lax.rsqrt(var + 1e-5)
        y = y * g_ref[...] + bln_ref[...]
        y_ref[...] = y.astype(y_ref.dtype)          # bf16 MXU operand

    out = jnp.dot(y_ref[...], w_ref[...],
                  preferred_element_type=jnp.float32) + b_ref[...]
    if quick_gelu:
        out = out * jax.nn.sigmoid(1.702 * out)
    o_ref[...] = out.astype(o_ref.dtype)


def _matmul_res_kernel(x_ref, w_ref, b_ref, r_ref, o_ref, acc_ref):
    """K-tiled bf16 matmul with f32 accumulator; bias + residual fused at finalize."""
    @pl.when(pl.program_id(2) == 0)
    def _():
        acc_ref[...] = jnp.zeros_like(acc_ref)

    acc_ref[...] += jnp.dot(x_ref[...], w_ref[...],
                            preferred_element_type=jnp.float32)

    @pl.when(pl.program_id(2) == pl.num_programs(2) - 1)
    def _():
        out = acc_ref[...] + b_ref[...] + r_ref[...].astype(jnp.float32)
        o_ref[...] = out.astype(o_ref.dtype)


def _attn_kernel(qkv_ref, o_ref, *, n_f, n_tok, n_head, scale):
    """attention_frames_g for ONE batch element.

    Input block: packed qkv (1, L, 3d) with rows in (frame, token) order.
    Output block: (1, L, d) written lane-dense, already in residual row order
    (no JAX-level transpose/concatenate needed outside the kernel).
    """
    d = o_ref.shape[-1]
    hd = d // n_head
    f32 = jnp.float32
    x = qkv_ref[0]                         # (L, 3d) bf16

    k_all = x[:, d:2 * d]                  # (L, d)
    v_all = x[:, 2 * d:3 * d]              # (L, d)

    # ---- CLS-global attention: one CLS query per frame over all L keys ----
    q_cls = jnp.concatenate(
        [x[j * n_tok:j * n_tok + 1, 0:d] for j in range(n_f)], axis=0)   # (f, d)
    cls_heads = []
    for h in range(n_head):
        c0, c1 = h * hd, (h + 1) * hd
        s = lax.dot_general(q_cls[:, c0:c1], k_all[:, c0:c1],
                            (((1,), (1,)), ((), ())),
                            preferred_element_type=f32) * scale          # (f, L)
        s = s - jnp.max(s, axis=-1, keepdims=True)
        p = jnp.exp(s)
        p = p * (1.0 / jnp.sum(p, axis=-1, keepdims=True))               # exact
        cls_heads.append(jnp.dot(p.astype(x.dtype), v_all[:, c0:c1],
                                 preferred_element_type=f32))            # (f, hd)
    cls_out = jnp.concatenate(cls_heads, axis=-1)                        # (f, d)

    # ---- per-frame token attention + assembly in residual row order ----
    # TODO(synk): for long sequences, tile over Lk (flash-style) and/or add a
    # head-group grid axis so large video configs fit v7x VMEM and use both TCs.
    rows = []
    for j in range(n_f):
        xf = x[j * n_tok:(j + 1) * n_tok, :]                             # (n, 3d)
        tok_heads = []
        for h in range(n_head):
            c0, c1 = h * hd, (h + 1) * hd
            qh = xf[1:, c0:c1]                                           # (n-1, hd)
            kh = xf[:, d + c0:d + c1]                                    # (n, hd)
            vh = xf[:, 2 * d + c0:2 * d + c1]
            s = lax.dot_general(qh, kh, (((1,), (1,)), ((), ())),
                                preferred_element_type=f32) * scale      # (n-1, n)
            s = s - jnp.max(s, axis=-1, keepdims=True)
            p = jnp.exp(s)
            p = p * (1.0 / jnp.sum(p, axis=-1, keepdims=True))
            tok_heads.append(jnp.dot(p.astype(x.dtype), vh,
                                     preferred_element_type=f32))        # (n-1, hd)
        rows.append(cls_out[j:j + 1, :])                                 # CLS row
        rows.append(jnp.concatenate(tok_heads, axis=-1))                 # (n-1, d)

    out = jnp.concatenate(rows, axis=0)                                  # (L, d)
    o_ref[0] = out.astype(o_ref.dtype)


# ----------------------------- wrappers -----------------------------

def ln_linear(x2, gamma, beta, w, b, *, quick_gelu=False, tm=512, tn=512):
    """LayerNorm(x2) @ w + b (optional QuickGELU). x2 f32, w bf16, output bf16."""
    m, kdim = x2.shape
    n = w.shape[1]
    btm = _tile(m, tm, 16)
    btn = _tile(n, tn, 128)
    cost = pl.CostEstimate(
        flops=2 * m * n * kdim + 8 * m * kdim,
        transcendentals=(m * n if quick_gelu else 0) + m,
        bytes_accessed=4 * m * kdim + 2 * kdim * n + 2 * m * n)
    return pl.pallas_call(
        functools.partial(_ln_matmul_kernel, quick_gelu=quick_gelu),
        grid=(m // btm, n // btn),
        in_specs=[
            pl.BlockSpec((btm, kdim), lambda i, j: (i, 0)),
            pl.BlockSpec((1, kdim), lambda i, j: (0, 0)),
            pl.BlockSpec((1, kdim), lambda i, j: (0, 0)),
            pl.BlockSpec((kdim, btn), lambda i, j: (0, j)),
            pl.BlockSpec((1, btn), lambda i, j: (0, j)),
        ],
        out_specs=pl.BlockSpec((btm, btn), lambda i, j: (i, j)),
        out_shape=jax.ShapeDtypeStruct((m, n), jnp.bfloat16),
        scratch_shapes=[pltpu.VMEM((btm, kdim), jnp.bfloat16)],
        compiler_params=pltpu.CompilerParams(
            # cols axis must stay sequential ("arbitrary") so the cached LN
            # scratch is always initialized at j == 0 on every core.
            dimension_semantics=("parallel", "arbitrary"),
            vmem_limit_bytes=_VMEM_LIMIT),
        cost_estimate=cost,
    )(x2, gamma, beta, w, b)


def linear_residual(x2, w, b, res, *, tm=512, tn=512, tk=1024):
    """(x2 @ w + b) + res. x2/w bf16, res/out f32. Output aliases the residual buffer."""
    m, kdim = x2.shape
    n = w.shape[1]
    btm = _tile(m, tm, 16)
    btn = _tile(n, tn, 128)
    btk = _tile(kdim, tk, 128)
    cost = pl.CostEstimate(
        flops=2 * m * n * kdim,
        transcendentals=0,
        bytes_accessed=2 * m * kdim + 2 * kdim * n + 8 * m * n)
    return pl.pallas_call(
        _matmul_res_kernel,
        grid=(m // btm, n // btn, kdim // btk),
        in_specs=[
            pl.BlockSpec((btm, btk), lambda i, j, kk: (i, kk)),
            pl.BlockSpec((btk, btn), lambda i, j, kk: (kk, j)),
            pl.BlockSpec((1, btn), lambda i, j, kk: (0, j)),
            pl.BlockSpec((btm, btn), lambda i, j, kk: (i, j)),
        ],
        out_specs=pl.BlockSpec((btm, btn), lambda i, j, kk: (i, j)),
        out_shape=jax.ShapeDtypeStruct((m, n), jnp.float32),
        scratch_shapes=[pltpu.VMEM((btm, btn), jnp.float32)],
        input_output_aliases={3: 0},   # residual buffer reused for the output
        compiler_params=pltpu.CompilerParams(
            dimension_semantics=("parallel", "parallel", "arbitrary"),
            vmem_limit_bytes=_VMEM_LIMIT),
        cost_estimate=cost,
    )(x2, w, b, res)


def attention(qkv, *, n_f, n_tok, n_head, scale):
    """qkv: (b, L, 3d) bf16 packed projections -> (b, L, d) bf16 attention output."""
    b, L, d3 = qkv.shape
    d = d3 // 3
    return pl.pallas_call(
        functools.partial(_attn_kernel, n_f=n_f, n_tok=n_tok,
                          n_head=n_head, scale=scale),
        grid=(b,),
        in_specs=[pl.BlockSpec((1, L, d3), lambda i: (i, 0, 0))],
        out_specs=pl.BlockSpec((1, L, d), lambda i: (i, 0, 0)),
        out_shape=jax.ShapeDtypeStruct((b, L, d), jnp.bfloat16),
        compiler_params=pltpu.CompilerParams(
            dimension_semantics=("parallel",),
            vmem_limit_bytes=_VMEM_LIMIT),
    )(qkv)


# ----------------------------- model -----------------------------

def residual_attention_block(x_int, p, n_head, n_f):
    """x_int: (b, L=f*n, d) f32 residual stream in batch-major layout."""
    b, L, d = x_int.shape
    n_tok = L // n_f
    hd = d // n_head
    scale = 1.0 / float(hd) ** 0.5
    m = b * L
    x2 = x_int.reshape(m, d)

    # attention branch: LN1 fused with ONE packed QKV projection (bf16 out).
    qkv = ln_linear(x2, p["ln1_g"], p["ln1_b"], p["in_proj_w"], p["in_proj_b"])
    attn_o = attention(qkv.reshape(b, L, 3 * d),
                       n_f=n_f, n_tok=n_tok, n_head=n_head, scale=scale)
    x2 = linear_residual(attn_o.reshape(m, d),
                         p["out_proj_w"], p["out_proj_b"], x2)

    # MLP branch: LN2 + c_fc + QuickGELU fused, then c_proj fused with residual.
    h = ln_linear(x2, p["ln2_g"], p["ln2_b"], p["fc_w"], p["fc_b"], quick_gelu=True)
    x2 = linear_residual(h, p["proj_w"], p["proj_b"], x2)

    return x2.reshape(b, L, d)


def transformer_forward(x, params, n_head, n_f=4):
    """x: (seq=(f n), b, d) f32, seq-first like nn.MultiheadAttention."""
    seq, b, d = x.shape
    assert seq % n_f == 0
    n_tok = seq // n_f
    # One layout change for the whole stack: (f n) b d -> b (f n) d.
    xi = x.reshape(n_f, n_tok, b, d).transpose(2, 0, 1, 3).reshape(b, seq, d)
    for p in params:
        xi = residual_attention_block(xi, p, n_head, n_f)
    # Inverse layout change at exit.
    return xi.reshape(b, n_f, n_tok, d).transpose(1, 2, 0, 3).reshape(seq, b, d)


# ----------------------------- parameter init -----------------------------

def init_block_params(key, width):
    ks = jax.random.split(key, 6)
    d = width
    s = 0.02
    wdt = jnp.bfloat16
    # Generate in PyTorch (Dout, Din) layout, transpose ONCE to (Din, Dout) and
    # store as bf16 so every kernel consumes MXU-ready operands directly.
    in_proj_w = (jax.random.normal(ks[0], (3 * d, d), jnp.float32) * s).T.astype(wdt)
    out_proj_w = (jax.random.normal(ks[2], (d, d), jnp.float32) * s).T.astype(wdt)
    fc_w = (jax.random.normal(ks[3], (4 * d, d), jnp.float32) * s).T.astype(wdt)
    proj_w = (jax.random.normal(ks[5], (d, 4 * d), jnp.float32) * s).T.astype(wdt)
    return {
        "ln1_g": jnp.ones((1, d), jnp.float32),
        "ln1_b": jnp.zeros((1, d), jnp.float32),
        "in_proj_w": in_proj_w,                                    # (d, 3d) bf16
        "in_proj_b": (jax.random.normal(ks[1], (3 * d,), jnp.float32) * s).reshape(1, 3 * d),
        "out_proj_w": out_proj_w,                                  # (d, d) bf16
        "out_proj_b": jnp.zeros((1, d), jnp.float32),
        "ln2_g": jnp.ones((1, d), jnp.float32),
        "ln2_b": jnp.zeros((1, d), jnp.float32),
        "fc_w": fc_w,                                              # (d, 4d) bf16
        "fc_b": (jax.random.normal(ks[4], (4 * d,), jnp.float32) * s).reshape(1, 4 * d),
        "proj_w": proj_w,                                          # (4d, d) bf16
        "proj_b": jnp.zeros((1, d), jnp.float32),
    }


def init_transformer_params(key, width, layers):
    # Matches the PyTorch quirk: the module builds (layers - 1) blocks.
    n_blocks = layers - 1
    keys = jax.random.split(key, max(n_blocks, 1))
    return [init_block_params(keys[i], width) for i in range(n_blocks)]


# ----------------------------- pure-JAX reference -----------------------------

def _reference_forward(x, params, n_head, n_f):
    """Mirror of the PyTorch forward (bf16 matmul operands, f32 stats)."""
    f32 = jnp.float32

    def cast(v):  # mirror the kernels' bf16 rounding of MXU operands
        return v.astype(jnp.bfloat16).astype(f32)

    def ln(v, g, bt):
        mu = jnp.mean(v, axis=-1, keepdims=True)
        var = jnp.mean(jnp.square(v - mu), axis=-1, keepdims=True)
        return (v - mu) * lax.rsqrt(var + 1e-5) * g.reshape(-1) + bt.reshape(-1)

    seq, b, d = x.shape
    n = seq // n_f
    hd = d // n_head
    scale = 1.0 / float(hd) ** 0.5

    for p in params:
        w_in = p["in_proj_w"].astype(f32)
        b_in = p["in_proj_b"].astype(f32).reshape(-1)

        y = ln(x, p["ln1_g"], p["ln1_b"])
        qkv = cast(y) @ w_in + b_in
        q_a, k_a, v_a = qkv[..., :d], qkv[..., d:2 * d], qkv[..., 2 * d:]

        def mha(q, k, v):
            Lq, B, _ = q.shape
            Lk = k.shape[0]
            qh = cast(q).reshape(Lq, B, n_head, hd).transpose(1, 2, 0, 3)
            kh = cast(k).reshape(Lk, B, n_head, hd).transpose(1, 2, 0, 3)
            vh = cast(v).reshape(Lk, B, n_head, hd).transpose(1, 2, 0, 3)
            s = jnp.einsum("bhqd,bhkd->bhqk", qh, kh) * scale
            pr = jax.nn.softmax(s, axis=-1)
            o = jnp.einsum("bhqk,bhkd->bhqd", cast(pr), vh)
            return o.transpose(2, 0, 1, 3).reshape(Lq, B, d)

        q4 = q_a.reshape(n_f, n, b, d)
        cls_out = mha(q4[:, 0], k_a, v_a)                                # (f, b, d)
        q_tok = q4[:, 1:].transpose(1, 0, 2, 3).reshape(n - 1, n_f * b, d)
        k_frm = k_a.reshape(n_f, n, b, d).transpose(1, 0, 2, 3).reshape(n, n_f * b, d)
        v_frm = v_a.reshape(n_f, n, b, d).transpose(1, 0, 2, 3).reshape(n, n_f * b, d)
        tok_out = mha(q_tok, k_frm, v_frm)
        tok_out = tok_out.reshape(n - 1, n_f, b, d).transpose(1, 0, 2, 3)
        attn_o = jnp.concatenate([cls_out[:, None], tok_out], axis=1).reshape(seq, b, d)

        x = x + cast(attn_o) @ p["out_proj_w"].astype(f32) + p["out_proj_b"].reshape(-1)

        y2 = ln(x, p["ln2_g"], p["ln2_b"])
        h = cast(y2) @ p["fc_w"].astype(f32) + p["fc_b"].astype(f32).reshape(-1)
        h = h * jax.nn.sigmoid(1.702 * h)
        x = x + cast(h) @ p["proj_w"].astype(f32) + p["proj_b"].reshape(-1)
    return x


# ----------------------------- main -----------------------------

if __name__ == "__main__":
    width, layers, heads = 32, 3, 4    # -> 2 residual blocks
    n_f = 4                            # frames
    n_tok = 5                          # 1 CLS + 4 patch tokens per frame
    batch = 2
    seq = n_f * n_tok                  # 20

    key = jax.random.PRNGKey(0)
    k_x, k_p = jax.random.split(key)
    x = jax.random.normal(k_x, (seq, batch, width), jnp.float32)
    params = init_transformer_params(k_p, width, layers)

    fwd = jax.jit(functools.partial(transformer_forward, n_head=heads, n_f=n_f))
    out = fwd(x, params)
    jax.block_until_ready(out)
    assert out.shape == (seq, batch, width)

    ref = _reference_forward(x, params, heads, n_f)
    err = float(jnp.max(jnp.abs(out - ref)))
    assert err < 2e-2, f"max abs error vs reference: {err}"

    print("KERNEL_OK")
</pallas_src>

<mosaic_0001>
module attributes {stable_mosaic.version = 11 : i64} {
  func.func @_ln_matmul_kernel(%arg0: i32, %arg1: i32, %arg2: memref<40x32xf32, #tpu.memory_space<vmem>>, %arg3: memref<1x32xf32, #tpu.memory_space<vmem>>, %arg4: memref<1x32xf32, #tpu.memory_space<vmem>>, %arg5: memref<32x96xbf16, #tpu.memory_space<vmem>>, %arg6: memref<1x96xf32, #tpu.memory_space<vmem>>, %arg7: memref<40x96xbf16, #tpu.memory_space<vmem>>, %arg8: memref<40x32xbf16, #tpu.memory_space<vmem>>) attributes {dimension_semantics = [#tpu.dimension_semantics<parallel>, #tpu.dimension_semantics<arbitrary>], iteration_bounds = array<i64: 1, 1>, scalar_prefetch = 0 : i64, scratch_operands = 1 : i64, tpu.core_type = #tpu.core_type<tc>, window_params = [{transform_indices = @transform_0, window_bounds = array<i64: 40, 32>}, {pipeline_mode = #tpu.pipeline_mode<synchronous>, transform_indices = @transform_1, window_bounds = array<i64: 1, 32>}, {pipeline_mode = #tpu.pipeline_mode<synchronous>, transform_indices = @transform_2, window_bounds = array<i64: 1, 32>}, {transform_indices = @transform_3, window_bounds = array<i64: 32, 96>}, {transform_indices = @transform_4, window_bounds = array<i64: 1, 96>}, {transform_indices = @transform_5, window_bounds = array<i64: 40, 96>}]} {
    %c0_i32 = arith.constant 0 : i32
    %0 = arith.cmpi eq, %arg1, %c0_i32 : i32
    %1 = arith.extui %0 : i1 to i32
    %c0_i32_0 = arith.constant 0 : i32
    %2 = arith.cmpi ne, %1, %c0_i32_0 : i32
    scf.if %2 {
      %c0_8 = arith.constant 0 : index
      %c0_9 = arith.constant 0 : index
      %11 = vector.load %arg2[%c0_8, %c0_9] : memref<40x32xf32, #tpu.memory_space<vmem>>, vector<40x32xf32>
      %cst_10 = arith.constant dense<0.000000e+00> : vector<40xf32>
      %12 = vector.multi_reduction <add>, %11, %cst_10 [1] : vector<40x32xf32> to vector<40xf32>
      %13 = vector.shape_cast %12 : vector<40xf32> to vector<40x1xf32>
      %cst_11 = arith.constant 3.200000e+01 : f32
      %14 = vector.broadcast %cst_11 : f32 to vector<40x1xf32>
      %15 = arith.divf %13, %14 : vector<40x1xf32>
      %16 = vector.broadcast %15 : vector<40x1xf32> to vector<40x32xf32>
      %17 = arith.subf %11, %16 : vector<40x32xf32>
      %18 = arith.mulf %17, %17 : vector<40x32xf32>
      %cst_12 = arith.constant dense<0.000000e+00> : vector<40xf32>
      %19 = vector.multi_reduction <add>, %18, %cst_12 [1] : vector<40x32xf32> to vector<40xf32>
      %20 = vector.shape_cast %19 : vector<40xf32> to vector<40x1xf32>
      %cst_13 = arith.constant 3.200000e+01 : f32
      %21 = vector.broadcast %cst_13 : f32 to vector<40x1xf32>
      %22 = arith.divf %20, %21 : vector<40x1xf32>
      %23 = vector.broadcast %15 : vector<40x1xf32> to vector<40x32xf32>
      %24 = arith.subf %11, %23 : vector<40x32xf32>
      %cst_14 = arith.constant 9.99999974E-6 : f32
      %25 = vector.broadcast %cst_14 : f32 to vector<40x1xf32>
      %26 = arith.addf %22, %25 : vector<40x1xf32>
      %27 = math.rsqrt %26 : vector<40x1xf32>
      %28 = vector.broadcast %27 : vector<40x1xf32> to vector<40x32xf32>
      %29 = arith.mulf %24, %28 : vector<40x32xf32>
      %c0_15 = arith.constant 0 : index
      %c0_16 = arith.constant 0 : index
      %30 = vector.load %arg3[%c0_15, %c0_16] : memref<1x32xf32, #tpu.memory_space<vmem>>, vector<1x32xf32>
      %31 = vector.broadcast %30 : vector<1x32xf32> to vector<40x32xf32>
      %32 = arith.mulf %29, %31 : vector<40x32xf32>
      %c0_17 = arith.constant 0 : index
      %c0_18 = arith.constant 0 : index
      %33 = vector.load %arg4[%c0_17, %c0_18] : memref<1x32xf32, #tpu.memory_space<vmem>>, vector<1x32xf32>
      %34 = vector.broadcast %33 : vector<1x32xf32> to vector<40x32xf32>
      %35 = arith.addf %32, %34 : vector<40x32xf32>
      %36 = arith.truncf %35 : vector<40x32xf32> to vector<40x32xbf16>
      %c0_19 = arith.constant 0 : index
      %c0_20 = arith.constant 0 : index
      %37 = vector.load %arg8[%c0_19, %c0_20] : memref<40x32xbf16, #tpu.memory_space<vmem>>, vector<40x32xbf16>
      tpu.vector_store %arg8[%c0_19, %c0_20], %36 {strides = array<i32>} : memref<40x32xbf16, #tpu.memory_space<vmem>>, vector<40x32xbf16>,
    } else {
    }
    %c0 = arith.constant 0 : index
    %c0_1 = arith.constant 0 : index
    %3 = vector.load %arg8[%c0, %c0_1] : memref<40x32xbf16, #tpu.memory_space<vmem>>, vector<40x32xbf16>
    %c0_2 = arith.constant 0 : index
    %c0_3 = arith.constant 0 : index
    %4 = vector.load %arg5[%c0_2, %c0_3] : memref<32x96xbf16, #tpu.memory_space<vmem>>, vector<32x96xbf16>
    %cst = arith.constant dense<0.000000e+00> : vector<40x96xf32>
    %5 = tpu.matmul %3, %4, %cst {dimension_numbers = #tpu.dot_dimension_numbers<[1], [0], [0], [1], [0, 0, 1, 1], [], []>} : vector<40x32xbf16>, vector<32x96xbf16>, vector<40x96xf32> -> vector<40x96xf32>
    %c0_4 = arith.constant 0 : index
    %c0_5 = arith.constant 0 : index
    %6 = vector.load %arg6[%c0_4, %c0_5] : memref<1x96xf32, #tpu.memory_space<vmem>>, vector<1x96xf32>
    %7 = vector.broadcast %6 : vector<1x96xf32> to vector<40x96xf32>
    %8 = arith.addf %5, %7 : vector<40x96xf32>
    %9 = arith.truncf %8 : vector<40x96xf32> to vector<40x96xbf16>
    %c0_6 = arith.constant 0 : index
    %c0_7 = arith.constant 0 : index
    %10 = vector.load %arg7[%c0_6, %c0_7] : memref<40x96xbf16, #tpu.memory_space<vmem>>, vector<40x96xbf16>
    tpu.vector_store %arg7[%c0_6, %c0_7], %9 {strides = array<i32>} : memref<40x96xbf16, #tpu.memory_space<vmem>>, vector<40x96xbf16>,
    return
  }
  func.func @transform_0(%arg0: i32, %arg1: i32) -> (i32, i32) {
    %c0_i32 = arith.constant 0 : i32
    %c0_i32_0 = arith.constant 0 : i32
    return %arg0, %c0_i32 : i32, i32
  }
  func.func @transform_1(%arg0: i32, %arg1: i32) -> (i32, i32) {
    %c0_i32 = arith.constant 0 : i32
    %c0_i32_0 = arith.constant 0 : i32
    %c0_i32_1 = arith.constant 0 : i32
    return %c0_i32, %c0_i32_0 : i32, i32
  }
  func.func @transform_2(%arg0: i32, %arg1: i32) -> (i32, i32) {
    %c0_i32 = arith.constant 0 : i32
    %c0_i32_0 = arith.constant 0 : i32
    %c0_i32_1 = arith.constant 0 : i32
    return %c0_i32, %c0_i32_0 : i32, i32
  }
  func.func @transform_3(%arg0: i32, %arg1: i32) -> (i32, i32) {
    %c0_i32 = arith.constant 0 : i32
    %c0_i32_0 = arith.constant 0 : i32
    return %c0_i32, %arg1 : i32, i32
  }
  func.func @transform_4(%arg0: i32, %arg1: i32) -> (i32, i32) {
    %c0_i32 = arith.constant 0 : i32
    %c0_i32_0 = arith.constant 0 : i32
    return %c0_i32, %arg1 : i32, i32
  }
  func.func @transform_5(%arg0: i32, %arg1: i32) -> (i32, i32) {
    %c0_i32 = arith.constant 0 : i32
    return %arg0, %arg1 : i32, i32
  }
}

module attributes {stable_mosaic.version = 11 : i64} {
  func.func @_matmul_res_kernel(%arg0: i32, %arg1: i32, %arg2: i32, %arg3: memref<40x32xbf16, #tpu.memory_space<vmem>>, %arg4: memref<32x32xbf16, #tpu.memory_space<vmem>>, %arg5: memref<1x32xf32, #tpu.memory_space<vmem>>, %arg6: memref<40x32xf32, #tpu.memory_space<vmem>>, %arg7: memref<40x32xf32, #tpu.memory_space<vmem>>, %arg8: memref<40x32xf32, #tpu.memory_space<vmem>>) attributes {dimension_semantics = [#tpu.dimension_semantics<parallel>, #tpu.dimension_semantics<parallel>, #tpu.dimension_semantics<arbitrary>], iteration_bounds = array<i64: 1, 1, 1>, scalar_prefetch = 0 : i64, scratch_operands = 1 : i64, tpu.core_type = #tpu.core_type<tc>, window_params = [{transform_indices = @transform_0, window_bounds = array<i64: 40, 32>}, {transform_indices = @transform_1, window_bounds = array<i64: 32, 32>}, {transform_indices = @transform_2, window_bounds = array<i64: 1, 32>}, {transform_indices = @transform_3, window_bounds = array<i64: 40, 32>}, {transform_indices = @transform_4, window_bounds = array<i64: 40, 32>}]} {
    %c0_i32 = arith.constant 0 : i32
    %0 = arith.cmpi eq, %arg2, %c0_i32 : i32
    %1 = arith.extui %0 : i1 to i32
    %c0_i32_0 = arith.constant 0 : i32
    %2 = arith.cmpi ne, %1, %c0_i32_0 : i32
    scf.if %2 {
      %cst_10 = arith.constant 0.000000e+00 : f32
      %12 = vector.broadcast %cst_10 : f32 to vector<40x32xf32>
      %c0_11 = arith.constant 0 : index
      %c0_12 = arith.constant 0 : index
      %13 = vector.load %arg8[%c0_11, %c0_12] : memref<40x32xf32, #tpu.memory_space<vmem>>, vector<40x32xf32>
      tpu.vector_store %arg8[%c0_11, %c0_12], %12 {strides = array<i32>} : memref<40x32xf32, #tpu.memory_space<vmem>>, vector<40x32xf32>,
    } else {
    }
    %c0 = arith.constant 0 : index
    %c0_1 = arith.constant 0 : index
    %3 = vector.load %arg8[%c0, %c0_1] : memref<40x32xf32, #tpu.memory_space<vmem>>, vector<40x32xf32>
    %c0_2 = arith.constant 0 : index
    %c0_3 = arith.constant 0 : index
    %4 = vector.load %arg3[%c0_2, %c0_3] : memref<40x32xbf16, #tpu.memory_space<vmem>>, vector<40x32xbf16>
    %c0_4 = arith.constant 0 : index
    %c0_5 = arith.constant 0 : index
    %5 = vector.load %arg4[%c0_4, %c0_5] : memref<32x32xbf16, #tpu.memory_space<vmem>>, vector<32x32xbf16>
    %cst = arith.constant dense<0.000000e+00> : vector<40x32xf32>
    %6 = tpu.matmul %4, %5, %cst {dimension_numbers = #tpu.dot_dimension_numbers<[1], [0], [0], [1], [0, 0, 1, 1], [], []>} : vector<40x32xbf16>, vector<32x32xbf16>, vector<40x32xf32> -> vector<40x32xf32>
    %7 = arith.addf %3, %6 : vector<40x32xf32>
    %c0_6 = arith.constant 0 : index
    %c0_7 = arith.constant 0 : index
    %8 = vector.load %arg8[%c0_6, %c0_7] : memref<40x32xf32, #tpu.memory_space<vmem>>, vector<40x32xf32>
    tpu.vector_store %arg8[%c0_6, %c0_7], %7 {strides = array<i32>} : memref<40x32xf32, #tpu.memory_space<vmem>>, vector<40x32xf32>,
    %c0_i32_8 = arith.constant 0 : i32
    %9 = arith.cmpi eq, %arg2, %c0_i32_8 : i32
    %10 = arith.extui %9 : i1 to i32
    %c0_i32_9 = arith.constant 0 : i32
    %11 = arith.cmpi ne, %10, %c0_i32_9 : i32
    scf.if %11 {
      %c0_10 = arith.constant 0 : index
      %c0_11 = arith.constant 0 : index
      %12 = vector.load %arg8[%c0_10, %c0_11] : memref<40x32xf32, #tpu.memory_space<vmem>>, vector<40x32xf32>
      %c0_12 = arith.constant 0 : index
      %c0_13 = arith.constant 0 : index
      %13 = vector.load %arg5[%c0_12, %c0_13] : memref<1x32xf32, #tpu.memory_space<vmem>>, vector<1x32xf32>
      %14 = vector.broadcast %13 : vector<1x32xf32> to vector<40x32xf32>
      %15 = arith.addf %12, %14 : vector<40x32xf32>
      %c0_14 = arith.constant 0 : index
      %c0_15 = arith.constant 0 : index
      %16 = vector.load %arg6[%c0_14, %c0_15] : memref<40x32xf32, #tpu.memory_space<vmem>>, vector<40x32xf32>
      %17 = arith.addf %15, %16 : vector<40x32xf32>
      %c0_16 = arith.constant 0 : index
      %c0_17 = arith.constant 0 : index
      %18 = vector.load %arg7[%c0_16, %c0_17] : memref<40x32xf32, #tpu.memory_space<vmem>>, vector<40x32xf32>
      tpu.vector_store %arg7[%c0_16, %c0_17], %17 {strides = array<i32>} : memref<40x32xf32, #tpu.memory_space<vmem>>, vector<40x32xf32>,
    } else {
    }
    return
  }
  func.func @transform_0(%arg0: i32, %arg1: i32, %arg2: i32) -> (i32, i32) {
    %c0_i32 = arith.constant 0 : i32
    return %arg0, %arg2 : i32, i32
  }
  func.func @transform_1(%arg0: i32, %arg1: i32, %arg2: i32) -> (i32, i32) {
    %c0_i32 = arith.constant 0 : i32
    return %arg2, %arg1 : i32, i32
  }
  func.func @transform_2(%arg0: i32, %arg1: i32, %arg2: i32) -> (i32, i32) {
    %c0_i32 = arith.constant 0 : i32
    %c0_i32_0 = arith.constant 0 : i32
    return %c0_i32, %arg1 : i32, i32
  }
  func.func @transform_3(%arg0: i32, %arg1: i32, %arg2: i32) -> (i32, i32) {
    %c0_i32 = arith.constant 0 : i32
    return %arg0, %arg1 : i32, i32
  }
  func.func @transform_4(%arg0: i32, %arg1: i32, %arg2: i32) -> (i32, i32) {
    %c0_i32 = arith.constant 0 : i32
    return %arg0, %arg1 : i32, i32
  }
}

module attributes {stable_mosaic.version = 11 : i64} {
  func.func @_ln_matmul_kernel(%arg0: i32, %arg1: i32, %arg2: memref<40x32xf32, #tpu.memory_space<vmem>>, %arg3: memref<1x32xf32, #tpu.memory_space<vmem>>, %arg4: memref<1x32xf32, #tpu.memory_space<vmem>>, %arg5: memref<32x128xbf16, #tpu.memory_space<vmem>>, %arg6: memref<1x128xf32, #tpu.memory_space<vmem>>, %arg7: memref<40x128xbf16, #tpu.memory_space<vmem>>, %arg8: memref<40x32xbf16, #tpu.memory_space<vmem>>) attributes {dimension_semantics = [#tpu.dimension_semantics<parallel>, #tpu.dimension_semantics<arbitrary>], iteration_bounds = array<i64: 1, 1>, scalar_prefetch = 0 : i64, scratch_operands = 1 : i64, tpu.core_type = #tpu.core_type<tc>, window_params = [{transform_indices = @transform_0, window_bounds = array<i64: 40, 32>}, {pipeline_mode = #tpu.pipeline_mode<synchronous>, transform_indices = @transform_1, window_bounds = array<i64: 1, 32>}, {pipeline_mode = #tpu.pipeline_mode<synchronous>, transform_indices = @transform_2, window_bounds = array<i64: 1, 32>}, {transform_indices = @transform_3, window_bounds = array<i64: 32, 128>}, {transform_indices = @transform_4, window_bounds = array<i64: 1, 128>}, {transform_indices = @transform_5, window_bounds = array<i64: 40, 128>}]} {
    %c0_i32 = arith.constant 0 : i32
    %0 = arith.cmpi eq, %arg1, %c0_i32 : i32
    %1 = arith.extui %0 : i1 to i32
    %c0_i32_0 = arith.constant 0 : i32
    %2 = arith.cmpi ne, %1, %c0_i32_0 : i32
    scf.if %2 {
      %c0_10 = arith.constant 0 : index
      %c0_11 = arith.constant 0 : index
      %19 = vector.load %arg2[%c0_10, %c0_11] : memref<40x32xf32, #tpu.memory_space<vmem>>, vector<40x32xf32>
      %cst_12 = arith.constant dense<0.000000e+00> : vector<40xf32>
      %20 = vector.multi_reduction <add>, %19, %cst_12 [1] : vector<40x32xf32> to vector<40xf32>
      %21 = vector.shape_cast %20 : vector<40xf32> to vector<40x1xf32>
      %cst_13 = arith.constant 3.200000e+01 : f32
      %22 = vector.broadcast %cst_13 : f32 to vector<40x1xf32>
      %23 = arith.divf %21, %22 : vector<40x1xf32>
      %24 = vector.broadcast %23 : vector<40x1xf32> to vector<40x32xf32>
      %25 = arith.subf %19, %24 : vector<40x32xf32>
      %26 = arith.mulf %25, %25 : vector<40x32xf32>
      %cst_14 = arith.constant dense<0.000000e+00> : vector<40xf32>
      %27 = vector.multi_reduction <add>, %26, %cst_14 [1] : vector<40x32xf32> to vector<40xf32>
      %28 = vector.shape_cast %27 : vector<40xf32> to vector<40x1xf32>
      %cst_15 = arith.constant 3.200000e+01 : f32
      %29 = vector.broadcast %cst_15 : f32 to vector<40x1xf32>
      %30 = arith.divf %28, %29 : vector<40x1xf32>
      %31 = vector.broadcast %23 : vector<40x1xf32> to vector<40x32xf32>
      %32 = arith.subf %19, %31 : vector<40x32xf32>
      %cst_16 = arith.constant 9.99999974E-6 : f32
      %33 = vector.broadcast %cst_16 : f32 to vector<40x1xf32>
      %34 = arith.addf %30, %33 : vector<40x1xf32>
      %35 = math.rsqrt %34 : vector<40x1xf32>
      %36 = vector.broadcast %35 : vector<40x1xf32> to vector<40x32xf32>
      %37 = arith.mulf %32, %36 : vector<40x32xf32>
      %c0_17 = arith.constant 0 : index
      %c0_18 = arith.constant 0 : index
      %38 = vector.load %arg3[%c0_17, %c0_18] : memref<1x32xf32, #tpu.memory_space<vmem>>, vector<1x32xf32>
      %39 = vector.broadcast %38 : vector<1x32xf32> to vector<40x32xf32>
      %40 = arith.mulf %37, %39 : vector<40x32xf32>
      %c0_19 = arith.constant 0 : index
      %c0_20 = arith.constant 0 : index
      %41 = vector.load %arg4[%c0_19, %c0_20] : memref<1x32xf32, #tpu.memory_space<vmem>>, vector<1x32xf32>
      %42 = vector.broadcast %41 : vector<1x32xf32> to vector<40x32xf32>
      %43 = arith.addf %40, %42 : vector<40x32xf32>
      %44 = arith.truncf %43 : vector<40x32xf32> to vector<40x32xbf16>
      %c0_21 = arith.constant 0 : index
      %c0_22 = arith.constant 0 : index
      %45 = vector.load %arg8[%c0_21, %c0_22] : memref<40x32xbf16, #tpu.memory_space<vmem>>, vector<40x32xbf16>
      tpu.vector_store %arg8[%c0_21, %c0_22], %44 {strides = array<i32>} : memref<40x32xbf16, #tpu.memory_space<vmem>>, vector<40x32xbf16>,
    } else {
    }
    %c0 = arith.constant 0 : index
    %c0_1 = arith.constant 0 : index
    %3 = vector.load %arg8[%c0, %c0_1] : memref<40x32xbf16, #tpu.memory_space<vmem>>, vector<40x32xbf16>
    %c0_2 = arith.constant 0 : index
    %c0_3 = arith.constant 0 : index
    %4 = vector.load %arg5[%c0_2, %c0_3] : memref<32x128xbf16, #tpu.memory_space<vmem>>, vector<32x128xbf16>
    %cst = arith.constant dense<0.000000e+00> : vector<40x128xf32>
    %5 = tpu.matmul %3, %4, %cst {dimension_numbers = #tpu.dot_dimension_numbers<[1], [0], [0], [1], [0, 0, 1, 1], [], []>} : vector<40x32xbf16>, vector<32x128xbf16>, vector<40x128xf32> -> vector<40x128xf32>
    %c0_4 = arith.constant 0 : index
    %c0_5 = arith.constant 0 : index
    %6 = vector.load %arg6[%c0_4, %c0_5] : memref<1x128xf32, #tpu.memory_space<vmem>>, vector<1x128xf32>
    %7 = vector.broadcast %6 : vector<1x128xf32> to vector<40x128xf32>
    %8 = arith.addf %5, %7 : vector<40x128xf32>
    %cst_6 = arith.constant 1.702000e+00 : f32
    %9 = vector.broadcast %cst_6 : f32 to vector<40x128xf32>
    %10 = arith.mulf %9, %8 : vector<40x128xf32>
    %11 = arith.negf %10 : vector<40x128xf32>
    %12 = math.exp %11 : vector<40x128xf32>
    %cst_7 = arith.constant 1.000000e+00 : f32
    %13 = vector.broadcast %cst_7 : f32 to vector<40x128xf32>
    %14 = arith.addf %13, %12 : vector<40x128xf32>
    %15 = arith.divf %13, %14 : vector<40x128xf32>
    %16 = arith.mulf %8, %15 : vector<40x128xf32>
    %17 = arith.truncf %16 : vector<40x128xf32> to vector<40x128xbf16>
    %c0_8 = arith.constant 0 : index
    %c0_9 = arith.constant 0 : index
    %18 = vector.load %arg7[%c0_8, %c0_9] : memref<40x128xbf16, #tpu.memory_space<vmem>>, vector<40x128xbf16>
    tpu.vector_store %arg7[%c0_8, %c0_9], %17 {strides = array<i32>} : memref<40x128xbf16, #tpu.memory_space<vmem>>, vector<40x128xbf16>,
    return
  }
  func.func @transform_0(%arg0: i32, %arg1: i32) -> (i32, i32) {
    %c0_i32 = arith.constant 0 : i32
    %c0_i32_0 = arith.constant 0 : i32
    return %arg0, %c0_i32 : i32, i32
  }
  func.func @transform_1(%arg0: i32, %arg1: i32) -> (i32, i32) {
    %c0_i32 = arith.constant 0 : i32
    %c0_i32_0 = arith.constant 0 : i32
    %c0_i32_1 = arith.constant 0 : i32
    return %c0_i32, %c0_i32_0 : i32, i32
  }
  func.func @transform_2(%arg0: i32, %arg1: i32) -> (i32, i32) {
    %c0_i32 = arith.constant 0 : i32
    %c0_i32_0 = arith.constant 0 : i32
    %c0_i32_1 = arith.constant 0 : i32
    return %c0_i32, %c0_i32_0 : i32, i32
  }
  func.func @transform_3(%arg0: i32, %arg1: i32) -> (i32, i32) {
    %c0_i32 = arith.constant 0 : i32
    %c0_i32_0 = arith.constant 0 : i32
    return %c0_i32, %arg1 : i32, i32
  }
  func.func @transform_4(%arg0: i32, %arg1: i32) -> (i32, i32) {
    %c0_i32 = arith.constant 0 : i32
    %c0_i32_0 = arith.constant 0 : i32
    return %c0_i32, %arg1 : i32, i32
  }
  func.func @transform_5(%arg0: i32, %arg1: i32) -> (i32, i32) {
    %c0_i32 = arith.constant 0 : i32
    return %arg0, %arg1 : i32, i32
  }
}

module attributes {stable_mosaic.version = 11 : i64} {
  func.func @_attn_kernel(%arg0: i32, %arg1: memref<1x20x96xbf16, #tpu.memory_space<vmem>>, %arg2: memref<1x20x32xbf16, #tpu.memory_space<vmem>>) attributes {dimension_semantics = [#tpu.dimension_semantics<parallel>], iteration_bounds = array<i64: 2>, scalar_prefetch = 0 : i64, scratch_operands = 0 : i64, tpu.core_type = #tpu.core_type<tc>, window_params = [{transform_indices = @transform_0, window_bounds = array<i64: 1, 20, 96>}, {transform_indices = @transform_1, window_bounds = array<i64: 1, 20, 32>}]} {
    %c0 = arith.constant 0 : index
    %c0_0 = arith.constant 0 : index
    %c0_1 = arith.constant 0 : index
    %0 = vector.load %arg1[%c0, %c0_0, %c0_1] : memref<1x20x96xbf16, #tpu.memory_space<vmem>>, vector<1x20x96xbf16>
    %1 = vector.shape_cast %0 : vector<1x20x96xbf16> to vector<20x96xbf16>
    %2 = vector.extract_strided_slice %1 {offsets = [0, 32], sizes = [20, 32], strides = [1, 1]} : vector<20x96xbf16> to vector<20x32xbf16>
    %3 = vector.extract_strided_slice %1 {offsets = [0, 64], sizes = [20, 32], strides = [1, 1]} : vector<20x96xbf16> to vector<20x32xbf16>
    %4 = vector.extract_strided_slice %1 {offsets = [0, 0], sizes = [1, 32], strides = [1, 1]} : vector<20x96xbf16> to vector<1x32xbf16>
    %5 = vector.extract_strided_slice %1 {offsets = [5, 0], sizes = [1, 32], strides = [1, 1]} : vector<20x96xbf16> to vector<1x32xbf16>
    %6 = vector.extract_strided_slice %1 {offsets = [10, 0], sizes = [1, 32], strides = [1, 1]} : vector<20x96xbf16> to vector<1x32xbf16>
    %7 = vector.extract_strided_slice %1 {offsets = [15, 0], sizes = [1, 32], strides = [1, 1]} : vector<20x96xbf16> to vector<1x32xbf16>
    %8 = tpu.concatenate %4, %5, %6, %7 in 0 : vector<1x32xbf16>, vector<1x32xbf16>, vector<1x32xbf16>, vector<1x32xbf16> -> vector<4x32xbf16>
    %9 = vector.extract_strided_slice %8 {offsets = [0, 0], sizes = [4, 8], strides = [1, 1]} : vector<4x32xbf16> to vector<4x8xbf16>
    %10 = vector.extract_strided_slice %2 {offsets = [0, 0], sizes = [20, 8], strides = [1, 1]} : vector<20x32xbf16> to vector<20x8xbf16>
    %cst = arith.constant dense<0.000000e+00> : vector<4x20xf32>
    %11 = tpu.matmul %9, %10, %cst {dimension_numbers = #tpu.dot_dimension_numbers<[1], [1], [0], [0], [0, 0, 1, 0], [], []>} : vector<4x8xbf16>, vector<20x8xbf16>, vector<4x20xf32> -> vector<4x20xf32>
    %cst_2 = arith.constant 0.353553385 : f32
    %12 = vector.broadcast %cst_2 : f32 to vector<4x20xf32>
    %13 = arith.mulf %11, %12 : vector<4x20xf32>
    %cst_3 = arith.constant dense<0xFF800000> : vector<4xf32>
    %14 = vector.multi_reduction <maximumf>, %13, %cst_3 [1] : vector<4x20xf32> to vector<4xf32>
    %15 = vector.shape_cast %14 : vector<4xf32> to vector<4x1xf32>
    %16 = vector.broadcast %15 : vector<4x1xf32> to vector<4x20xf32>
    %17 = arith.subf %13, %16 : vector<4x20xf32>
    %18 = math.exp %17 : vector<4x20xf32>
    %cst_4 = arith.constant dense<0.000000e+00> : vector<4xf32>
    %19 = vector.multi_reduction <add>, %18, %cst_4 [1] : vector<4x20xf32> to vector<4xf32>
    %20 = vector.shape_cast %19 : vector<4xf32> to vector<4x1xf32>
    %cst_5 = arith.constant 1.000000e+00 : f32
    %21 = vector.broadcast %cst_5 : f32 to vector<4x1xf32>
    %22 = arith.divf %21, %20 : vector<4x1xf32>
    %23 = vector.broadcast %22 : vector<4x1xf32> to vector<4x20xf32>
    %24 = arith.mulf %18, %23 : vector<4x20xf32>
    %25 = arith.truncf %24 : vector<4x20xf32> to vector<4x20xbf16>
    %26 = vector.extract_strided_slice %3 {offsets = [0, 0], sizes = [20, 8], strides = [1, 1]} : vector<20x32xbf16> to vector<20x8xbf16>
    %cst_6 = arith.constant dense<0.000000e+00> : vector<4x8xf32>
    %27 = tpu.matmul %25, %26, %cst_6 {dimension_numbers = #tpu.dot_dimension_numbers<[1], [0], [0], [1], [0, 0, 1, 1], [], []>} : vector<4x20xbf16>, vector<20x8xbf16>, vector<4x8xf32> -> vector<4x8xf32>
    %28 = vector.extract_strided_slice %8 {offsets = [0, 8], sizes = [4, 8], strides = [1, 1]} : vector<4x32xbf16> to vector<4x8xbf16>
    %29 = vector.extract_strided_slice %2 {offsets = [0, 8], sizes = [20, 8], strides = [1, 1]} : vector<20x32xbf16> to vector<20x8xbf16>
    %cst_7 = arith.constant dense<0.000000e+00> : vector<4x20xf32>
    %30 = tpu.matmul %28, %29, %cst_7 {dimension_numbers = #tpu.dot_dimension_numbers<[1], [1], [0], [0], [0, 0, 1, 0], [], []>} : vector<4x8xbf16>, vector<20x8xbf16>, vector<4x20xf32> -> vector<4x20xf32>
    %cst_8 = arith.constant 0.353553385 : f32
    %31 = vector.broadcast %cst_8 : f32 to vector<4x20xf32>
    %32 = arith.mulf %30, %31 : vector<4x20xf32>
    %cst_9 = arith.constant dense<0xFF800000> : vector<4xf32>
    %33 = vector.multi_reduction <maximumf>, %32, %cst_9 [1] : vector<4x20xf32> to vector<4xf32>
    %34 = vector.shape_cast %33 : vector<4xf32> to vector<4x1xf32>
    %35 = vector.broadcast %34 : vector<4x1xf32> to vector<4x20xf32>
    %36 = arith.subf %32, %35 : vector<4x20xf32>
    %37 = math.exp %36 : vector<4x20xf32>
    %cst_10 = arith.constant dense<0.000000e+00> : vector<4xf32>
    %38 = vector.multi_reduction <add>, %37, %cst_10 [1] : vector<4x20xf32> to vector<4xf32>
    %39 = vector.shape_cast %38 : vector<4xf32> to vector<4x1xf32>
    %cst_11 = arith.constant 1.000000e+00 : f32
    %40 = vector.broadcast %cst_11 : f32 to vector<4x1xf32>
    %41 = arith.divf %40, %39 : vector<4x1xf32>
    %42 = vector.broadcast %41 : vector<4x1xf32> to vector<4x20xf32>
    %43 = arith.mulf %37, %42 : vector<4x20xf32>
    %44 = arith.truncf %43 : vector<4x20xf32> to vector<4x20xbf16>
    %45 = vector.extract_strided_slice %3 {offsets = [0, 8], sizes = [20, 8], strides = [1, 1]} : vector<20x32xbf16> to vector<20x8xbf16>
    %cst_12 = arith.constant dense<0.000000e+00> : vector<4x8xf32>
    %46 = tpu.matmul %44, %45, %cst_12 {dimension_numbers = #tpu.dot_dimension_numbers<[1], [0], [0], [1], [0, 0, 1, 1], [], []>} : vector<4x20xbf16>, vector<20x8xbf16>, vector<4x8xf32> -> vector<4x8xf32>
    %47 = vector.extract_strided_slice %8 {offsets = [0, 16], sizes = [4, 8], strides = [1, 1]} : vector<4x32xbf16> to vector<4x8xbf16>
    %48 = vector.extract_strided_slice %2 {offsets = [0, 16], sizes = [20, 8], strides = [1, 1]} : vector<20x32xbf16> to vector<20x8xbf16>
    %cst_13 = arith.constant dense<0.000000e+00> : vector<4x20xf32>
    %49 = tpu.matmul %47, %48, %cst_13 {dimension_numbers = #tpu.dot_dimension_numbers<[1], [1], [0], [0], [0, 0, 1, 0], [], []>} : vector<4x8xbf16>, vector<20x8xbf16>, vector<4x20xf32> -> vector<4x20xf32>
    %cst_14 = arith.constant 0.353553385 : f32
    %50 = vector.broadcast %cst_14 : f32 to vector<4x20xf32>
    %51 = arith.mulf %49, %50 : vector<4x20xf32>
    %cst_15 = arith.constant dense<0xFF800000> : vector<4xf32>
    %52 = vector.multi_reduction <maximumf>, %51, %cst_15 [1] : vector<4x20xf32> to vector<4xf32>
    %53 = vector.shape_cast %52 : vector<4xf32> to vector<4x1xf32>
    %54 = vector.broadcast %53 : vector<4x1xf32> to vector<4x20xf32>
    %55 = arith.subf %51, %54 : vector<4x20xf32>
    %56 = math.exp %55 : vector<4x20xf32>
    %cst_16 = arith.constant dense<0.000000e+00> : vector<4xf32>
    %57 = vector.multi_reduction <add>, %56, %cst_16 [1] : vector<4x20xf32> to vector<4xf32>
    %58 = vector.shape_cast %57 : vector<4xf32> to vector<4x1xf32>
    %cst_17 = arith.constant 1.000000e+00 : f32
    %59 = vector.broadcast %cst_17 : f32 to vector<4x1xf32>
    %60 = arith.divf %59, %58 : vector<4x1xf32>
    %61 = vector.broadcast %60 : vector<4x1xf32> to vector<4x20xf32>
    %62 = arith.mulf %56, %61 : vector<4x20xf32>
    %63 = arith.truncf %62 : vector<4x20xf32> to vector<4x20xbf16>
    %64 = vector.extract_strided_slice %3 {offsets = [0, 16], sizes = [20, 8], strides = [1, 1]} : vector<20x32xbf16> to vector<20x8xbf16>
    %cst_18 = arith.constant dense<0.000000e+00> : vector<4x8xf32>
    %65 = tpu.matmul %63, %64, %cst_18 {dimension_numbers = #tpu.dot_dimension_numbers<[1], [0], [0], [1], [0, 0, 1, 1], [], []>} : vector<4x20xbf16>, vector<20x8xbf16>, vector<4x8xf32> -> vector<4x8xf32>
    %66 = vector.extract_strided_slice %8 {offsets = [0, 24], sizes = [4, 8], strides = [1, 1]} : vector<4x32xbf16> to vector<4x8xbf16>
    %67 = vector.extract_strided_slice %2 {offsets = [0, 24], sizes = [20, 8], strides = [1, 1]} : vector<20x32xbf16> to vector<20x8xbf16>
    %cst_19 = arith.constant dense<0.000000e+00> : vector<4x20xf32>
    %68 = tpu.matmul %66, %67, %cst_19 {dimension_numbers = #tpu.dot_dimension_numbers<[1], [1], [0], [0], [0, 0, 1, 0], [], []>} : vector<4x8xbf16>, vector<20x8xbf16>, vector<4x20xf32> -> vector<4x20xf32>
    %cst_20 = arith.constant 0.353553385 : f32
    %69 = vector.broadcast %cst_20 : f32 to vector<4x20xf32>
    %70 = arith.mulf %68, %69 : vector<4x20xf32>
    %cst_21 = arith.constant dense<0xFF800000> : vector<4xf32>
    %71 = vector.multi_reduction <maximumf>, %70, %cst_21 [1] : vector<4x20xf32> to vector<4xf32>
    %72 = vector.shape_cast %71 : vector<4xf32> to vector<4x1xf32>
    %73 = vector.broadcast %72 : vector<4x1xf32> to vector<4x20xf32>
    %74 = arith.subf %70, %73 : vector<4x20xf32>
    %75 = math.exp %74 : vector<4x20xf32>
    %cst_22 = arith.constant dense<0.000000e+00> : vector<4xf32>
    %76 = vector.multi_reduction <add>, %75, %cst_22 [1] : vector<4x20xf32> to vector<4xf32>
    %77 = vector.shape_cast %76 : vector<4xf32> to vector<4x1xf32>
    %cst_23 = arith.constant 1.000000e+00 : f32
    %78 = vector.broadcast %cst_23 : f32 to vector<4x1xf32>
    %79 = arith.divf %78, %77 : vector<4x1xf32>
    %80 = vector.broadcast %79 : vector<4x1xf32> to vector<4x20xf32>
    %81 = arith.mulf %75, %80 : vector<4x20xf32>
    %82 = arith.truncf %81 : vector<4x20xf32> to vector<4x20xbf16>
    %83 = vector.extract_strided_slice %3 {offsets = [0, 24], sizes = [20, 8], strides = [1, 1]} : vector<20x32xbf16> to vector<20x8xbf16>
    %cst_24 = arith.constant dense<0.000000e+00> : vector<4x8xf32>
    %84 = tpu.matmul %82, %83, %cst_24 {dimension_numbers = #tpu.dot_dimension_numbers<[1], [0], [0], [1], [0, 0, 1, 1], [], []>} : vector<4x20xbf16>, vector<20x8xbf16>, vector<4x8xf32> -> vector<4x8xf32>
    %85 = tpu.concatenate %27, %46, %65, %84 in 1 : vector<4x8xf32>, vector<4x8xf32>, vector<4x8xf32>, vector<4x8xf32> -> vector<4x32xf32>
    %86 = vector.extract_strided_slice %1 {offsets = [0, 0], sizes = [5, 96], strides = [1, 1]} : vector<20x96xbf16> to vector<5x96xbf16>
    %87 = vector.extract_strided_slice %86 {offsets = [1, 0], sizes = [4, 8], strides = [1, 1]} : vector<5x96xbf16> to vector<4x8xbf16>
    %88 = vector.extract_strided_slice %86 {offsets = [0, 32], sizes = [5, 8], strides = [1, 1]} : vector<5x96xbf16> to vector<5x8xbf16>
    %89 = vector.extract_strided_slice %86 {offsets = [0, 64], sizes = [5, 8], strides = [1, 1]} : vector<5x96xbf16> to vector<5x8xbf16>
    %cst_25 = arith.constant dense<0.000000e+00> : vector<4x5xf32>
    %90 = tpu.matmul %87, %88, %cst_25 {dimension_numbers = #tpu.dot_dimension_numbers<[1], [1], [0], [0], [0, 0, 1, 0], [], []>} : vector<4x8xbf16>, vector<5x8xbf16>, vector<4x5xf32> -> vector<4x5xf32>
    %cst_26 = arith.constant 0.353553385 : f32
    %91 = vector.broadcast %cst_26 : f32 to vector<4x5xf32>
    %92 = arith.mulf %90, %91 : vector<4x5xf32>
    %cst_27 = arith.constant dense<0xFF800000> : vector<4xf32>
    %93 = vector.multi_reduction <maximumf>, %92, %cst_27 [1] : vector<4x5xf32> to vector<4xf32>
    %94 = vector.shape_cast %93 : vector<4xf32> to vector<4x1xf32>
    %95 = vector.broadcast %94 : vector<4x1xf32> to vector<4x5xf32>
    %96 = arith.subf %92, %95 : vector<4x5xf32>
    %97 = math.exp %96 : vector<4x5xf32>
    %cst_28 = arith.constant dense<0.000000e+00> : vector<4xf32>
    %98 = vector.multi_reduction <add>, %97, %cst_28 [1] : vector<4x5xf32> to vector<4xf32>
    %99 = vector.shape_cast %98 : vector<4xf32> to vector<4x1xf32>
    %cst_29 = arith.constant 1.000000e+00 : f32
    %100 = vector.broadcast %cst_29 : f32 to vector<4x1xf32>
    %101 = arith.divf %100, %99 : vector<4x1xf32>
    %102 = vector.broadcast %101 : vector<4x1xf32> to vector<4x5xf32>
    %103 = arith.mulf %97, %102 : vector<4x5xf32>
    %104 = arith.truncf %103 : vector<4x5xf32> to vector<4x5xbf16>
    %cst_30 = arith.constant dense<0.000000e+00> : vector<4x8xf32>
    %105 = tpu.matmul %104, %89, %cst_30 {dimension_numbers = #tpu.dot_dimension_numbers<[1], [0], [0], [1], [0, 0, 1, 1], [], []>} : vector<4x5xbf16>, vector<5x8xbf16>, vector<4x8xf32> -> vector<4x8xf32>
    %106 = vector.extract_strided_slice %86 {offsets = [1, 8], sizes = [4, 8], strides = [1, 1]} : vector<5x96xbf16> to vector<4x8xbf16>
    %107 = vector.extract_strided_slice %86 {offsets = [0, 40], sizes = [5, 8], strides = [1, 1]} : vector<5x96xbf16> to vector<5x8xbf16>
    %108 = vector.extract_strided_slice %86 {offsets = [0, 72], sizes = [5, 8], strides = [1, 1]} : vector<5x96xbf16> to vector<5x8xbf16>
    %cst_31 = arith.constant dense<0.000000e+00> : vector<4x5xf32>
    %109 = tpu.matmul %106, %107, %cst_31 {dimension_numbers = #tpu.dot_dimension_numbers<[1], [1], [0], [0], [0, 0, 1, 0], [], []>} : vector<4x8xbf16>, vector<5x8xbf16>, vector<4x5xf32> -> vector<4x5xf32>
    %cst_32 = arith.constant 0.353553385 : f32
    %110 = vector.broadcast %cst_32 : f32 to vector<4x5xf32>
    %111 = arith.mulf %109, %110 : vector<4x5xf32>
    %cst_33 = arith.constant dense<0xFF800000> : vector<4xf32>
    %112 = vector.multi_reduction <maximumf>, %111, %cst_33 [1] : vector<4x5xf32> to vector<4xf32>
    %113 = vector.shape_cast %112 : vector<4xf32> to vector<4x1xf32>
    %114 = vector.broadcast %113 : vector<4x1xf32> to vector<4x5xf32>
    %115 = arith.subf %111, %114 : vector<4x5xf32>
    %116 = math.exp %115 : vector<4x5xf32>
    %cst_34 = arith.constant dense<0.000000e+00> : vector<4xf32>
    %117 = vector.multi_reduction <add>, %116, %cst_34 [1] : vector<4x5xf32> to vector<4xf32>
    %118 = vector.shape_cast %117 : vector<4xf32> to vector<4x1xf32>
    %cst_35 = arith.constant 1.000000e+00 : f32
    %119 = vector.broadcast %cst_35 : f32 to vector<4x1xf32>
    %120 = arith.divf %119, %118 : vector<4x1xf32>
    %121 = vector.broadcast %120 : vector<4x1xf32> to vector<4x5xf32>
    %122 = arith.mulf %116, %121 : vector<4x5xf32>
    %123 = arith.truncf %122 : vector<4x5xf32> to vector<4x5xbf16>
    %cst_36 = arith.constant dense<0.000000e+00> : vector<4x8xf32>
    %124 = tpu.matmul %123, %108, %cst_36 {dimension_numbers = #tpu.dot_dimension_numbers<[1], [0], [0], [1], [0, 0, 1, 1], [], []>} : vector<4x5xbf16>, vector<5x8xbf16>, vector<4x8xf32> -> vector<4x8xf32>
    %125 = vector.extract_strided_slice %86 {offsets = [1, 16], sizes = [4, 8], strides = [1, 1]} : vector<5x96xbf16> to vector<4x8xbf16>
    %126 = vector.extract_strided_slice %86 {offsets = [0, 48], sizes = [5, 8], strides = [1, 1]} : vector<5x96xbf16> to vector<5x8xbf16>
    %127 = vector.extract_strided_slice %86 {offsets = [0, 80], sizes = [5, 8], strides = [1, 1]} : vector<5x96xbf16> to vector<5x8xbf16>
    %cst_37 = arith.constant dense<0.000000e+00> : vector<4x5xf32>
    %128 = tpu.matmul %125, %126, %cst_37 {dimension_numbers = #tpu.dot_dimension_numbers<[1], [1], [0], [0], [0, 0, 1, 0], [], []>} : vector<4x8xbf16>, vector<5x8xbf16>, vector<4x5xf32> -> vector<4x5xf32>
    %cst_38 = arith.constant 0.353553385 : f32
    %129 = vector.broadcast %cst_38 : f32 to vector<4x5xf32>
    %130 = arith.mulf %128, %129 : vector<4x5xf32>
    %cst_39 = arith.constant dense<0xFF800000> : vector<4xf32>
    %131 = vector.multi_reduction <maximumf>, %130, %cst_39 [1] : vector<4x5xf32> to vector<4xf32>
    %132 = vector.shape_cast %131 : vector<4xf32> to vector<4x1xf32>
    %133 = vector.broadcast %132 : vector<4x1xf32> to vector<4x5xf32>
    %134 = arith.subf %130, %133 : vector<4x5xf32>
    %135 = math.exp %134 : vector<4x5xf32>
    %cst_40 = arith.constant dense<0.000000e+00> : vector<4xf32>
    %136 = vector.multi_reduction <add>, %135, %cst_40 [1] : vector<4x5xf32> to vector<4xf32>
    %137 = vector.shape_cast %136 : vector<4xf32> to vector<4x1xf32>
    %cst_41 = arith.constant 1.000000e+00 : f32
    %138 = vector.broadcast %cst_41 : f32 to vector<4x1xf32>
    %139 = arith.divf %138, %137 : vector<4x1xf32>
    %140 = vector.broadcast %139 : vector<4x1xf32> to vector<4x5xf32>
    %141 = arith.mulf %135, %140 : vector<4x5xf32>
    %142 = arith.truncf %141 : vector<4x5xf32> to vector<4x5xbf16>
    %cst_42 = arith.constant dense<0.000000e+00> : vector<4x8xf32>
    %143 = tpu.matmul %142, %127, %cst_42 {dimension_numbers = #tpu.dot_dimension_numbers<[1], [0], [0], [1], [0, 0, 1, 1], [], []>} : vector<4x5xbf16>, vector<5x8xbf16>, vector<4x8xf32> -> vector<4x8xf32>
    %144 = vector.extract_strided_slice %86 {offsets = [1, 24], sizes = [4, 8], strides = [1, 1]} : vector<5x96xbf16> to vector<4x8xbf16>
    %145 = vector.extract_strided_slice %86 {offsets = [0, 56], sizes = [5, 8], strides = [1, 1]} : vector<5x96xbf16> to vector<5x8xbf16>
    %146 = vector.extract_strided_slice %86 {offsets = [0, 88], sizes = [5, 8], strides = [1, 1]} : vector<5x96xbf16> to vector<5x8xbf16>
    %cst_43 = arith.constant dense<0.000000e+00> : vector<4x5xf32>
    %147 = tpu.matmul %144, %145, %cst_43 {dimension_numbers = #tpu.dot_dimension_numbers<[1], [1], [0], [0], [0, 0, 1, 0], [], []>} : vector<4x8xbf16>, vector<5x8xbf16>, vector<4x5xf32> -> vector<4x5xf32>
    %cst_44 = arith.constant 0.353553385 : f32
    %148 = vector.broadcast %cst_44 : f32 to vector<4x5xf32>
    %149 = arith.mulf %147, %148 : vector<4x5xf32>
    %cst_45 = arith.constant dense<0xFF800000> : vector<4xf32>
    %150 = vector.multi_reduction <maximumf>, %149, %cst_45 [1] : vector<4x5xf32> to vector<4xf32>
    %151 = vector.shape_cast %150 : vector<4xf32> to vector<4x1xf32>
    %152 = vector.broadcast %151 : vector<4x1xf32> to vector<4x5xf32>
    %153 = arith.subf %149, %152 : vector<4x5xf32>
    %154 = math.exp %153 : vector<4x5xf32>
    %cst_46 = arith.constant dense<0.000000e+00> : vector<4xf32>
    %155 = vector.multi_reduction <add>, %154, %cst_46 [1] : vector<4x5xf32> to vector<4xf32>
    %156 = vector.shape_cast %155 : vector<4xf32> to vector<4x1xf32>
    %cst_47 = arith.constant 1.000000e+00 : f32
    %157 = vector.broadcast %cst_47 : f32 to vector<4x1xf32>
    %158 = arith.divf %157, %156 : vector<4x1xf32>
    %159 = vector.broadcast %158 : vector<4x1xf32> to vector<4x5xf32>
    %160 = arith.mulf %154, %159 : vector<4x5xf32>
    %161 = arith.truncf %160 : vector<4x5xf32> to vector<4x5xbf16>
    %cst_48 = arith.constant dense<0.000000e+00> : vector<4x8xf32>
    %162 = tpu.matmul %161, %146, %cst_48 {dimension_numbers = #tpu.dot_dimension_numbers<[1], [0], [0], [1], [0, 0, 1, 1], [], []>} : vector<4x5xbf16>, vector<5x8xbf16>, vector<4x8xf32> -> vector<4x8xf32>
    %163 = vector.extract_strided_slice %85 {offsets = [0, 0], sizes = [1, 32], strides = [1, 1]} : vector<4x32xf32> to vector<1x32xf32>
    %164 = tpu.concatenate %105, %124, %143, %162 in 1 : vector<4x8xf32>, vector<4x8xf32>, vector<4x8xf32>, vector<4x8xf32> -> vector<4x32xf32>
    %165 = vector.extract_strided_slice %1 {offsets = [5, 0], sizes = [5, 96], strides = [1, 1]} : vector<20x96xbf16> to vector<5x96xbf16>
    %166 = vector.extract_strided_slice %165 {offsets = [1, 0], sizes = [4, 8], strides = [1, 1]} : vector<5x96xbf16> to vector<4x8xbf16>
    %167 = vector.extract_strided_slice %165 {offsets = [0, 32], sizes = [5, 8], strides = [1, 1]} : vector<5x96xbf16> to vector<5x8xbf16>
    %168 = vector.extract_strided_slice %165 {offsets = [0, 64], sizes = [5, 8], strides = [1, 1]} : vector<5x96xbf16> to vector<5x8xbf16>
    %cst_49 = arith.constant dense<0.000000e+00> : vector<4x5xf32>
    %169 = tpu.matmul %166, %167, %cst_49 {dimension_numbers = #tpu.dot_dimension_numbers<[1], [1], [0], [0], [0, 0, 1, 0], [], []>} : vector<4x8xbf16>, vector<5x8xbf16>, vector<4x5xf32> -> vector<4x5xf32>
    %cst_50 = arith.constant 0.353553385 : f32
    %170 = vector.broadcast %cst_50 : f32 to vector<4x5xf32>
    %171 = arith.mulf %169, %170 : vector<4x5xf32>
    %cst_51 = arith.constant dense<0xFF800000> : vector<4xf32>
    %172 = vector.multi_reduction <maximumf>, %171, %cst_51 [1] : vector<4x5xf32> to vector<4xf32>
    %173 = vector.shape_cast %172 : vector<4xf32> to vector<4x1xf32>
    %174 = vector.broadcast %173 : vector<4x1xf32> to vector<4x5xf32>
    %175 = arith.subf %171, %174 : vector<4x5xf32>
    %176 = math.exp %175 : vector<4x5xf32>
    %cst_52 = arith.constant dense<0.000000e+00> : vector<4xf32>
    %177 = vector.multi_reduction <add>, %176, %cst_52 [1] : vector<4x5xf32> to vector<4xf32>
    %178 = vector.shape_cast %177 : vector<4xf32> to vector<4x1xf32>
    %cst_53 = arith.constant 1.000000e+00 : f32
    %179 = vector.broadcast %cst_53 : f32 to vector<4x1xf32>
    %180 = arith.divf %179, %178 : vector<4x1xf32>
    %181 = vector.broadcast %180 : vector<4x1xf32> to vector<4x5xf32>
    %182 = arith.mulf %176, %181 : vector<4x5xf32>
    %183 = arith.truncf %182 : vector<4x5xf32> to vector<4x5xbf16>
    %cst_54 = arith.constant dense<0.000000e+00> : vector<4x8xf32>
    %184 = tpu.matmul %183, %168, %cst_54 {dimension_numbers = #tpu.dot_dimension_numbers<[1], [0], [0], [1], [0, 0, 1, 1], [], []>} : vector<4x5xbf16>, vector<5x8xbf16>, vector<4x8xf32> -> vector<4x8xf32>
    %185 = vector.extract_strided_slice %165 {offsets = [1, 8], sizes = [4, 8], strides = [1, 1]} : vector<5x96xbf16> to vector<4x8xbf16>
    %186 = vector.extract_strided_slice %165 {offsets = [0, 40], sizes = [5, 8], strides = [1, 1]} : vector<5x96xbf16> to vector<5x8xbf16>
    %187 = vector.extract_strided_slice %165 {offsets = [0, 72], sizes = [5, 8], strides = [1, 1]} : vector<5x96xbf16> to vector<5x8xbf16>
    %cst_55 = arith.constant dense<0.000000e+00> : vector<4x5xf32>
    %188 = tpu.matmul %185, %186, %cst_55 {dimension_numbers = #tpu.dot_dimension_numbers<[1], [1], [0], [0], [0, 0, 1, 0], [], []>} : vector<4x8xbf16>, vector<5x8xbf16>, vector<4x5xf32> -> vector<4x5xf32>
    %cst_56 = arith.constant 0.353553385 : f32
    %189 = vector.broadcast %cst_56 : f32 to vector<4x5xf32>
    %190 = arith.mulf %188, %189 : vector<4x5xf32>
    %cst_57 = arith.constant dense<0xFF800000> : vector<4xf32>
    %191 = vector.multi_reduction <maximumf>, %190, %cst_57 [1] : vector<4x5xf32> to vector<4xf32>
    %192 = vector.shape_cast %191 : vector<4xf32> to vector<4x1xf32>
    %193 = vector.broadcast %192 : vector<4x1xf32> to vector<4x5xf32>
    %194 = arith.subf %190, %193 : vector<4x5xf32>
    %195 = math.exp %194 : vector<4x5xf32>
    %cst_58 = arith.constant dense<0.000000e+00> : vector<4xf32>
    %196 = vector.multi_reduction <add>, %195, %cst_58 [1] : vector<4x5xf32> to vector<4xf32>
    %197 = vector.shape_cast %196 : vector<4xf32> to vector<4x1xf32>
    %cst_59 = arith.constant 1.000000e+00 : f32
    %198 = vector.broadcast %cst_59 : f32 to vector<4x1xf32>
    %199 = arith.divf %198, %197 : vector<4x1xf32>
    %200 = vector.broadcast %199 : vector<4x1xf32> to vector<4x5xf32>
    %201 = arith.mulf %195, %200 : vector<4x5xf32>
    %202 = arith.truncf %201 : vector<4x5xf32> to vector<4x5xbf16>
    %cst_60 = arith.constant dense<0.000000e+00> : vector<4x8xf32>
    %203 = tpu.matmul %202, %187, %cst_60 {dimension_numbers = #tpu.dot_dimension_numbers<[1], [0], [0], [1], [0, 0, 1, 1], [], []>} : vector<4x5xbf16>, vector<5x8xbf16>, vector<4x8xf32> -> vector<4x8xf32>
    %204 = vector.extract_strided_slice %165 {offsets = [1, 16], sizes = [4, 8], strides = [1, 1]} : vector<5x96xbf16> to vector<4x8xbf16>
    %205 = vector.extract_strided_slice %165 {offsets = [0, 48], sizes = [5, 8], strides = [1, 1]} : vector<5x96xbf16> to vector<5x8xbf16>
    %206 = vector.extract_strided_slice %165 {offsets = [0, 80], sizes = [5, 8], strides = [1, 1]} : vector<5x96xbf16> to vector<5x8xbf16>
    %cst_61 = arith.constant dense<0.000000e+00> : vector<4x5xf32>
    %207 = tpu.matmul %204, %205, %cst_61 {dimension_numbers = #tpu.dot_dimension_numbers<[1], [1], [0], [0], [0, 0, 1, 0], [], []>} : vector<4x8xbf16>, vector<5x8xbf16>, vector<4x5xf32> -> vector<4x5xf32>
    %cst_62 = arith.constant 0.353553385 : f32
    %208 = vector.broadcast %cst_62 : f32 to vector<4x5xf32>
    %209 = arith.mulf %207, %208 : vector<4x5xf32>
    %cst_63 = arith.constant dense<0xFF800000> : vector<4xf32>
    %210 = vector.multi_reduction <maximumf>, %209, %cst_63 [1] : vector<4x5xf32> to vector<4xf32>
    %211 = vector.shape_cast %210 : vector<4xf32> to vector<4x1xf32>
    %212 = vector.broadcast %211 : vector<4x1xf32> to vector<4x5xf32>
    %213 = arith.subf %209, %212 : vector<4x5xf32>
    %214 = math.exp %213 : vector<4x5xf32>
    %cst_64 = arith.constant dense<0.000000e+00> : vector<4xf32>
    %215 = vector.multi_reduction <add>, %214, %cst_64 [1] : vector<4x5xf32> to vector<4xf32>
    %216 = vector.shape_cast %215 : vector<4xf32> to vector<4x1xf32>
    %cst_65 = arith.constant 1.000000e+00 : f32
    %217 = vector.broadcast %cst_65 : f32 to vector<4x1xf32>
    %218 = arith.divf %217, %216 : vector<4x1xf32>
    %219 = vector.broadcast %218 : vector<4x1xf32> to vector<4x5xf32>
    %220 = arith.mulf %214, %219 : vector<4x5xf32>
    %221 = arith.truncf %220 : vector<4x5xf32> to vector<4x5xbf16>
    %cst_66 = arith.constant dense<0.000000e+00> : vector<4x8xf32>
    %222 = tpu.matmul %221, %206, %cst_66 {dimension_numbers = #tpu.dot_dimension_numbers<[1], [0], [0], [1], [0, 0, 1, 1], [], []>} : vector<4x5xbf16>, vector<5x8xbf16>, vector<4x8xf32> -> vector<4x8xf32>
    %223 = vector.extract_strided_slice %165 {offsets = [1, 24], sizes = [4, 8], strides = [1, 1]} : vector<5x96xbf16> to vector<4x8xbf16>
    %224 = vector.extract_strided_slice %165 {offsets = [0, 56], sizes = [5, 8], strides = [1, 1]} : vector<5x96xbf16> to vector<5x8xbf16>
    %225 = vector.extract_strided_slice %165 {offsets = [0, 88], sizes = [5, 8], strides = [1, 1]} : vector<5x96xbf16> to vector<5x8xbf16>
    %cst_67 = arith.constant dense<0.000000e+00> : vector<4x5xf32>
    %226 = tpu.matmul %223, %224, %cst_67 {dimension_numbers = #tpu.dot_dimension_numbers<[1], [1], [0], [0], [0, 0, 1, 0], [], []>} : vector<4x8xbf16>, vector<5x8xbf16>, vector<4x5xf32> -> vector<4x5xf32>
    %cst_68 = arith.constant 0.353553385 : f32
    %227 = vector.broadcast %cst_68 : f32 to vector<4x5xf32>
    %228 = arith.mulf %226, %227 : vector<4x5xf32>
    %cst_69 = arith.constant dense<0xFF800000> : vector<4xf32>
    %229 = vector.multi_reduction <maximumf>, %228, %cst_69 [1] : vector<4x5xf32> to vector<4xf32>
    %230 = vector.shape_cast %229 : vector<4xf32> to vector<4x1xf32>
    %231 = vector.broadcast %230 : vector<4x1xf32> to vector<4x5xf32>
    %232 = arith.subf %228, %231 : vector<4x5xf32>
    %233 = math.exp %232 : vector<4x5xf32>
    %cst_70 = arith.constant dense<0.000000e+00> : vector<4xf32>
    %234 = vector.multi_reduction <add>, %233, %cst_70 [1] : vector<4x5xf32> to vector<4xf32>
    %235 = vector.shape_cast %234 : vector<4xf32> to vector<4x1xf32>
    %cst_71 = arith.constant 1.000000e+00 : f32
    %236 = vector.broadcast %cst_71 : f32 to vector<4x1xf32>
    %237 = arith.divf %236, %235 : vector<4x1xf32>
    %238 = vector.broadcast %237 : vector<4x1xf32> to vector<4x5xf32>
    %239 = arith.mulf %233, %238 : vector<4x5xf32>
    %240 = arith.truncf %239 : vector<4x5xf32> to vector<4x5xbf16>
    %cst_72 = arith.constant dense<0.000000e+00> : vector<4x8xf32>
    %241 = tpu.matmul %240, %225, %cst_72 {dimension_numbers = #tpu.dot_dimension_numbers<[1], [0], [0], [1], [0, 0, 1, 1], [], []>} : vector<4x5xbf16>, vector<5x8xbf16>, vector<4x8xf32> -> vector<4x8xf32>
    %242 = vector.extract_strided_slice %85 {offsets = [1, 0], sizes = [1, 32], strides = [1, 1]} : vector<4x32xf32> to vector<1x32xf32>
    %243 = tpu.concatenate %184, %203, %222, %241 in 1 : vector<4x8xf32>, vector<4x8xf32>, vector<4x8xf32>, vector<4x8xf32> -> vector<4x32xf32>
    %244 = vector.extract_strided_slice %1 {offsets = [10, 0], sizes = [5, 96], strides = [1, 1]} : vector<20x96xbf16> to vector<5x96xbf16>
    %245 = vector.extract_strided_slice %244 {offsets = [1, 0], sizes = [4, 8], strides = [1, 1]} : vector<5x96xbf16> to vector<4x8xbf16>
    %246 = vector.extract_strided_slice %244 {offsets = [0, 32], sizes = [5, 8], strides = [1, 1]} : vector<5x96xbf16> to vector<5x8xbf16>
    %247 = vector.extract_strided_slice %244 {offsets = [0, 64], sizes = [5, 8], strides = [1, 1]} : vector<5x96xbf16> to vector<5x8xbf16>
    %cst_73 = arith.constant dense<0.000000e+00> : vector<4x5xf32>
    %248 = tpu.matmul %245, %246, %cst_73 {dimension_numbers = #tpu.dot_dimension_numbers<[1], [1], [0], [0], [0, 0, 1, 0], [], []>} : vector<4x8xbf16>, vector<5x8xbf16>, vector<4x5xf32> -> vector<4x5xf32>
    %cst_74 = arith.constant 0.353553385 : f32
    %249 = vector.broadcast %cst_74 : f32 to vector<4x5xf32>
    %250 = arith.mulf %248, %249 : vector<4x5xf32>
    %cst_75 = arith.constant dense<0xFF800000> : vector<4xf32>
    %251 = vector.multi_reduction <maximumf>, %250, %cst_75 [1] : vector<4x5xf32> to vector<4xf32>
    %252 = vector.shape_cast %251 : vector<4xf32> to vector<4x1xf32>
    %253 = vector.broadcast %252 : vector<4x1xf32> to vector<4x5xf32>
    %254 = arith.subf %250, %253 : vector<4x5xf32>
    %255 = math.exp %254 : vector<4x5xf32>
    %cst_76 = arith.constant dense<0.000000e+00> : vector<4xf32>
    %256 = vector.multi_reduction <add>, %255, %cst_76 [1] : vector<4x5xf32> to vector<4xf32>
    %257 = vector.shape_cast %256 : vector<4xf32> to vector<4x1xf32>
    %cst_77 = arith.constant 1.000000e+00 : f32
    %258 = vector.broadcast %cst_77 : f32 to vector<4x1xf32>
    %259 = arith.divf %258, %257 : vector<4x1xf32>
    %260 = vector.broadcast %259 : vector<4x1xf32> to vector<4x5xf32>
    %261 = arith.mulf %255, %260 : vector<4x5xf32>
    %262 = arith.truncf %261 : vector<4x5xf32> to vector<4x5xbf16>
    %cst_78 = arith.constant dense<0.000000e+00> : vector<4x8xf32>
    %263 = tpu.matmul %262, %247, %cst_78 {dimension_numbers = #tpu.dot_dimension_numbers<[1], [0], [0], [1], [0, 0, 1, 1], [], []>} : vector<4x5xbf16>, vector<5x8xbf16>, vector<4x8xf32> -> vector<4x8xf32>
    %264 = vector.extract_strided_slice %244 {offsets = [1, 8], sizes = [4, 8], strides = [1, 1]} : vector<5x96xbf16> to vector<4x8xbf16>
    %265 = vector.extract_strided_slice %244 {offsets = [0, 40], sizes = [5, 8], strides = [1, 1]} : vector<5x96xbf16> to vector<5x8xbf16>
    %266 = vector.extract_strided_slice %244 {offsets = [0, 72], sizes = [5, 8], strides = [1, 1]} : vector<5x96xbf16> to vector<5x8xbf16>
    %cst_79 = arith.constant dense<0.000000e+00> : vector<4x5xf32>
    %267 = tpu.matmul %264, %265, %cst_79 {dimension_numbers = #tpu.dot_dimension_numbers<[1], [1], [0], [0], [0, 0, 1, 0], [], []>} : vector<4x8xbf16>, vector<5x8xbf16>, vector<4x5xf32> -> vector<4x5xf32>
    %cst_80 = arith.constant 0.353553385 : f32
    %268 = vector.broadcast %cst_80 : f32 to vector<4x5xf32>
    %269 = arith.mulf %267, %268 : vector<4x5xf32>
    %cst_81 = arith.constant dense<0xFF800000> : vector<4xf32>
    %270 = vector.multi_reduction <maximumf>, %269, %cst_81 [1] : vector<4x5xf32> to vector<4xf32>
    %271 = vector.shape_cast %270 : vector<4xf32> to vector<4x1xf32>
    %272 = vector.broadcast %271 : vector<4x1xf32> to vector<4x5xf32>
    %273 = arith.subf %269, %272 : vector<4x5xf32>
    %274 = math.exp %273 : vector<4x5xf32>
    %cst_82 = arith.constant dense<0.000000e+00> : vector<4xf32>
    %275 = vector.multi_reduction <add>, %274, %cst_82 [1] : vector<4x5xf32> to vector<4xf32>
    %276 = vector.shape_cast %275 : vector<4xf32> to vector<4x1xf32>
    %cst_83 = arith.constant 1.000000e+00 : f32
    %277 = vector.broadcast %cst_83 : f32 to vector<4x1xf32>
    %278 = arith.divf %277, %276 : vector<4x1xf32>
    %279 = vector.broadcast %278 : vector<4x1xf32> to vector<4x5xf32>
    %280 = arith.mulf %274, %279 : vector<4x5xf32>
    %281 = arith.truncf %280 : vector<4x5xf32> to vector<4x5xbf16>
    %cst_84 = arith.constant dense<0.000000e+00> : vector<4x8xf32>
    %282 = tpu.matmul %281, %266, %cst_84 {dimension_numbers = #tpu.dot_dimension_numbers<[1], [0], [0], [1], [0, 0, 1, 1], [], []>} : vector<4x5xbf16>, vector<5x8xbf16>, vector<4x8xf32> -> vector<4x8xf32>
    %283 = vector.extract_strided_slice %244 {offsets = [1, 16], sizes = [4, 8], strides = [1, 1]} : vector<5x96xbf16> to vector<4x8xbf16>
    %284 = vector.extract_strided_slice %244 {offsets = [0, 48], sizes = [5, 8], strides = [1, 1]} : vector<5x96xbf16> to vector<5x8xbf16>
    %285 = vector.extract_strided_slice %244 {offsets = [0, 80], sizes = [5, 8], strides = [1, 1]} : vector<5x96xbf16> to vector<5x8xbf16>
    %cst_85 = arith.constant dense<0.000000e+00> : vector<4x5xf32>
    %286 = tpu.matmul %283, %284, %cst_85 {dimension_numbers = #tpu.dot_dimension_numbers<[1], [1], [0], [0], [0, 0, 1, 0], [], []>} : vector<4x8xbf16>, vector<5x8xbf16>, vector<4x5xf32> -> vector<4x5xf32>
    %cst_86 = arith.constant 0.353553385 : f32
    %287 = vector.broadcast %cst_86 : f32 to vector<4x5xf32>
    %288 = arith.mulf %286, %287 : vector<4x5xf32>
    %cst_87 = arith.constant dense<0xFF800000> : vector<4xf32>
    %289 = vector.multi_reduction <maximumf>, %288, %cst_87 [1] : vector<4x5xf32> to vector<4xf32>
    %290 = vector.shape_cast %289 : vector<4xf32> to vector<4x1xf32>
    %291 = vector.broadcast %290 : vector<4x1xf32> to vector<4x5xf32>
    %292 = arith.subf %288, %291 : vector<4x5xf32>
    %293 = math.exp %292 : vector<4x5xf32>
    %cst_88 = arith.constant dense<0.000000e+00> : vector<4xf32>
    %294 = vector.multi_reduction <add>, %293, %cst_88 [1] : vector<4x5xf32> to vector<4xf32>
    %295 = vector.shape_cast %294 : vector<4xf32> to vector<4x1xf32>
    %cst_89 = arith.constant 1.000000e+00 : f32
    %296 = vector.broadcast %cst_89 : f32 to vector<4x1xf32>
    %297 = arith.divf %296, %295 : vector<4x1xf32>
    %298 = vector.broadcast %297 : vector<4x1xf32> to vector<4x5xf32>
    %299 = arith.mulf %293, %298 : vector<4x5xf32>
    %300 = arith.truncf %299 : vector<4x5xf32> to vector<4x5xbf16>
    %cst_90 = arith.constant dense<0.000000e+00> : vector<4x8xf32>
    %301 = tpu.matmul %300, %285, %cst_90 {dimension_numbers = #tpu.dot_dimension_numbers<[1], [0], [0], [1], [0, 0, 1, 1], [], []>} : vector<4x5xbf16>, vector<5x8xbf16>, vector<4x8xf32> -> vector<4x8xf32>
    %302 = vector.extract_strided_slice %244 {offsets = [1, 24], sizes = [4, 8], strides = [1, 1]} : vector<5x96xbf16> to vector<4x8xbf16>
    %303 = vector.extract_strided_slice %244 {offsets = [0, 56], sizes = [5, 8], strides = [1, 1]} : vector<5x96xbf16> to vector<5x8xbf16>
    %304 = vector.extract_strided_slice %244 {offsets = [0, 88], sizes = [5, 8], strides = [1, 1]} : vector<5x96xbf16> to vector<5x8xbf16>
    %cst_91 = arith.constant dense<0.000000e+00> : vector<4x5xf32>
    %305 = tpu.matmul %302, %303, %cst_91 {dimension_numbers = #tpu.dot_dimension_numbers<[1], [1], [0], [0], [0, 0, 1, 0], [], []>} : vector<4x8xbf16>, vector<5x8xbf16>, vector<4x5xf32> -> vector<4x5xf32>
    %cst_92 = arith.constant 0.353553385 : f32
    %306 = vector.broadcast %cst_92 : f32 to vector<4x5xf32>
    %307 = arith.mulf %305, %306 : vector<4x5xf32>
    %cst_93 = arith.constant dense<0xFF800000> : vector<4xf32>
    %308 = vector.multi_reduction <maximumf>, %307, %cst_93 [1] : vector<4x5xf32> to vector<4xf32>
    %309 = vector.shape_cast %308 : vector<4xf32> to vector<4x1xf32>
    %310 = vector.broadcast %309 : vector<4x1xf32> to vector<4x5xf32>
    %311 = arith.subf %307, %310 : vector<4x5xf32>
    %312 = math.exp %311 : vector<4x5xf32>
    %cst_94 = arith.constant dense<0.000000e+00> : vector<4xf32>
    %313 = vector.multi_reduction <add>, %312, %cst_94 [1] : vector<4x5xf32> to vector<4xf32>
    %314 = vector.shape_cast %313 : vector<4xf32> to vector<4x1xf32>
    %cst_95 = arith.constant 1.000000e+00 : f32
    %315 = vector.broadcast %cst_95 : f32 to vector<4x1xf32>
    %316 = arith.divf %315, %314 : vector<4x1xf32>
    %317 = vector.broadcast %316 : vector<4x1xf32> to vector<4x5xf32>
    %318 = arith.mulf %312, %317 : vector<4x5xf32>
    %319 = arith.truncf %318 : vector<4x5xf32> to vector<4x5xbf16>
    %cst_96 = arith.constant dense<0.000000e+00> : vector<4x8xf32>
    %320 = tpu.matmul %319, %304, %cst_96 {dimension_numbers = #tpu.dot_dimension_numbers<[1], [0], [0], [1], [0, 0, 1, 1], [], []>} : vector<4x5xbf16>, vector<5x8xbf16>, vector<4x8xf32> -> vector<4x8xf32>
    %321 = vector.extract_strided_slice %85 {offsets = [2, 0], sizes = [1, 32], strides = [1, 1]} : vector<4x32xf32> to vector<1x32xf32>
    %322 = tpu.concatenate %263, %282, %301, %320 in 1 : vector<4x8xf32>, vector<4x8xf32>, vector<4x8xf32>, vector<4x8xf32> -> vector<4x32xf32>
    %323 = vector.extract_strided_slice %1 {offsets = [15, 0], sizes = [5, 96], strides = [1, 1]} : vector<20x96xbf16> to vector<5x96xbf16>
    %324 = vector.extract_strided_slice %323 {offsets = [1, 0], sizes = [4, 8], strides = [1, 1]} : vector<5x96xbf16> to vector<4x8xbf16>
    %325 = vector.extract_strided_slice %323 {offsets = [0, 32], sizes = [5, 8], strides = [1, 1]} : vector<5x96xbf16> to vector<5x8xbf16>
    %326 = vector.extract_strided_slice %323 {offsets = [0, 64], sizes = [5, 8], strides = [1, 1]} : vector<5x96xbf16> to vector<5x8xbf16>
    %cst_97 = arith.constant dense<0.000000e+00> : vector<4x5xf32>
    %327 = tpu.matmul %324, %325, %cst_97 {dimension_numbers = #tpu.dot_dimension_numbers<[1], [1], [0], [0], [0, 0, 1, 0], [], []>} : vector<4x8xbf16>, vector<5x8xbf16>, vector<4x5xf32> -> vector<4x5xf32>
    %cst_98 = arith.constant 0.353553385 : f32
    %328 = vector.broadcast %cst_98 : f32 to vector<4x5xf32>
    %329 = arith.mulf %327, %328 : vector<4x5xf32>
    %cst_99 = arith.constant dense<0xFF800000> : vector<4xf32>
    %330 = vector.multi_reduction <maximumf>, %329, %cst_99 [1] : vector<4x5xf32> to vector<4xf32>
    %331 = vector.shape_cast %330 : vector<4xf32> to vector<4x1xf32>
    %332 = vector.broadcast %331 : vector<4x1xf32> to vector<4x5xf32>
    %333 = arith.subf %329, %332 : vector<4x5xf32>
    %334 = math.exp %333 : vector<4x5xf32>
    %cst_100 = arith.constant dense<0.000000e+00> : vector<4xf32>
    %335 = vector.multi_reduction <add>, %334, %cst_100 [1] : vector<4x5xf32> to vector<4xf32>
    %336 = vector.shape_cast %335 : vector<4xf32> to vector<4x1xf32>
    %cst_101 = arith.constant 1.000000e+00 : f32
    %337 = vector.broadcast %cst_101 : f32 to vector<4x1xf32>
    %338 = arith.divf %337, %336 : vector<4x1xf32>
    %339 = vector.broadcast %338 : vector<4x1xf32> to vector<4x5xf32>
    %340 = arith.mulf %334, %339 : vector<4x5xf32>
    %341 = arith.truncf %340 : vector<4x5xf32> to vector<4x5xbf16>
    %cst_102 = arith.constant dense<0.000000e+00> : vector<4x8xf32>
    %342 = tpu.matmul %341, %326, %cst_102 {dimension_numbers = #tpu.dot_dimension_numbers<[1], [0], [0], [1], [0, 0, 1, 1], [], []>} : vector<4x5xbf16>, vector<5x8xbf16>, vector<4x8xf32> -> vector<4x8xf32>
    %343 = vector.extract_strided_slice %323 {offsets = [1, 8], sizes = [4, 8], strides = [1, 1]} : vector<5x96xbf16> to vector<4x8xbf16>
    %344 = vector.extract_strided_slice %323 {offsets = [0, 40], sizes = [5, 8], strides = [1, 1]} : vector<5x96xbf16> to vector<5x8xbf16>
    %345 = vector.extract_strided_slice %323 {offsets = [0, 72], sizes = [5, 8], strides = [1, 1]} : vector<5x96xbf16> to vector<5x8xbf16>
    %cst_103 = arith.constant dense<0.000000e+00> : vector<4x5xf32>
    %346 = tpu.matmul %343, %344, %cst_103 {dimension_numbers = #tpu.dot_dimension_numbers<[1], [1], [0], [0], [0, 0, 1, 0], [], []>} : vector<4x8xbf16>, vector<5x8xbf16>, vector<4x5xf32> -> vector<4x5xf32>
    %cst_104 = arith.constant 0.353553385 : f32
    %347 = vector.broadcast %cst_104 : f32 to vector<4x5xf32>
    %348 = arith.mulf %346, %347 : vector<4x5xf32>
    %cst_105 = arith.constant dense<0xFF800000> : vector<4xf32>
    %349 = vector.multi_reduction <maximumf>, %348, %cst_105 [1] : vector<4x5xf32> to vector<4xf32>
    %350 = vector.shape_cast %349 : vector<4xf32> to vector<4x1xf32>
    %351 = vector.broadcast %350 : vector<4x1xf32> to vector<4x5xf32>
    %352 = arith.subf %348, %351 : vector<4x5xf32>
    %353 = math.exp %352 : vector<4x5xf32>
    %cst_106 = arith.constant dense<0.000000e+00> : vector<4xf32>
    %354 = vector.multi_reduction <add>, %353, %cst_106 [1] : vector<4x5xf32> to vector<4xf32>
    %355 = vector.shape_cast %354 : vector<4xf32> to vector<4x1xf32>
    %cst_107 = arith.constant 1.000000e+00 : f32
    %356 = vector.broadcast %cst_107 : f32 to vector<4x1xf32>
    %357 = arith.divf %356, %355 : vector<4x1xf32>
    %358 = vector.broadcast %357 : vector<4x1xf32> to vector<4x5xf32>
    %359 = arith.mulf %353, %358 : vector<4x5xf32>
    %360 = arith.truncf %359 : vector<4x5xf32> to vector<4x5xbf16>
    %cst_108 = arith.constant dense<0.000000e+00> : vector<4x8xf32>
    %361 = tpu.matmul %360, %345, %cst_108 {dimension_numbers = #tpu.dot_dimension_numbers<[1], [0], [0], [1], [0, 0, 1, 1], [], []>} : vector<4x5xbf16>, vector<5x8xbf16>, vector<4x8xf32> -> vector<4x8xf32>
    %362 = vector.extract_strided_slice %323 {offsets = [1, 16], sizes = [4, 8], strides = [1, 1]} : vector<5x96xbf16> to vector<4x8xbf16>
    %363 = vector.extract_strided_slice %323 {offsets = [0, 48], sizes = [5, 8], strides = [1, 1]} : vector<5x96xbf16> to vector<5x8xbf16>
    %364 = vector.extract_strided_slice %323 {offsets = [0, 80], sizes = [5, 8], strides = [1, 1]} : vector<5x96xbf16> to vector<5x8xbf16>
    %cst_109 = arith.constant dense<0.000000e+00> : vector<4x5xf32>
    %365 = tpu.matmul %362, %363, %cst_109 {dimension_numbers = #tpu.dot_dimension_numbers<[1], [1], [0], [0], [0, 0, 1, 0], [], []>} : vector<4x8xbf16>, vector<5x8xbf16>, vector<4x5xf32> -> vector<4x5xf32>
    %cst_110 = arith.constant 0.353553385 : f32
    %366 = vector.broadcast %cst_110 : f32 to vector<4x5xf32>
    %367 = arith.mulf %365, %366 : vector<4x5xf32>
    %cst_111 = arith.constant dense<0xFF800000> : vector<4xf32>
    %368 = vector.multi_reduction <maximumf>, %367, %cst_111 [1] : vector<4x5xf32> to vector<4xf32>
    %369 = vector.shape_cast %368 : vector<4xf32> to vector<4x1xf32>
    %370 = vector.broadcast %369 : vector<4x1xf32> to vector<4x5xf32>
    %371 = arith.subf %367, %370 : vector<4x5xf32>
    %372 = math.exp %371 : vector<4x5xf32>
    %cst_112 = arith.constant dense<0.000000e+00> : vector<4xf32>
    %373 = vector.multi_reduction <add>, %372, %cst_112 [1] : vector<4x5xf32> to vector<4xf32>
    %374 = vector.shape_cast %373 : vector<4xf32> to vector<4x1xf32>
    %cst_113 = arith.constant 1.000000e+00 : f32
    %375 = vector.broadcast %cst_113 : f32 to vector<4x1xf32>
    %376 = arith.divf %375, %374 : vector<4x1xf32>
    %377 = vector.broadcast %376 : vector<4x1xf32> to vector<4x5xf32>
    %378 = arith.mulf %372, %377 : vector<4x5xf32>
    %379 = arith.truncf %378 : vector<4x5xf32> to vector<4x5xbf16>
    %cst_114 = arith.constant dense<0.000000e+00> : vector<4x8xf32>
    %380 = tpu.matmul %379, %364, %cst_114 {dimension_numbers = #tpu.dot_dimension_numbers<[1], [0], [0], [1], [0, 0, 1, 1], [], []>} : vector<4x5xbf16>, vector<5x8xbf16>, vector<4x8xf32> -> vector<4x8xf32>
    %381 = vector.extract_strided_slice %323 {offsets = [1, 24], sizes = [4, 8], strides = [1, 1]} : vector<5x96xbf16> to vector<4x8xbf16>
    %382 = vector.extract_strided_slice %323 {offsets = [0, 56], sizes = [5, 8], strides = [1, 1]} : vector<5x96xbf16> to vector<5x8xbf16>
    %383 = vector.extract_strided_slice %323 {offsets = [0, 88], sizes = [5, 8], strides = [1, 1]} : vector<5x96xbf16> to vector<5x8xbf16>
    %cst_115 = arith.constant dense<0.000000e+00> : vector<4x5xf32>
    %384 = tpu.matmul %381, %382, %cst_115 {dimension_numbers = #tpu.dot_dimension_numbers<[1], [1], [0], [0], [0, 0, 1, 0], [], []>} : vector<4x8xbf16>, vector<5x8xbf16>, vector<4x5xf32> -> vector<4x5xf32>
    %cst_116 = arith.constant 0.353553385 : f32
    %385 = vector.broadcast %cst_116 : f32 to vector<4x5xf32>
    %386 = arith.mulf %384, %385 : vector<4x5xf32>
    %cst_117 = arith.constant dense<0xFF800000> : vector<4xf32>
    %387 = vector.multi_reduction <maximumf>, %386, %cst_117 [1] : vector<4x5xf32> to vector<4xf32>
    %388 = vector.shape_cast %387 : vector<4xf32> to vector<4x1xf32>
    %389 = vector.broadcast %388 : vector<4x1xf32> to vector<4x5xf32>
    %390 = arith.subf %386, %389 : vector<4x5xf32>
    %391 = math.exp %390 : vector<4x5xf32>
    %cst_118 = arith.constant dense<0.000000e+00> : vector<4xf32>
    %392 = vector.multi_reduction <add>, %391, %cst_118 [1] : vector<4x5xf32> to vector<4xf32>
    %393 = vector.shape_cast %392 : vector<4xf32> to vector<4x1xf32>
    %cst_119 = arith.constant 1.000000e+00 : f32
    %394 = vector.broadcast %cst_119 : f32 to vector<4x1xf32>
    %395 = arith.divf %394, %393 : vector<4x1xf32>
    %396 = vector.broadcast %395 : vector<4x1xf32> to vector<4x5xf32>
    %397 = arith.mulf %391, %396 : vector<4x5xf32>
    %398 = arith.truncf %397 : vector<4x5xf32> to vector<4x5xbf16>
    %cst_120 = arith.constant dense<0.000000e+00> : vector<4x8xf32>
    %399 = tpu.matmul %398, %383, %cst_120 {dimension_numbers = #tpu.dot_dimension_numbers<[1], [0], [0], [1], [0, 0, 1, 1], [], []>} : vector<4x5xbf16>, vector<5x8xbf16>, vector<4x8xf32> -> vector<4x8xf32>
    %400 = vector.extract_strided_slice %85 {offsets = [3, 0], sizes = [1, 32], strides = [1, 1]} : vector<4x32xf32> to vector<1x32xf32>
    %401 = tpu.concatenate %342, %361, %380, %399 in 1 : vector<4x8xf32>, vector<4x8xf32>, vector<4x8xf32>, vector<4x8xf32> -> vector<4x32xf32>
    %402 = tpu.concatenate %163, %164, %242, %243, %321, %322, %400, %401 in 0 : vector<1x32xf32>, vector<4x32xf32>, vector<1x32xf32>, vector<4x32xf32>, vector<1x32xf32>, vector<4x32xf32>, vector<1x32xf32>, vector<4x32xf32> -> vector<20x32xf32>
    %403 = arith.truncf %402 : vector<20x32xf32> to vector<20x32xbf16>
    %c0_121 = arith.constant 0 : index
    %c0_122 = arith.constant 0 : index
    %c0_123 = arith.constant 0 : index
    %404 = vector.load %arg2[%c0_121, %c0_122, %c0_123] : memref<1x20x32xbf16, #tpu.memory_space<vmem>>, vector<1x20x32xbf16>
    %405 = vector.shape_cast %404 : vector<1x20x32xbf16> to vector<20x32xbf16>
    %406 = vector.shape_cast %403 : vector<20x32xbf16> to vector<1x20x32xbf16>
    tpu.vector_store %arg2[%c0_121, %c0_122, %c0_123], %406 {strides = array<i32>} : memref<1x20x32xbf16, #tpu.memory_space<vmem>>, vector<1x20x32xbf16>,
    return
  }
  func.func @transform_0(%arg0: i32) -> (i32, i32, i32) {
    %c0_i32 = arith.constant 0 : i32
    %c0_i32_0 = arith.constant 0 : i32
    %c0_i32_1 = arith.constant 0 : i32
    return %arg0, %c0_i32, %c0_i32_0 : i32, i32, i32
  }
  func.func @transform_1(%arg0: i32) -> (i32, i32, i32) {
    %c0_i32 = arith.constant 0 : i32
    %c0_i32_0 = arith.constant 0 : i32
    %c0_i32_1 = arith.constant 0 : i32
    return %arg0, %c0_i32, %c0_i32_0 : i32, i32, i32
  }
}

module attributes {stable_mosaic.version = 11 : i64} {
  func.func @_matmul_res_kernel(%arg0: i32, %arg1: i32, %arg2: i32, %arg3: memref<40x128xbf16, #tpu.memory_space<vmem>>, %arg4: memref<128x32xbf16, #tpu.memory_space<vmem>>, %arg5: memref<1x32xf32, #tpu.memory_space<vmem>>, %arg6: memref<40x32xf32, #tpu.memory_space<vmem>>, %arg7: memref<40x32xf32, #tpu.memory_space<vmem>>, %arg8: memref<40x32xf32, #tpu.memory_space<vmem>>) attributes {dimension_semantics = [#tpu.dimension_semantics<parallel>, #tpu.dimension_semantics<parallel>, #tpu.dimension_semantics<arbitrary>], iteration_bounds = array<i64: 1, 1, 1>, scalar_prefetch = 0 : i64, scratch_operands = 1 : i64, tpu.core_type = #tpu.core_type<tc>, window_params = [{transform_indices = @transform_0, window_bounds = array<i64: 40, 128>}, {transform_indices = @transform_1, window_bounds = array<i64: 128, 32>}, {transform_indices = @transform_2, window_bounds = array<i64: 1, 32>}, {transform_indices = @transform_3, window_bounds = array<i64: 40, 32>}, {transform_indices = @transform_4, window_bounds = array<i64: 40, 32>}]} {
    %c0_i32 = arith.constant 0 : i32
    %0 = arith.cmpi eq, %arg2, %c0_i32 : i32
    %1 = arith.extui %0 : i1 to i32
    %c0_i32_0 = arith.constant 0 : i32
    %2 = arith.cmpi ne, %1, %c0_i32_0 : i32
    scf.if %2 {
      %cst_10 = arith.constant 0.000000e+00 : f32
      %12 = vector.broadcast %cst_10 : f32 to vector<40x32xf32>
      %c0_11 = arith.constant 0 : index
      %c0_12 = arith.constant 0 : index
      %13 = vector.load %arg8[%c0_11, %c0_12] : memref<40x32xf32, #tpu.memory_space<vmem>>, vector<40x32xf32>
      tpu.vector_store %arg8[%c0_11, %c0_12], %12 {strides = array<i32>} : memref<40x32xf32, #tpu.memory_space<vmem>>, vector<40x32xf32>,
    } else {
    }
    %c0 = arith.constant 0 : index
    %c0_1 = arith.constant 0 : index
    %3 = vector.load %arg8[%c0, %c0_1] : memref<40x32xf32, #tpu.memory_space<vmem>>, vector<40x32xf32>
    %c0_2 = arith.constant 0 : index
    %c0_3 = arith.constant 0 : index
    %4 = vector.load %arg3[%c0_2, %c0_3] : memref<40x128xbf16, #tpu.memory_space<vmem>>, vector<40x128xbf16>
    %c0_4 = arith.constant 0 : index
    %c0_5 = arith.constant 0 : index
    %5 = vector.load %arg4[%c0_4, %c0_5] : memref<128x32xbf16, #tpu.memory_space<vmem>>, vector<128x32xbf16>
    %cst = arith.constant dense<0.000000e+00> : vector<40x32xf32>
    %6 = tpu.matmul %4, %5, %cst {dimension_numbers = #tpu.dot_dimension_numbers<[1], [0], [0], [1], [0, 0, 1, 1], [], []>} : vector<40x128xbf16>, vector<128x32xbf16>, vector<40x32xf32> -> vector<40x32xf32>
    %7 = arith.addf %3, %6 : vector<40x32xf32>
    %c0_6 = arith.constant 0 : index
    %c0_7 = arith.constant 0 : index
    %8 = vector.load %arg8[%c0_6, %c0_7] : memref<40x32xf32, #tpu.memory_space<vmem>>, vector<40x32xf32>
    tpu.vector_store %arg8[%c0_6, %c0_7], %7 {strides = array<i32>} : memref<40x32xf32, #tpu.memory_space<vmem>>, vector<40x32xf32>,
    %c0_i32_8 = arith.constant 0 : i32
    %9 = arith.cmpi eq, %arg2, %c0_i32_8 : i32
    %10 = arith.extui %9 : i1 to i32
    %c0_i32_9 = arith.constant 0 : i32
    %11 = arith.cmpi ne, %10, %c0_i32_9 : i32
    scf.if %11 {
      %c0_10 = arith.constant 0 : index
      %c0_11 = arith.constant 0 : index
      %12 = vector.load %arg8[%c0_10, %c0_11] : memref<40x32xf32, #tpu.memory_space<vmem>>, vector<40x32xf32>
      %c0_12 = arith.constant 0 : index
      %c0_13 = arith.constant 0 : index
      %13 = vector.load %arg5[%c0_12, %c0_13] : memref<1x32xf32, #tpu.memory_space<vmem>>, vector<1x32xf32>
      %14 = vector.broadcast %13 : vector<1x32xf32> to vector<40x32xf32>
      %15 = arith.addf %12, %14 : vector<40x32xf32>
      %c0_14 = arith.constant 0 : index
      %c0_15 = arith.constant 0 : index
      %16 = vector.load %arg6[%c0_14, %c0_15] : memref<40x32xf32, #tpu.memory_space<vmem>>, vector<40x32xf32>
      %17 = arith.addf %15, %16 : vector<40x32xf32>
      %c0_16 = arith.constant 0 : index
      %c0_17 = arith.constant 0 : index
      %18 = vector.load %arg7[%c0_16, %c0_17] : memref<40x32xf32, #tpu.memory_space<vmem>>, vector<40x32xf32>
      tpu.vector_store %arg7[%c0_16, %c0_17], %17 {strides = array<i32>} : memref<40x32xf32, #tpu.memory_space<vmem>>, vector<40x32xf32>,
    } else {
    }
    return
  }
  func.func @transform_0(%arg0: i32, %arg1: i32, %arg2: i32) -> (i32, i32) {
    %c0_i32 = arith.constant 0 : i32
    return %arg0, %arg2 : i32, i32
  }
  func.func @transform_1(%arg0: i32, %arg1: i32, %arg2: i32) -> (i32, i32) {
    %c0_i32 = arith.constant 0 : i32
    return %arg2, %arg1 : i32, i32
  }
  func.func @transform_2(%arg0: i32, %arg1: i32, %arg2: i32) -> (i32, i32) {
    %c0_i32 = arith.constant 0 : i32
    %c0_i32_0 = arith.constant 0 : i32
    return %c0_i32, %arg1 : i32, i32
  }
  func.func @transform_3(%arg0: i32, %arg1: i32, %arg2: i32) -> (i32, i32) {
    %c0_i32 = arith.constant 0 : i32
    return %arg0, %arg1 : i32, i32
  }
  func.func @transform_4(%arg0: i32, %arg1: i32, %arg2: i32) -> (i32, i32) {
    %c0_i32 = arith.constant 0 : i32
    return %arg0, %arg1 : i32, i32
  }
}

</mosaic_0001>

<bundles_post_ra>
// kernel: transformer_forward.10
= control target key start
LH: loop header
LB: loop body
LE: loop exit
PB: predicated region body
PF: predicated region fallthrough
CT: control target
= control target key end

     0   :  { %vm30_vm0 = vcmask 261120   ;;  %v359_v36 = vmov 0.0   ;;  %vm360_vm1 = vmmov 0   ;;  %vm142_vm2 = vcmask 257024   ;;  %s494_s0 = inlined_call_operand.vmem [shape: f32[40,32], index: 0, kind: input, shape index: {}]   ;;  %s495_s3 = inlined_call_operand.vmem [shape: bf16[32,96], index: 3, kind: input, shape index: {}]   ;;  %s496_s1 = inlined_call_operand.vmem [shape: f32[1,32], index: 1, kind: input, shape index: {}]   ;;  %s497_s2 = inlined_call_operand.vmem [shape: f32[1,32], index: 2, kind: input, shape index: {}]   ;;  %s498_s4 = inlined_call_operand.vmem [shape: f32[1,96], index: 4, kind: input, shape index: {}]   ;;  %s499_s5 = inlined_call_operand.vmem [shape: bf16[40,96], index: 5, kind: output, shape index: {}]  }
   0x1   :  { %v27_v0 = vld [vmem:[%s494_s0 + $0x10] sm:$0xff]  ;;  %v28_v1 = vld [vmem:[%s494_s0 + $0x18] sm:$0xff]  ;;  %v25_v2 = vld [vmem:[%s494_s0] sm:$0xff]  ;;  %338 = vmatprep.subr.bf16.mxu1 %v359_v36  ;;  %322 = vmatprep.subr.bf16.mxu0 %v359_v36  ;;  %vm276_vm3 = vcmask 781312  }
   0x2   :  { %v37_v3 = vsel %vm30_vm0, %v27_v0, 0.0  ;;  %v31_v4 = vsel %vm30_vm0, %v25_v2, 0.0  ;;  %v26_v5 = vld [vmem:[%s494_s0 + $0x8] sm:$0xff]  ;;  %v40_v6 = vsel %vm30_vm0, %v28_v1, 0.0  ;;  %v29_v8 = vld [vmem:[%s494_s0 + $0x20] sm:$0xff]  ;;  %330 = vmatprep.mubr.msk.bf16.mxu1 %vm360_vm1, %v359_v36  ;;  %326 = vmatprep.mubr.msk.bf16.mxu0 %vm360_vm1, %v359_v36 }
   0x3   :  { %38 = vadd.xlane.f32.xlu0 %v37_v3  ;;  %32 = vadd.xlane.f32.xlu1 %v31_v4  ;;  %v34_v7 = vsel %vm30_vm0, %v26_v5, 0.0  ;;  %v43_v9 = vsel %vm30_vm0, %v29_v8, 0.0  ;;  %v344_v35 = vld [vmem:[%s495_s3 + $0x8] sm:$0xff]   ;;  %v345_v37 = vld [vmem:[%s495_s3] sm:$0xff]  }
   0x4   :  { %340 = vmatpush3.bf16.msra.mxu1 %v344_v35  ;;  %323 = vmatpush3.bf16.msra.mxu0 %v344_v35  ;;  %v286_v54 = vld [vmem:[%s496_s1] ss:$0 sm:$0xff] }
   0x5   :  { %339 = vmatprep.subr.bf16.mxu1 %v359_v36  ;;  %324 = vmatprep.subr.bf16.mxu0 %v359_v36  ;;  %v287_v56 = vld [vmem:[%s497_s2] ss:$0 sm:$0xff] }
   0x7   :  { %41 = vadd.xlane.f32.xlu0 %v40_v6  ;;  %35 = vadd.xlane.f32.xlu1 %v34_v7 }
   0x8   :  { %341 = vmatpush3.bf16.msra.mxu1 %v345_v37  ;;  %325 = vmatpush3.bf16.msra.mxu0 %v345_v37 }
   0xb   :  { %44 = vadd.xlane.f32.xlu0 %v43_v9 }
  0x8c   :  { %v39_v10 = vpop.xlane.xlu0 %38  ;;  %v33_v11 = vpop.xlane.xlu1 %32 }
  0x8d   :  { %v49_v12 = vmul.f32 0.03125, %v39_v10  ;;  %v47_v13 = vmul.f32 0.03125, %v33_v11 }
  0x8f   :  { %v411_v14 = vsub.f32 %v27_v0, %v49_v12  ;;  %v413_v15 = vsub.f32 %v25_v2, %v47_v13 }
  0x90   :  { %v42_v16 = vpop.xlane.xlu0 %41  ;;  %v36_v17 = vpop.xlane.xlu1 %35 }
  0x91   :  { %v50_v18 = vmul.f32 0.03125, %v42_v16  ;;  %v59_v19 = vmul.f32 %v411_v14, %v411_v14  ;;  %v48_v20 = vmul.f32 0.03125, %v36_v17  ;;  %v57_v21 = vmul.f32 %v413_v15, %v413_v15 }
  0x93   :  { %v419_v22 = vsub.f32 %v28_v1, %v50_v18  ;;  %v68_v23 = vsel %vm30_vm0, %v59_v19, 0.0  ;;  %v422_v24 = vsub.f32 %v26_v5, %v48_v20  ;;  %v62_v28 = vsel %vm30_vm0, %v57_v21, 0.0  ;;  %v293_v19 = vld [vmem:[%s498_s4] ss:$0 sm:$0xff] }
  0x94   :  { %v45_v25 = vpop.xlane.xlu0 %44  ;;  %69 = vadd.xlane.f32.xlu1 %v68_v23 }
  0x95   :  { %v51_v26 = vmul.f32 0.03125, %v45_v25  ;;  %v60_v27 = vmul.f32 %v419_v22, %v419_v22  ;;  %v58_v29 = vmul.f32 %v422_v24, %v422_v24 }
  0x97   :  { %v429_v30 = vsub.f32 %v29_v8, %v51_v26  ;;  %v71_v31 = vsel %vm30_vm0, %v60_v27, 0.0  ;;  %v65_v33 = vsel %vm30_vm0, %v58_v29, 0.0 }
  0x98   :  { %72 = vadd.xlane.f32.xlu0 %v71_v31  ;;  %63 = vadd.xlane.f32.xlu1 %v62_v28 }
  0x99   :  { %v61_v32 = vmul.f32 %v429_v30, %v429_v30 }
  0x9b   :  { %v74_v34 = vsel %vm30_vm0, %v61_v32, 0.0 }
  0x9c   :  { %75 = vadd.xlane.f32.xlu1 %v74_v34  ;;  %66 = vadd.xlane.f32.xlu0 %v65_v33 }
 0x11d   :  { %v70_v38 = vpop.xlane.xlu1 %69 }
 0x11e   :  { %v79_v39 = vmul.f32 0.03125, %v70_v38 }
 0x120   :  { %v84_v40 = vadd.f32 1e-05, %v79_v39 }
 0x121   :  { %v73_v41 = vpop.xlane.xlu0 %72  ;;  %v64_v42 = vpop.xlane.xlu1 %63 }
 0x122   :  { %349 = vrsqrt.f32 %v84_v40  ;;  %v80_v43 = vmul.f32 0.03125, %v73_v41  ;;  %v77_v44 = vmul.f32 0.03125, %v64_v42 }
 0x124   :  { %v85_v45 = vadd.f32 1e-05, %v80_v43  ;;  %v82_v46 = vadd.f32 1e-05, %v77_v44 }
 0x125   :  { %v67_v47 = vpop.xlane.xlu0 %66  ;;  %v76_v48 = vpop.xlane.xlu1 %75 }
 0x126   :  { %351 = vrsqrt.f32 %v85_v45  ;;  %v78_v49 = vmul.f32 0.03125, %v67_v47  ;;  %v81_v50 = vmul.f32 0.03125, %v76_v48 }
 0x127   :  { %353 = vrsqrt.f32 %v82_v46 }
 0x128   :  { %v83_v51 = vadd.f32 1e-05, %v78_v49  ;;  %v86_v52 = vadd.f32 1e-05, %v81_v50 }
 0x12a   :  { %355 = vrsqrt.f32 %v83_v51 }
 0x12b   :  { %357 = vrsqrt.f32 %v86_v52 }
 0x12f   :  { %v350_v53 = vpop.eup %349 }
 0x130   :  { %v94_v55 = vmul.f32 %v350_v53, %v411_v14 }
 0x132   :  { %v106_v57 = vmul.f32 %v286_v54, %v94_v55 }
 0x133   :  { %v352_v58 = vpop.eup %351 }
 0x134   :  { %v354_v59 = vpop.eup %353  ;;  %v118_v60 = vadd.f32 %v287_v56, %v106_v57  ;;  %v95_v61 = vmul.f32 %v352_v58, %v419_v22 }
 0x135   :  { %v92_v62 = vmul.f32 %v354_v59, %v413_v15 }
 0x136   :  { %v309_v63 = vpack.c.bf16 %v118_v60, %v118_v60  ;;  %v107_v0 = vmul.f32 %v286_v54, %v95_v61 }
 0x137   :  { %v356_v1 = vpop.eup %355  ;;  %v104_v2 = vmul.f32 %v286_v54, %v92_v62 }
 0x138   :  { %v358_v3 = vpop.eup %357  ;;  %145 = vst.msk [vmem:[#allocation2 + $0x8] sm:$0xf] %vm142_vm2, %v309_v63  ;;  %v119_v4 = vadd.f32 %v287_v56, %v107_v0  ;;  %v93_v5 = vmul.f32 %v356_v1, %v422_v24 }
 0x139   :  { %v116_v6 = vadd.f32 %v287_v56, %v104_v2  ;;  %v96_v7 = vmul.f32 %v358_v3, %v429_v30 }
 0x13a   :  { %v310_v8 = vpack.c.bf16 %v119_v4, %v119_v4  ;;  %v105_v9 = vmul.f32 %v286_v54, %v93_v5 }
 0x13b   :  { %v307_v10 = vpack.c.bf16 %v116_v6, %v116_v6  ;;  %v108_v11 = vmul.f32 %v286_v54, %v96_v7 }
 0x13c   :  { %146 = vst.msk [vmem:[#allocation2 + $0xc] sm:$0xf] %vm142_vm2, %v310_v8  ;;  %v117_v12 = vadd.f32 %v287_v56, %v105_v9 }
 0x13d   :  { %143 = vst.msk [vmem:[#allocation2] sm:$0xf] %vm142_vm2, %v307_v10  ;;  %v120_v13 = vadd.f32 %v287_v56, %v108_v11 }
 0x13e   :  { %v308_v14 = vpack.c.bf16 %v117_v12, %v117_v12 }
 0x13f   :  { %v311_v15 = vpack.c.bf16 %v120_v13, %v120_v13 }
 0x140   :  { %144 = vst.msk [vmem:[#allocation2 + $0x4] sm:$0xf] %vm142_vm2, %v308_v14 }
 0x141   :  { %147 = vst.msk [vmem:[#allocation2 + $0x10] sm:$0xf] %vm142_vm2, %v311_v15 }
 0x143   :  { %v346_v16 = vld [vmem:[#allocation2 + $0x8] sm:$0xff]  }
 0x144   :  { %331 = vmatmul.mubr.msk.bf16.vlgmr.msra.gmra.mxu1 %vm30_vm0, %v346_v16 }
 0x145   :  { %334 = vmatprep.mubr.msk.bf16.mxu1 %vm360_vm1, %v359_v36 }
 0x147   :  { %v347_v17 = vld [vmem:[#allocation2] sm:$0xff]  }
 0x148   :  { %327 = vmatmul.mubr.msk.bf16.vlgmr.msra.gmra.mxu0 %vm30_vm0, %v347_v17  ;;  %v348_v18 = vld [vmem:[#allocation2 + $0x10] ss:$0 sps:$4 sm:$0xff]  }
 0x14c   :  { %335 = vmatmul.mubr.msk.bf16.gmra.mxu1 %vm30_vm0, %v348_v18 }
 0x204   :  { %v241_v20 = vpop.f32.mrf.mxu1 }
 0x205   :  { %v242_v21 = vadd.f32 %v293_v19, %v241_v20 }
 0x206   :  { %v332_v22 = vpop.f32.mrf.mxu1 }
 0x207   :  { %v314_v23 = vpack.c.bf16 %v242_v21, %v242_v21 }
 0x208   :  { %v233_v24 = vpop.f32.mrf.mxu0  ;;  %v244_v25 = vpop.f32.mrf.mxu1 }
 0x209   :  { %279 = vst.msk [vmem:[%s499_s5 + $0x8] sm:$0xf] %vm276_vm3, %v314_v23  ;;  %v234_v26 = vadd.f32 %v293_v19, %v233_v24  ;;  %v245_v27 = vadd.f32 %v293_v19, %v244_v25 }
 0x20a   :  { %v328_v28 = vpop.f32.mrf.mxu0  ;;  %v333_v29 = vpop.f32.mrf.mxu1 }
 0x20b   :  { %v312_v30 = vpack.c.bf16 %v234_v26, %v234_v26  ;;  %v315_v31 = vpack.c.bf16 %v245_v27, %v245_v27 }
 0x20c   :  { %v236_v32 = vpop.f32.mrf.mxu0  ;;  %v249_v33 = vpop.f32.mrf.mxu1 }
 0x20d   :  { %277 = vst.msk [vmem:[%s499_s5] sm:$0xf] %vm276_vm3, %v312_v30  ;;  %280 = vst.msk [vmem:[%s499_s5 + $0xc] sm:$0xf] %vm276_vm3, %v315_v31  ;;  %v237_v34 = vadd.f32 %v293_v19, %v236_v32  ;;  %v250_v35 = vadd.f32 %v293_v19, %v249_v33 }
 0x20e   :  { %v329_v36 = vpop.f32.mrf.mxu0  ;;  %v336_v37 = vpop.f32.mrf.mxu1 }
 0x20f   :  { %v313_v38 = vpack.c.bf16 %v237_v34, %v237_v34  ;;  %v316_v39 = vpack.c.bf16 %v250_v35, %v250_v35 }
 0x210   :  { %v252_v40 = vpop.f32.mrf.mxu1 }
 0x211   :  { %278 = vst.msk [vmem:[%s499_s5 + $0x4] sm:$0xf] %vm276_vm3, %v313_v38  ;;  %281 = vst.msk [vmem:[%s499_s5 + $0x10] sm:$0xf] %vm276_vm3, %v316_v39 }
 0x212   :  { %v337_v41 = vpop.f32.mrf.mxu1 }

// kernel: transformer_forward.12
= control target key start
LH: loop header
LB: loop body
LE: loop exit
PB: predicated region body
PF: predicated region fallthrough
CT: control target
= control target key end

     0   :  { %vm22_vm0 = vcmask 261120   ;;  %v223_v0 = vmov 0.0   ;;  %vm224_vm1 = vmmov 0   ;;  %s316_s1 = inlined_call_operand.vmem [shape: bf16[32,32], index: 1, kind: input, shape index: {}]   ;;  %s317_s0 = inlined_call_operand.vmem [shape: bf16[40,32], index: 0, kind: input, shape index: {}]   ;;  %s318_s2 = inlined_call_operand.vmem [shape: f32[1,32], index: 2, kind: input, shape index: {}]   ;;  %s319_s3 = inlined_call_operand.vmem [shape: f32[40,32], index: 3, kind: input, shape index: {}, may-alias: {3,4}]   ;;  %s320_s4 = inlined_call_operand.vmem [shape: f32[40,32], index: 4, kind: output, shape index: {}, may-alias: {3,4}]  }
   0x1   :  { %196 = vmatprep.subr.bf16.mxu0 %v223_v0  ;;  %212 = vmatprep.subr.bf16.mxu1 %v223_v0  ;;  %v218_v1 = vld [vmem:[%s316_s1 + $0x8] sm:$0xff]   ;;  %23 = vst.msk [vmem:[#allocation2] sm:$0xff] %vm22_vm0, %v223_v0  ;;  %24 = vst.msk [vmem:[#allocation2 + $0x8] sm:$0xff] %vm22_vm0, %v223_v0  ;;  %v219_v2 = vld [vmem:[%s316_s1] sm:$0xff]  }
   0x2   :  { %25 = vst.msk [vmem:[#allocation2 + $0x10] sm:$0xff] %vm22_vm0, %v223_v0  ;;  %26 = vst.msk [vmem:[#allocation2 + $0x18] sm:$0xff] %vm22_vm0, %v223_v0  ;;  %200 = vmatprep.mubr.msk.bf16.mxu0 %vm224_vm1, %v223_v0  ;;  %204 = vmatprep.mubr.msk.bf16.mxu1 %vm224_vm1, %v223_v0  ;;  %v220_v3 = vld [vmem:[%s317_s0] sm:$0xff]   ;;  %v221_v4 = vld [vmem:[%s317_s0 + $0x8] sm:$0xff]  }
   0x3   :  { %27 = vst.msk [vmem:[#allocation2 + $0x20] sm:$0xff] %vm22_vm0, %v223_v0  ;;  %197 = vmatpush3.bf16.msra.mxu0 %v218_v1  ;;  %214 = vmatpush3.bf16.msra.mxu1 %v218_v1  ;;  %v222_v5 = vld [vmem:[%s317_s0 + $0x10] ss:$0 sps:$4 sm:$0xff]   ;;  %v190_v23 = vld [vmem:[%s318_s2] ss:$0 sm:$0xff]  ;;  %v164_v36 = vld [vmem:[%s319_s3 + $0x8] sm:$0xff] }
   0x4   :  { %198 = vmatprep.subr.bf16.mxu0 %v223_v0  ;;  %213 = vmatprep.subr.bf16.mxu1 %v223_v0  ;;  %v163_v25 = vld [vmem:[%s319_s3] sm:$0xff]  ;;  %v165_v29 = vld [vmem:[%s319_s3 + $0x10] sm:$0xff]  ;;  %v166_v39 = vld [vmem:[%s319_s3 + $0x18] sm:$0xff] }
   0x7   :  { %199 = vmatpush3.bf16.msra.mxu0 %v219_v2  ;;  %215 = vmatpush3.bf16.msra.mxu1 %v219_v2 }
   0x8   :  { %v28_v6 = vld [vmem:[#allocation2] sm:$0xff]  ;;  %v29_v14 = vld [vmem:[#allocation2 + $0x8] sm:$0xff] }
   0x9   :  { %v30_v7 = vld [vmem:[#allocation2 + $0x10] sm:$0xff]  ;;  %v31_v15 = vld [vmem:[#allocation2 + $0x18] sm:$0xff] }
   0xa   :  { %201 = vmatmul.mubr.msk.bf16.vlgmr.msra.gmra.mxu0 %vm22_vm0, %v220_v3  ;;  %205 = vmatmul.mubr.msk.bf16.vlgmr.msra.gmra.mxu1 %vm22_vm0, %v221_v4  ;;  %v32_v22 = vld [vmem:[#allocation2 + $0x20] sm:$0xff] }
   0xb   :  { %208 = vmatprep.mubr.msk.bf16.mxu1 %vm224_vm1, %v223_v0 }
  0x12   :  { %209 = vmatmul.mubr.msk.bf16.gmra.mxu1 %vm22_vm0, %v222_v5 }
  0xca   :  { %v111_v8 = vpop.f32.mrf.mxu0  ;;  %v119_v9 = vpop.f32.mrf.mxu1 }
  0xcb   :  { %v133_v10 = vadd.f32 %v111_v8, %v28_v6  ;;  %v135_v11 = vadd.f32 %v119_v9, %v30_v7 }
  0xcc   :  { %v202_v12 = vpop.f32.mrf.mxu0  ;;  %v206_v13 = vpop.f32.mrf.mxu1 }
  0xcd   :  { %138 = vst.msk [vmem:[#allocation2] sm:$0xff] %vm22_vm0, %v133_v10  ;;  %140 = vst.msk [vmem:[#allocation2 + $0x10] sm:$0xff] %vm22_vm0, %v135_v11 }
  0xce   :  { %v114_v16 = vpop.f32.mrf.mxu0  ;;  %v122_v17 = vpop.f32.mrf.mxu1 }
  0xcf   :  { %v134_v18 = vadd.f32 %v114_v16, %v29_v14  ;;  %v136_v19 = vadd.f32 %v122_v17, %v31_v15 }
  0xd0   :  { %v203_v20 = vpop.f32.mrf.mxu0  ;;  %v207_v21 = vpop.f32.mrf.mxu1 }
  0xd1   :  { %139 = vst.msk [vmem:[#allocation2 + $0x8] sm:$0xff] %vm22_vm0, %v134_v18  ;;  %141 = vst.msk [vmem:[#allocation2 + $0x18] sm:$0xff] %vm22_vm0, %v136_v19 }
  0xd2   :  { %v127_v24 = vpop.f32.mrf.mxu1 }
  0xd3   :  { %v137_v26 = vadd.f32 %v127_v24, %v32_v22 }
  0xd4   :  { %v146_v27 = vld [vmem:[#allocation2] sm:$0xff]  ;;  %v148_v28 = vld [vmem:[#allocation2 + $0x10] sm:$0xff]  ;;  %v210_v30 = vpop.f32.mrf.mxu1 }
  0xd5   :  { %v158_v31 = vadd.f32 %v190_v23, %v146_v27  ;;  %v160_v32 = vadd.f32 %v190_v23, %v148_v28  ;;  %142 = vst.msk [vmem:[#allocation2 + $0x20] sm:$0xff] %vm22_vm0, %v137_v26 }
  0xd6   :  { %v130_v33 = vpop.f32.mrf.mxu1 }
  0xd7   :  { %v168_v34 = vadd.f32 %v163_v25, %v158_v31  ;;  %v170_v35 = vadd.f32 %v165_v29, %v160_v32 }
  0xd8   :  { %v147_v37 = vld [vmem:[#allocation2 + $0x8] sm:$0xff]  ;;  %v149_v38 = vld [vmem:[#allocation2 + $0x18] sm:$0xff]  ;;  %v211_v40 = vpop.f32.mrf.mxu1 }
  0xd9   :  { %173 = vst.msk [vmem:[%s320_s4] sm:$0xff] %vm22_vm0, %v168_v34  ;;  %175 = vst.msk [vmem:[%s320_s4 + $0x10] sm:$0xff] %vm22_vm0, %v170_v35  ;;  %v159_v41 = vadd.f32 %v190_v23, %v147_v37  ;;  %v161_v42 = vadd.f32 %v190_v23, %v149_v38 }
  0xdb   :  { %v169_v43 = vadd.f32 %v164_v36, %v159_v41  ;;  %v171_v44 = vadd.f32 %v166_v39, %v161_v42 }
  0xdc   :  { %v150_v45 = vld [vmem:[#allocation2 + $0x20] sm:$0xff] }
  0xdd   :  { %v162_v47 = vadd.f32 %v190_v23, %v150_v45 }
  0xe0   :  { %v167_v46 = vld [vmem:[%s319_s3 + $0x20] sm:$0xff] }
  0xe1   :  { %174 = vst.msk [vmem:[%s320_s4 + $0x8] sm:$0xff] %vm22_vm0, %v169_v43  ;;  %176 = vst.msk [vmem:[%s320_s4 + $0x18] sm:$0xff] %vm22_vm0, %v171_v44  ;;  %v172_v48 = vadd.f32 %v167_v46, %v162_v47 }
  0xe3   :  { %177 = vst.msk [vmem:[%s320_s4 + $0x20] sm:$0xff] %vm22_vm0, %v172_v48 }

// kernel: transformer_forward.13
= control target key start
LH: loop header
LB: loop body
LE: loop exit
PB: predicated region body
PF: predicated region fallthrough
CT: control target
= control target key end

     0   :  { %vm30_vm0 = vcmask 261120   ;;  %v434_v36 = vmov 0.0   ;;  %vm435_vm1 = vmmov 0   ;;  %vm142_vm2 = vcmask 257024   ;;  %s558_s0 = inlined_call_operand.vmem [shape: f32[40,32], index: 0, kind: input, shape index: {}]   ;;  %s559_s3 = inlined_call_operand.vmem [shape: bf16[32,128], index: 3, kind: input, shape index: {}]   ;;  %s560_s1 = inlined_call_operand.vmem [shape: f32[1,32], index: 1, kind: input, shape index: {}]   ;;  %s561_s2 = inlined_call_operand.vmem [shape: f32[1,32], index: 2, kind: input, shape index: {}]   ;;  %s562_s4 = inlined_call_operand.vmem [shape: f32[1,128], index: 4, kind: input, shape index: {}]   ;;  %s563_s5 = inlined_call_operand.vmem [shape: bf16[40,128], index: 5, kind: output, shape index: {}]  }
   0x1   :  { %v27_v0 = vld [vmem:[%s558_s0 + $0x10] sm:$0xff]  ;;  %v28_v1 = vld [vmem:[%s558_s0 + $0x18] sm:$0xff]  ;;  %v25_v2 = vld [vmem:[%s558_s0] sm:$0xff]  ;;  %393 = vmatprep.subr.bf16.mxu1 %v434_v36  ;;  %377 = vmatprep.subr.bf16.mxu0 %v434_v36 }
   0x2   :  { %v37_v3 = vsel %vm30_vm0, %v27_v0, 0.0  ;;  %v31_v4 = vsel %vm30_vm0, %v25_v2, 0.0  ;;  %v26_v5 = vld [vmem:[%s558_s0 + $0x8] sm:$0xff]  ;;  %v40_v6 = vsel %vm30_vm0, %v28_v1, 0.0  ;;  %v29_v8 = vld [vmem:[%s558_s0 + $0x20] sm:$0xff]  ;;  %385 = vmatprep.mubr.msk.bf16.mxu1 %vm435_vm1, %v434_v36  ;;  %381 = vmatprep.mubr.msk.bf16.mxu0 %vm435_vm1, %v434_v36 }
   0x3   :  { %38 = vadd.xlane.f32.xlu0 %v37_v3  ;;  %32 = vadd.xlane.f32.xlu1 %v31_v4  ;;  %v34_v7 = vsel %vm30_vm0, %v26_v5, 0.0  ;;  %v43_v9 = vsel %vm30_vm0, %v29_v8, 0.0  ;;  %v399_v35 = vld [vmem:[%s559_s3 + $0x8] sm:$0xff]   ;;  %v400_v37 = vld [vmem:[%s559_s3] sm:$0xff]  }
   0x4   :  { %395 = vmatpush3.bf16.msra.mxu1 %v399_v35  ;;  %378 = vmatpush3.bf16.msra.mxu0 %v399_v35  ;;  %v325_v54 = vld [vmem:[%s560_s1] ss:$0 sm:$0xff] }
   0x5   :  { %394 = vmatprep.subr.bf16.mxu1 %v434_v36  ;;  %379 = vmatprep.subr.bf16.mxu0 %v434_v36  ;;  %v326_v56 = vld [vmem:[%s561_s2] ss:$0 sm:$0xff] }
   0x7   :  { %41 = vadd.xlane.f32.xlu0 %v40_v6  ;;  %35 = vadd.xlane.f32.xlu1 %v34_v7 }
   0x8   :  { %396 = vmatpush3.bf16.msra.mxu1 %v400_v37  ;;  %380 = vmatpush3.bf16.msra.mxu0 %v400_v37 }
   0xb   :  { %44 = vadd.xlane.f32.xlu0 %v43_v9 }
  0x8c   :  { %v39_v10 = vpop.xlane.xlu0 %38  ;;  %v33_v11 = vpop.xlane.xlu1 %32 }
  0x8d   :  { %v49_v12 = vmul.f32 0.03125, %v39_v10  ;;  %v47_v13 = vmul.f32 0.03125, %v33_v11 }
  0x8f   :  { %v486_v14 = vsub.f32 %v27_v0, %v49_v12  ;;  %v488_v15 = vsub.f32 %v25_v2, %v47_v13 }
  0x90   :  { %v42_v16 = vpop.xlane.xlu0 %41  ;;  %v36_v17 = vpop.xlane.xlu1 %35 }
  0x91   :  { %v50_v18 = vmul.f32 0.03125, %v42_v16  ;;  %v59_v19 = vmul.f32 %v486_v14, %v486_v14  ;;  %v48_v20 = vmul.f32 0.03125, %v36_v17  ;;  %v57_v21 = vmul.f32 %v488_v15, %v488_v15 }
  0x93   :  { %v494_v22 = vsub.f32 %v28_v1, %v50_v18  ;;  %v68_v23 = vsel %vm30_vm0, %v59_v19, 0.0  ;;  %v497_v24 = vsub.f32 %v26_v5, %v48_v20  ;;  %v62_v28 = vsel %vm30_vm0, %v57_v21, 0.0  ;;  %v332_v19 = vld [vmem:[%s562_s4] ss:$0 sm:$0xff] }
  0x94   :  { %v45_v25 = vpop.xlane.xlu0 %44  ;;  %69 = vadd.xlane.f32.xlu1 %v68_v23 }
  0x95   :  { %v51_v26 = vmul.f32 0.03125, %v45_v25  ;;  %v60_v27 = vmul.f32 %v494_v22, %v494_v22  ;;  %v58_v29 = vmul.f32 %v497_v24, %v497_v24 }
  0x97   :  { %v504_v30 = vsub.f32 %v29_v8, %v51_v26  ;;  %v71_v31 = vsel %vm30_vm0, %v60_v27, 0.0  ;;  %v65_v33 = vsel %vm30_vm0, %v58_v29, 0.0 }
  0x98   :  { %72 = vadd.xlane.f32.xlu0 %v71_v31  ;;  %63 = vadd.xlane.f32.xlu1 %v62_v28 }
  0x99   :  { %v61_v32 = vmul.f32 %v504_v30, %v504_v30 }
  0x9b   :  { %v74_v34 = vsel %vm30_vm0, %v61_v32, 0.0 }
  0x9c   :  { %75 = vadd.xlane.f32.xlu1 %v74_v34  ;;  %66 = vadd.xlane.f32.xlu0 %v65_v33 }
 0x11d   :  { %v70_v38 = vpop.xlane.xlu1 %69 }
 0x11e   :  { %v79_v39 = vmul.f32 0.03125, %v70_v38 }
 0x120   :  { %v84_v40 = vadd.f32 1e-05, %v79_v39 }
 0x121   :  { %v73_v41 = vpop.xlane.xlu0 %72  ;;  %v64_v42 = vpop.xlane.xlu1 %63 }
 0x122   :  { %404 = vrsqrt.f32 %v84_v40  ;;  %v80_v43 = vmul.f32 0.03125, %v73_v41  ;;  %v77_v44 = vmul.f32 0.03125, %v64_v42 }
 0x124   :  { %v85_v45 = vadd.f32 1e-05, %v80_v43  ;;  %v82_v46 = vadd.f32 1e-05, %v77_v44 }
 0x125   :  { %v67_v47 = vpop.xlane.xlu0 %66  ;;  %v76_v48 = vpop.xlane.xlu1 %75 }
 0x126   :  { %406 = vrsqrt.f32 %v85_v45  ;;  %v78_v49 = vmul.f32 0.03125, %v67_v47  ;;  %v81_v50 = vmul.f32 0.03125, %v76_v48 }
 0x127   :  { %408 = vrsqrt.f32 %v82_v46 }
 0x128   :  { %v83_v51 = vadd.f32 1e-05, %v78_v49  ;;  %v86_v52 = vadd.f32 1e-05, %v81_v50 }
 0x12a   :  { %410 = vrsqrt.f32 %v83_v51 }
 0x12b   :  { %412 = vrsqrt.f32 %v86_v52 }
 0x12f   :  { %v405_v53 = vpop.eup %404 }
 0x130   :  { %v94_v55 = vmul.f32 %v405_v53, %v486_v14 }
 0x132   :  { %v106_v57 = vmul.f32 %v325_v54, %v94_v55 }
 0x133   :  { %v407_v58 = vpop.eup %406 }
 0x134   :  { %v409_v59 = vpop.eup %408  ;;  %v118_v60 = vadd.f32 %v326_v56, %v106_v57  ;;  %v95_v61 = vmul.f32 %v407_v58, %v494_v22 }
 0x135   :  { %v92_v62 = vmul.f32 %v409_v59, %v488_v15 }
 0x136   :  { %v353_v63 = vpack.c.bf16 %v118_v60, %v118_v60  ;;  %v107_v0 = vmul.f32 %v325_v54, %v95_v61 }
 0x137   :  { %v411_v1 = vpop.eup %410  ;;  %v104_v2 = vmul.f32 %v325_v54, %v92_v62 }
 0x138   :  { %v413_v3 = vpop.eup %412  ;;  %145 = vst.msk [vmem:[#allocation2 + $0x8] sm:$0xf] %vm142_vm2, %v353_v63  ;;  %v119_v4 = vadd.f32 %v326_v56, %v107_v0  ;;  %v93_v5 = vmul.f32 %v411_v1, %v497_v24 }
 0x139   :  { %v116_v6 = vadd.f32 %v326_v56, %v104_v2  ;;  %v96_v7 = vmul.f32 %v413_v3, %v504_v30 }
 0x13a   :  { %v354_v8 = vpack.c.bf16 %v119_v4, %v119_v4  ;;  %v105_v9 = vmul.f32 %v325_v54, %v93_v5 }
 0x13b   :  { %v351_v10 = vpack.c.bf16 %v116_v6, %v116_v6  ;;  %v108_v11 = vmul.f32 %v325_v54, %v96_v7 }
 0x13c   :  { %146 = vst.msk [vmem:[#allocation2 + $0xc] sm:$0xf] %vm142_vm2, %v354_v8  ;;  %v117_v12 = vadd.f32 %v326_v56, %v105_v9 }
 0x13d   :  { %143 = vst.msk [vmem:[#allocation2] sm:$0xf] %vm142_vm2, %v351_v10  ;;  %v120_v13 = vadd.f32 %v326_v56, %v108_v11 }
 0x13e   :  { %v352_v14 = vpack.c.bf16 %v117_v12, %v117_v12 }
 0x13f   :  { %v355_v15 = vpack.c.bf16 %v120_v13, %v120_v13 }
 0x140   :  { %144 = vst.msk [vmem:[#allocation2 + $0x4] sm:$0xf] %vm142_vm2, %v352_v14 }
 0x141   :  { %147 = vst.msk [vmem:[#allocation2 + $0x10] sm:$0xf] %vm142_vm2, %v355_v15 }
 0x143   :  { %v401_v16 = vld [vmem:[#allocation2 + $0x8] sm:$0xff]  }
 0x144   :  { %386 = vmatmul.mubr.msk.bf16.vlgmr.msra.gmra.mxu1 %vm30_vm0, %v401_v16 }
 0x145   :  { %389 = vmatprep.mubr.msk.bf16.mxu1 %vm435_vm1, %v434_v36 }
 0x147   :  { %v402_v17 = vld [vmem:[#allocation2] sm:$0xff]  }
 0x148   :  { %382 = vmatmul.mubr.msk.bf16.vlgmr.msra.gmra.mxu0 %vm30_vm0, %v402_v17  ;;  %v403_v18 = vld [vmem:[#allocation2 + $0x10] ss:$0 sps:$4 sm:$0xff]  }
 0x14c   :  { %390 = vmatmul.mubr.msk.bf16.gmra.mxu1 %vm30_vm0, %v403_v18 }
 0x204   :  { %v241_v20 = vpop.f32.mrf.mxu1 }
 0x205   :  { %v242_v21 = vadd.f32 %v332_v19, %v241_v20 }
 0x206   :  { %v387_v22 = vpop.f32.mrf.mxu1 }
 0x207   :  { %v343_v23 = vmul.f32 -1.702, %v242_v21 }
 0x208   :  { %v233_v24 = vpop.f32.mrf.mxu0  ;;  %v244_v25 = vpop.f32.mrf.mxu1 }
 0x209   :  { %v269_v26 = vmul.f32 1.442695, %v343_v23  ;;  %v234_v27 = vadd.f32 %v332_v19, %v233_v24  ;;  %v245_v28 = vadd.f32 %v332_v19, %v244_v25 }
 0x20a   :  { %v383_v29 = vpop.f32.mrf.mxu0  ;;  %v388_v30 = vpop.f32.mrf.mxu1 }
 0x20b   :  { %414 = vpow2.f32 %v269_v26  ;;  %v341_v31 = vmul.f32 -1.702, %v234_v27  ;;  %v344_v32 = vmul.f32 -1.702, %v245_v28 }
 0x20c   :  { %v236_v33 = vpop.f32.mrf.mxu0  ;;  %v249_v34 = vpop.f32.mrf.mxu1 }
 0x20d   :  { %v265_v35 = vmul.f32 1.442695, %v341_v31  ;;  %v271_v36 = vmul.f32 1.442695, %v344_v32  ;;  %v237_v37 = vadd.f32 %v332_v19, %v236_v33  ;;  %v250_v38 = vadd.f32 %v332_v19, %v249_v34 }
 0x20e   :  { %v384_v39 = vpop.f32.mrf.mxu0  ;;  %v391_v40 = vpop.f32.mrf.mxu1 }
 0x20f   :  { %416 = vpow2.f32 %v265_v35  ;;  %v342_v41 = vmul.f32 -1.702, %v237_v37  ;;  %v345_v42 = vmul.f32 -1.702, %v250_v38 }
 0x210   :  { %418 = vpow2.f32 %v271_v36  ;;  %v252_v43 = vpop.f32.mrf.mxu1 }
 0x211   :  { %v267_v44 = vmul.f32 1.442695, %v342_v41  ;;  %v273_v45 = vmul.f32 1.442695, %v345_v42 }
 0x212   :  { %v392_v46 = vpop.f32.mrf.mxu1 }
 0x213   :  { %420 = vpow2.f32 %v267_v44 }
 0x214   :  { %422 = vpow2.f32 %v273_v45 }
 0x218   :  { %v415_v47 = vpop.eup %414 }
 0x219   :  { %v277_v48 = vadd.f32 1.0, %v415_v47 }
 0x21b   :  { %424 = vrcp.f32 %v277_v48 }
 0x21c   :  { %v417_v49 = vpop.eup %416 }
 0x21d   :  { %v419_v50 = vpop.eup %418  ;;  %v275_v51 = vadd.f32 1.0, %v417_v49 }
 0x21e   :  { %v278_v52 = vadd.f32 1.0, %v419_v50 }
 0x220   :  { %v421_v53 = vpop.eup %420  ;;  %426 = vrcp.f32 %v278_v52 }
 0x221   :  { %v423_v54 = vpop.eup %422  ;;  %428 = vrcp.f32 %v275_v51  ;;  %v276_v55 = vadd.f32 1.0, %v421_v53 }
 0x222   :  { %v279_v56 = vadd.f32 1.0, %v423_v54 }
 0x223   :  { %430 = vrcp.f32 %v276_v55 }
 0x224   :  { %432 = vrcp.f32 %v279_v56 }
 0x228   :  { %v425_v57 = vpop.eup %424 }
 0x229   :  { %v292_v60 = vmul.f32 %v425_v57, %v242_v21 }
 0x22d   :  { %v427_v58 = vpop.eup %426 }
 0x22e   :  { %v429_v59 = vpop.eup %428  ;;  %v293_v61 = vmul.f32 %v427_v58, %v245_v28 }
 0x22f   :  { %v290_v1 = vmul.f32 %v429_v59, %v234_v27 }
 0x230   :  { %v431_v62 = vpop.eup %430  ;;  %v369_v63 = vpack.c.bf16 %v293_v61, %v292_v60 }
 0x231   :  { %v433_v0 = vpop.eup %432  ;;  %v291_v2 = vmul.f32 %v431_v62, %v237_v37 }
 0x232   :  { %371 = vst [vmem:[%s563_s5 + $0x8] sm:$0xff] %v369_v63   ;;  %v294_v3 = vmul.f32 %v433_v0, %v250_v38 }
 0x233   :  { %v364_v4 = vpack.c.bf16 %v291_v2, %v290_v1 }
 0x234   :  { %v360_v5 = vpack.c.bf16 %v294_v3, %v294_v3 }
 0x235   :  { %365 = vst [vmem:[%s563_s5] sm:$0xff] %v364_v4  }
 0x236   :  { %320 = vst [vmem:[%s563_s5 + $0x10] sm:$0xf] %v360_v5 }

// kernel: transformer_forward.14
= control target key start
LH: loop header
LB: loop body
LE: loop exit
PB: predicated region body
PF: predicated region fallthrough
CT: control target
= control target key end

     0   :  { %vm22_vm0 = vcmask 261120   ;;  %v304_v0 = vmov 0.0   ;;  %vm305_vm1 = vmmov 0   ;;  %s415_s1 = inlined_call_operand.vmem [shape: bf16[128,32], index: 1, kind: input, shape index: {}]   ;;  %s416_s0 = inlined_call_operand.vmem [shape: bf16[40,128], index: 0, kind: input, shape index: {}]   ;;  %s417_s2 = inlined_call_operand.vmem [shape: f32[1,32], index: 2, kind: input, shape index: {}]   ;;  %s418_s3 = inlined_call_operand.vmem [shape: f32[40,32], index: 3, kind: input, shape index: {}, may-alias: {3,4}]   ;;  %s419_s4 = inlined_call_operand.vmem [shape: f32[40,32], index: 4, kind: output, shape index: {}, may-alias: {3,4}]  }
   0x1   :  { %247 = vmatprep.subr.bf16.mxu0 %v304_v0  ;;  %275 = vmatprep.subr.bf16.mxu1 %v304_v0  ;;  %v293_v1 = vld [vmem:[%s415_s1 + $0x38] sm:$0xff]   ;;  %23 = vst.msk [vmem:[#allocation2] sm:$0xff] %vm22_vm0, %v304_v0  ;;  %24 = vst.msk [vmem:[#allocation2 + $0x8] sm:$0xff] %vm22_vm0, %v304_v0  ;;  %v294_v2 = vld [vmem:[%s415_s1 + $0x30] sm:$0xff]  }
   0x2   :  { %25 = vst.msk [vmem:[#allocation2 + $0x10] sm:$0xff] %vm22_vm0, %v304_v0  ;;  %26 = vst.msk [vmem:[#allocation2 + $0x18] sm:$0xff] %vm22_vm0, %v304_v0  ;;  %263 = vmatprep.mubr.msk.bf16.mxu0 %vm305_vm1, %v304_v0  ;;  %267 = vmatprep.mubr.msk.bf16.mxu1 %vm305_vm1, %v304_v0  ;;  %v295_v3 = vld [vmem:[%s415_s1 + $0x28] sm:$0xff]   ;;  %v296_v4 = vld [vmem:[%s415_s1 + $0x20] sm:$0xff]  }
   0x3   :  { %27 = vst.msk [vmem:[#allocation2 + $0x20] sm:$0xff] %vm22_vm0, %v304_v0  ;;  %248 = vmatpush3.bf16.msra.mxu0 %v293_v1  ;;  %283 = vmatpush3.bf16.msra.mxu1 %v293_v1  ;;  %v297_v5 = vld [vmem:[%s415_s1 + $0x18] sm:$0xff]   ;;  %v298_v6 = vld [vmem:[%s415_s1 + $0x10] sm:$0xff]   ;;  %v299_v7 = vld [vmem:[%s415_s1 + $0x8] sm:$0xff]  }
   0x4   :  { %249 = vmatprep.subr.bf16.mxu0 %v304_v0  ;;  %276 = vmatprep.subr.bf16.mxu1 %v304_v0  ;;  %v300_v8 = vld [vmem:[%s415_s1] sm:$0xff]   ;;  %v302_v10 = vld [vmem:[%s416_s0 + $0x8] sm:$0xff]   ;;  %v303_v11 = vld [vmem:[%s416_s0 + $0x10] ss:$0 sps:$4 sm:$0xff]  }
   0x5   :  { %v301_v9 = vld [vmem:[%s416_s0] sm:$0xff]   ;;  %v207_v35 = vld [vmem:[%s418_s3 + $0x10] sm:$0xff]  ;;  %v206_v42 = vld [vmem:[%s418_s3 + $0x8] sm:$0xff] }
   0x6   :  { %v235_v29 = vld [vmem:[%s417_s2] ss:$0 sm:$0xff]  ;;  %v208_v45 = vld [vmem:[%s418_s3 + $0x18] sm:$0xff] }
   0x7   :  { %250 = vmatpush3.bf16.msra.mxu0 %v294_v2  ;;  %284 = vmatpush3.bf16.msra.mxu1 %v294_v2  ;;  %v205_v31 = vld [vmem:[%s418_s3] sm:$0xff] }
   0x8   :  { %251 = vmatprep.subr.bf16.mxu0 %v304_v0  ;;  %277 = vmatprep.subr.bf16.mxu1 %v304_v0  ;;  %v28_v12 = vld [vmem:[#allocation2] sm:$0xff]  ;;  %v29_v20 = vld [vmem:[#allocation2 + $0x8] sm:$0xff] }
   0x9   :  { %v30_v13 = vld [vmem:[#allocation2 + $0x10] sm:$0xff]  ;;  %v31_v21 = vld [vmem:[#allocation2 + $0x18] sm:$0xff] }
   0xa   :  { %v32_v28 = vld [vmem:[#allocation2 + $0x20] sm:$0xff] }
   0xb   :  { %252 = vmatpush3.bf16.msra.mxu0 %v295_v3  ;;  %285 = vmatpush3.bf16.msra.mxu1 %v295_v3 }
   0xc   :  { %253 = vmatprep.subr.bf16.mxu0 %v304_v0  ;;  %278 = vmatprep.subr.bf16.mxu1 %v304_v0 }
   0xf   :  { %254 = vmatpush3.bf16.msra.mxu0 %v296_v4  ;;  %286 = vmatpush3.bf16.msra.mxu1 %v296_v4 }
  0x10   :  { %255 = vmatprep.subr.bf16.mxu0 %v304_v0  ;;  %279 = vmatprep.subr.bf16.mxu1 %v304_v0 }
  0x13   :  { %256 = vmatpush3.bf16.msra.mxu0 %v297_v5  ;;  %287 = vmatpush3.bf16.msra.mxu1 %v297_v5 }
  0x14   :  { %257 = vmatprep.subr.bf16.mxu0 %v304_v0  ;;  %280 = vmatprep.subr.bf16.mxu1 %v304_v0 }
  0x17   :  { %258 = vmatpush3.bf16.msra.mxu0 %v298_v6  ;;  %288 = vmatpush3.bf16.msra.mxu1 %v298_v6 }
  0x18   :  { %259 = vmatprep.subr.bf16.mxu0 %v304_v0  ;;  %281 = vmatprep.subr.bf16.mxu1 %v304_v0 }
  0x1b   :  { %260 = vmatpush3.bf16.msra.mxu0 %v299_v7  ;;  %289 = vmatpush3.bf16.msra.mxu1 %v299_v7 }
  0x1c   :  { %261 = vmatprep.subr.bf16.mxu0 %v304_v0  ;;  %282 = vmatprep.subr.bf16.mxu1 %v304_v0 }
  0x1f   :  { %262 = vmatpush3.bf16.msra.mxu0 %v300_v8  ;;  %290 = vmatpush3.bf16.msra.mxu1 %v300_v8 }
  0x22   :  { %264 = vmatmul.mubr.bf16.vlgmr.msra.gmra.mxu0 %v301_v9  ;;  %268 = vmatmul.mubr.bf16.vlgmr.msra.gmra.mxu1 %v302_v10 }
  0x23   :  { %271 = vmatprep.mubr.msk.bf16.mxu1 %vm305_vm1, %v304_v0 }
  0x2a   :  { %272 = vmatmul.mubr.bf16.gmra.mxu1 %v303_v11 }
  0xe2   :  { %v152_v14 = vpop.f32.mrf.mxu0  ;;  %v160_v15 = vpop.f32.mrf.mxu1 }
  0xe3   :  { %v174_v16 = vadd.f32 %v152_v14, %v28_v12  ;;  %v176_v17 = vadd.f32 %v160_v15, %v30_v13 }
  0xe4   :  { %v265_v18 = vpop.f32.mrf.mxu0  ;;  %v269_v19 = vpop.f32.mrf.mxu1 }
  0xe5   :  { %180 = vst.msk [vmem:[#allocation2] sm:$0xff] %vm22_vm0, %v174_v16  ;;  %182 = vst.msk [vmem:[#allocation2 + $0x10] sm:$0xff] %vm22_vm0, %v176_v17 }
  0xe6   :  { %v155_v22 = vpop.f32.mrf.mxu0  ;;  %v163_v23 = vpop.f32.mrf.mxu1 }
  0xe7   :  { %v175_v24 = vadd.f32 %v155_v22, %v29_v20  ;;  %v177_v25 = vadd.f32 %v163_v23, %v31_v21 }
  0xe8   :  { %v266_v26 = vpop.f32.mrf.mxu0  ;;  %v270_v27 = vpop.f32.mrf.mxu1 }
  0xe9   :  { %181 = vst.msk [vmem:[#allocation2 + $0x8] sm:$0xff] %vm22_vm0, %v175_v24  ;;  %183 = vst.msk [vmem:[#allocation2 + $0x18] sm:$0xff] %vm22_vm0, %v177_v25 }
  0xea   :  { %v168_v30 = vpop.f32.mrf.mxu1 }
  0xeb   :  { %v178_v32 = vadd.f32 %v168_v30, %v32_v28 }
  0xec   :  { %v188_v33 = vld [vmem:[#allocation2] sm:$0xff]  ;;  %v190_v34 = vld [vmem:[#allocation2 + $0x10] sm:$0xff]  ;;  %v273_v36 = vpop.f32.mrf.mxu1 }
  0xed   :  { %v200_v37 = vadd.f32 %v235_v29, %v188_v33  ;;  %v202_v38 = vadd.f32 %v235_v29, %v190_v34  ;;  %184 = vst.msk [vmem:[#allocation2 + $0x20] sm:$0xff] %vm22_vm0, %v178_v32 }
  0xee   :  { %v171_v39 = vpop.f32.mrf.mxu1 }
  0xef   :  { %v210_v40 = vadd.f32 %v205_v31, %v200_v37  ;;  %v212_v41 = vadd.f32 %v207_v35, %v202_v38 }
  0xf0   :  { %v189_v43 = vld [vmem:[#allocation2 + $0x8] sm:$0xff]  ;;  %v191_v44 = vld [vmem:[#allocation2 + $0x18] sm:$0xff]  ;;  %v274_v46 = vpop.f32.mrf.mxu1 }
  0xf1   :  { %215 = vst.msk [vmem:[%s419_s4] sm:$0xff] %vm22_vm0, %v210_v40  ;;  %217 = vst.msk [vmem:[%s419_s4 + $0x10] sm:$0xff] %vm22_vm0, %v212_v41  ;;  %v201_v47 = vadd.f32 %v235_v29, %v189_v43  ;;  %v203_v48 = vadd.f32 %v235_v29, %v191_v44 }
  0xf3   :  { %v211_v49 = vadd.f32 %v206_v42, %v201_v47  ;;  %v213_v50 = vadd.f32 %v208_v45, %v203_v48 }
  0xf4   :  { %v192_v51 = vld [vmem:[#allocation2 + $0x20] sm:$0xff] }
  0xf5   :  { %v204_v53 = vadd.f32 %v235_v29, %v192_v51 }
  0xf8   :  { %v209_v52 = vld [vmem:[%s418_s3 + $0x20] sm:$0xff] }
  0xf9   :  { %216 = vst.msk [vmem:[%s419_s4 + $0x8] sm:$0xff] %vm22_vm0, %v211_v49  ;;  %218 = vst.msk [vmem:[%s419_s4 + $0x18] sm:$0xff] %vm22_vm0, %v213_v50  ;;  %v214_v54 = vadd.f32 %v209_v52, %v204_v53 }
  0xfb   :  { %219 = vst.msk [vmem:[%s419_s4 + $0x20] sm:$0xff] %vm22_vm0, %v214_v54 }

// kernel: transformer_forward.11
= control target key start
LH: loop header
LB: loop body
LE: loop exit
PB: predicated region body
PF: predicated region fallthrough
CT: control target
= control target key end

     0   :  { %s3200_s6 = smov 0   ;;  %s3835_s0 = inlined_call_operand.vmem [shape: bf16[2,20,96], index: 0, kind: input, shape index: {}]   ;;  %s3836_s1 = inlined_call_operand.vmem [shape: bf16[2,20,32], index: 1, kind: output, shape index: {}]  }
   0x1 LB: > { %s2625_s7 = sadd.s32 4294967295, %s3171_s6   ;;  %p2629_p0 = scmp.ge.s32.totalorder %s3171_s6, 1  ;;  %s3171_s6 = sphi %s3200_s6, %s11_s6  }
   0x2   : > { %p87_p1 = scmp.lt.s32.totalorder %s3171_s6, 3 }
   0x4   : > { %p88_p2 = pnand %p2629_p0, %p87_p1 }
   0x5   : > { %p107_p3 = scmp.lt.s32.totalorder (!%p88_p2), %s2625_s7, 1  ;;  %s3175_s12 = smov (!%p88_p2), 96  }
   0x6   : > { %91 = sbr.rel (%p88_p2) target bundleno = 3227 (0xc9b), region = 24  ;;  %s3176_s13 = smov (!%p88_p2), 64  }
   0x7   : > { %s3177_s14 = smov (!%p88_p2), 88   ;;  %s3178_s15 = smov (!%p88_p2), 120  }
   0x8   : > { %s3179_s16 = smov (!%p88_p2), 56   ;;  %s3180_s17 = smov (!%p88_p2), 80  }
   0x9   : > { %s3181_s18 = smov (!%p88_p2), 112   ;;  %s3182_s19 = smov (!%p88_p2), 48  }
   0xa   : > { %s3183_s20 = smov (!%p88_p2), 72   ;;  %s3184_s21 = smov (!%p88_p2), 104  }
   0xb   : > { %v3173_v0 = vmov 0.0   ;;  %s3838_s7 = smov (!%p107_p3, %s2625_s7), 1  ;;  %vm3174_vm0 = vmmov 0   ;;  %vm152_vm1 = vcmask 64512   ;;  %vm131_vm2 = vcmask 1040384   ;;  %s3185_s22 = smov 40  }
   0xc   : > { %2773 = vmatprep.subr.bf16.mxu0 %v3173_v0  ;;  %2781 = vmatprep.subr.bf16.mxu1 %v3173_v0  ;;  %s3029_s8 = smul.u32 12, %s3838_s7  ;;  %vm132_vm3 = vsmask.f32 256  ;;  %vm140_vm5 = vcmask 1041408   ;;  %vm141_vm6 = vsmask.f32 1280 }
   0xd   : > { %2777 = vmatprep.mubr.msk.bf16.mxu0 %vm3174_vm0, %v3173_v0  ;;  %2785 = vmatprep.mubr.msk.bf16.mxu1 %vm3174_vm0, %v3173_v0  ;;  %vm133_vm4 = vmand %vm131_vm2, %vm132_vm3  ;;  %vm203_vm8 = vcmask 158720   ;;  %vm222_vm9 = vcmask 162816   ;;  %vm704_vm10 = vcmask 35840   ;;  %s3186_s23 = smov 8   ;;  %vm724_vm11 = vcmask 1042432   ;;  %s3188_s24 = smov 16  }
   0xe   : > { %s111_s11 = scalar_lea.vmem %s3835_s0, %s3029_s8  ;;  %vm142_vm7 = vmand %vm140_vm5, %vm141_vm6  ;;  %vm720_vm12 = vcmask 39936   ;;  %s3189_s25 = smov 24   ;;  %vm644_vm13 = vcmask 130048   ;;  %vm646_vm14 = vcmask 195584   ;;  %vm2544_vm15 = vcmask 1044480  }
   0xf   : > { %v3218_v1 = vld [vmem:[%s111_s11 + $0x8] sm:$0x3]  ;;  %v118_v2 = vld [vmem:[%s111_s11] sm:$0xf]  ;;  %v3220_v3 = vld [vmem:[%s111_s11 + $0x4] sm:$0xf]  ;;  %s116_s28 = scalar_lea.vmem %s3836_s1, %s3029_s8 }
  0x10   : > { %v3228_v4 = vcombine.low %v3218_v1, %v3218_v1  ;;  %v3233_v5 = vcombine.low %v118_v2, %v3220_v3  ;;  %v3237_v6 = vcombine.low %v118_v2, %v118_v2  ;;  %v3245_v11 = vcombine.low %v3220_v3, %v3220_v3 }
  0x11   : > { %vm2550_vm3 = vcmask 1046528  }
  0x12   : > { %150 = vrot.lane.b32.xlu0 %v3228_v4, %s3175_s12  ;;  %v124_v10 = vrot.slane %v3237_v6, 2  ;;  %v129_v14 = vrot.slane %v3245_v11, 2 }
  0x14   : > { %v134_v13 = vsel %vm133_vm4, %v118_v2, %v124_v10  ;;  %vm2565_vm4 = vcmask 257024  }
  0x15   : > { %v138_v15 = vsel %vm131_vm2, %v134_v13, %v3220_v3 }
  0x16   : > { %148 = vrot.lane.b32.xlu0 %v3233_v5, %s3175_s12  ;;  %v3253_v16 = vsel %vm142_vm7, %v138_v15, %v129_v14 }
  0x1a   : > { %219 = vrot.lane.b32.xlu0 %v3228_v4, %s3176_s13 }
  0x1e   : > { %275 = vrot.lane.b32.xlu0 %v3228_v4, %s3177_s14 }
  0x22   : > { %273 = vrot.lane.b32.xlu0 %v3233_v5, %s3177_s14 }
  0x26   : > { %271 = vrot.lane.b32.xlu0 %v3253_v16, %s3178_s15 }
  0x84   : > { %v151_v7 = vpop.permute.xlu0 %150 }
  0x85   : > { %v160_v8 = vsel %vm152_vm1, %v151_v7, 0 }
  0x86   : > { %2774 = vmatpush3.bf16.xpose.msra.mxu0 %v160_v8 }
  0x87   : > { %2775 = vmatprep.subr.bf16.mxu0 %v3173_v0 }
  0x88   : > { %v149_v9 = vpop.permute.xlu0 %148 }
  0x89   : > { %v157_v12 = vsel %vm152_vm1, %v149_v9, 0 }
  0x8c   : > { %v220_v28 = vpop.permute.xlu0 %219 }
  0x8d   : > { %v228_v29 = vsel %vm140_vm5, %v220_v28, 0 }
  0x8e   : > { %2776 = vmatpush3.bf16.xpose.msra.mxu0 %v157_v12  ;;  %2782 = vmatpush3.bf16.msra.mxu1 %v228_v29 }
  0x8f   : > { %2797 = vmatprep.subr.bf16.mxu0 %v3173_v0  ;;  %2783 = vmatprep.subr.bf16.mxu1 %v3173_v0 }
  0x90   : > { %v276_v33 = vpop.permute.xlu0 %275 }
  0x91   : > { %v284_v35 = vsel %vm152_vm1, %v276_v33, 0 }
  0x94   : > { %v274_v37 = vpop.permute.xlu0 %273 }
  0x95   : > { %2778 = vmatmul.mubr.msk.bf16.vlgmr.msra.gmra.mxu0 %vm152_vm1, %v3253_v16  ;;  %v281_v38 = vsel %vm152_vm1, %v274_v37, 0 }
  0x96   : > { %2801 = vmatprep.mubr.msk.bf16.mxu0 %vm3174_vm0, %v3173_v0 }
  0x98   : > { %v272_v39 = vpop.permute.xlu0 %271 }
 0x155   : > { %v196_v17 = vpop.f32.mrf.mxu0 }
 0x156   : > { %v202_v18 = vmul.f32 0.35355338, %v196_v17 }
 0x157   : > { %v2779_v19 = vpop.f32.mrf.mxu0 }
 0x158   : > { %v204_v20 = vsel %vm203_vm8, %v202_v18, -inf }
 0x159   : > { %205 = vmax.xlane.f32.xlu1 %v204_v20  ;;  %v199_v21 = vpop.f32.mrf.mxu0 }
 0x15b   : > { %v2780_v22 = vpop.f32.mrf.mxu0 }
 0x1e2   : > { %v206_v23 = vpop.xlane.xlu1 %205 }
 0x1e3   : > { %v207_v24 = vsub.f32 %v202_v18, %v206_v23 }
 0x1e5   : > { %v208_v25 = vmul.f32 1.442695, %v207_v24 }
 0x1e7   : > { %3085 = vpow2.f32 %v208_v25 }
 0x1f4   : > { %v3086_v26 = vpop.eup %3085 }
 0x1f5   : > { %v210_v27 = vsel %vm203_vm8, %v3086_v26, 0.0 }
 0x1f6   : > { %211 = vadd.xlane.f32.xlu1 %v210_v27 }
 0x207   : > { %217 = vrot.lane.b32.xlu1 %v3233_v5, %s3176_s13 }
 0x27f   : > { %v212_v30 = vpop.xlane.xlu1 %211 }
 0x280   : > { %3087 = vrcp.f32 %v212_v30 }
 0x283   : > { %v218_v31 = vpop.permute.xlu1 %217 }
 0x284   : > { %2784 = vmatpush3.bf16.msra.mxu1 %v218_v31 }
 0x285   : > { %2789 = vmatprep.subr.bf16.mxu1 %v3173_v0 }
 0x28d   : > { %v3088_v32 = vpop.eup %3087 }
 0x28e   : > { %v215_v34 = vmul.f32 %v3088_v32, %v3086_v26 }
 0x290   : > { %v216_v36 = vpack.c.bf16 %v215_v34, %v215_v34 }
 0x292   : > { %2786 = vmatmul.mubr.msk.bf16.vlgmr.msra.gmra.mxu1 %vm222_vm9, %v216_v36 }
 0x293   : > { %2790 = vmatpush3.bf16.xpose.msra.mxu1 %v284_v35  ;;  %2793 = vmatprep.mubr.msk.bf16.mxu1 %vm3174_vm0, %v3173_v0 }
 0x294   : > { %2791 = vmatprep.subr.bf16.mxu1 %v3173_v0 }
 0x29b   : > { %2792 = vmatpush3.bf16.xpose.msra.mxu1 %v281_v38 }
 0x29c   : > { %2813 = vmatprep.subr.bf16.mxu1 %v3173_v0 }
 0x2a2   : > { %2794 = vmatmul.mubr.msk.bf16.vlgmr.msra.gmra.mxu1 %vm152_vm1, %v272_v39 }
 0x2a3   : > { %2817 = vmatprep.mubr.msk.bf16.mxu1 %vm3174_vm0, %v3173_v0 }
 0x352   : > { %v3284_v40 = vpop.f32.mrf.mxu1 }
 0x354   : > { %v2787_v41 = vpop.f32.mrf.mxu1 }
 0x356   : > { %v267_v42 = vpop.f32.mrf.mxu1 }
 0x358   : > { %v2788_v43 = vpop.f32.mrf.mxu1 }
 0x362   : > { %v320_v44 = vpop.f32.mrf.mxu1 }
 0x363   : > { %v326_v45 = vmul.f32 0.35355338, %v320_v44 }
 0x364   : > { %v2795_v46 = vpop.f32.mrf.mxu1 }
 0x365   : > { %v327_v47 = vsel %vm203_vm8, %v326_v45, -inf }
 0x366   : > { %328 = vmax.xlane.f32.xlu0 %v327_v47  ;;  %v323_v48 = vpop.f32.mrf.mxu1 }
 0x367   : > { %v649_v48 = vshrl.u32 %v3237_v6, 16 }
 0x368   : > { %v2796_v49 = vpop.f32.mrf.mxu1 }
 0x369   : > { %v651_v49 = vshll.u32 %v3237_v6, 16 }
 0x37c   : > { %342 = vrot.lane.b32.xlu0 %v3228_v4, %s3179_s16 }
 0x380   : > { %395 = vrot.lane.b32.xlu0 %v3228_v4, %s3180_s17 }
 0x384   : > { %391 = vrot.lane.b32.xlu0 %v3253_v16, %s3181_s18 }
 0x3ef   : > { %v329_v50 = vpop.xlane.xlu0 %328 }
 0x3f0   : > { %v330_v51 = vsub.f32 %v326_v45, %v329_v50  ;;  %v653_v50 = vrot.slane %v651_v49, 1 }
 0x3f2   : > { %v331_v52 = vmul.f32 1.442695, %v330_v51  ;;  %v3347_v51 = vor.u32 %v653_v50, %v649_v48 }
 0x3f3   : > { %v343_v55 = vpop.permute.xlu0 %342 }
 0x3f4   : > { %3089 = vpow2.f32 %v331_v52  ;;  %v349_v56 = vsel %vm140_vm5, %v343_v55, 0  ;;  %v1123_v52 = vshrl.u32 %v3233_v5, 16 }
 0x3f5   : > { %2798 = vmatpush3.bf16.msra.mxu0 %v349_v56 }
 0x3f6   : > { %2799 = vmatprep.subr.bf16.mxu0 %v3173_v0 }
 0x3f7   : > { %v396_v60 = vpop.permute.xlu0 %395 }
 0x3f8   : > { %v404_v62 = vsel %vm152_vm1, %v396_v60, 0 }
 0x3fb   : > { %v392_v8 = vpop.permute.xlu0 %391 }
 0x401   : > { %v3090_v53 = vpop.eup %3089 }
 0x402   : > { %v333_v54 = vsel %vm203_vm8, %v3090_v53, 0.0 }
 0x403   : > { %334 = vadd.xlane.f32.xlu1 %v333_v54  ;;  %v1125_v54 = vrot.slane %v1123_v52, 2 }
 0x414   : > { %340 = vrot.lane.b32.xlu1 %v3233_v5, %s3179_s16 }
 0x418   : > { %393 = vrot.lane.b32.xlu1 %v3233_v5, %s3180_s17 }
 0x48c   : > { %v335_v57 = vpop.xlane.xlu1 %334 }
 0x48d   : > { %3091 = vrcp.f32 %v335_v57  ;;  %v1592_v57 = vshrl.u32 %v3245_v11, 16 }
 0x48f   : > { %v1594_v60 = vrot.slane %v1592_v57, 1 }
 0x490   : > { %v341_v58 = vpop.permute.xlu1 %340 }
 0x491   : > { %2800 = vmatpush3.bf16.msra.mxu0 %v341_v58  ;;  %v1595_v58 = vshll.u32 %v3245_v11, 16 }
 0x492   : > { %2805 = vmatprep.subr.bf16.mxu0 %v3173_v0 }
 0x494   : > { %v394_v2 = vpop.permute.xlu1 %393 }
 0x495   : > { %v401_v7 = vsel %vm152_vm1, %v394_v2, 0 }
 0x49a   : > { %v3092_v59 = vpop.eup %3091 }
 0x49b   : > { %v338_v61 = vmul.f32 %v3092_v59, %v3090_v53  ;;  %v1126_v53 = vshll.u32 %v3233_v5, 16  ;;  %v3366_v59 = vrot.slane %v3245_v11, 1 }
 0x49d   : > { %v339_v63 = vpack.c.bf16 %v338_v61, %v338_v61  ;;  %v1128_v55 = vrot.slane %v1126_v53, 3  ;;  %v1597_v61 = vrot.slane %v1595_v58, 2 }
 0x49f   : > { %2802 = vmatmul.mubr.msk.bf16.vlgmr.msra.gmra.mxu0 %vm222_vm9, %v339_v63  ;;  %v3357_v56 = vor.u32 %v1128_v55, %v1125_v54  ;;  %v2668_v63 = vcombine.low %v3220_v3, %v3218_v1 }
 0x4a0   : > { %2806 = vmatpush3.bf16.xpose.msra.mxu0 %v404_v62  ;;  %2809 = vmatprep.mubr.msk.bf16.mxu0 %vm3174_vm0, %v3173_v0  ;;  %v3372_v62 = vor.u32 %v1597_v61, %v1594_v60 }
 0x4a1   : > { %2807 = vmatprep.subr.bf16.mxu0 %v3173_v0  ;;  %v2063_v2 = vshrl.u32 %v2668_v63, 16 }
 0x4a3   : > { %v2065_v11 = vrot.slane %v2063_v2, 3 }
 0x4a8   : > { %2808 = vmatpush3.bf16.xpose.msra.mxu0 %v401_v7  ;;  %v2066_v7 = vshll.u32 %v2668_v63, 16 }
 0x4a9   : > { %2829 = vmatprep.subr.bf16.mxu0 %v3173_v0 }
 0x4af   : > { %2810 = vmatmul.mubr.msk.bf16.vlgmr.msra.gmra.mxu0 %vm152_vm1, %v392_v8  ;;  %v2068_v8 = vrot.slane %v2066_v7, 4 }
 0x4b0   : > { %2833 = vmatprep.mubr.msk.bf16.mxu0 %vm3174_vm0, %v3173_v0 }
 0x55f   : > { %v3311_v9 = vpop.f32.mrf.mxu0 }
 0x561   : > { %v2803_v10 = vpop.f32.mrf.mxu0 }
 0x562   : > { %v3382_v10 = vor.u32 %v2068_v8, %v2065_v11 }
 0x563   : > { %v388_v12 = vpop.f32.mrf.mxu0 }
 0x565   : > { %v2804_v13 = vpop.f32.mrf.mxu0 }
 0x56f   : > { %v440_v14 = vpop.f32.mrf.mxu0 }
 0x570   : > { %v446_v15 = vmul.f32 0.35355338, %v440_v14 }
 0x571   : > { %v2811_v17 = vpop.f32.mrf.mxu0 }
 0x572   : > { %v447_v18 = vsel %vm203_vm8, %v446_v15, -inf }
 0x573   : > { %448 = vmax.xlane.f32.xlu1 %v447_v18  ;;  %v443_v19 = vpop.f32.mrf.mxu0 }
 0x574   : > { %v1121_v19 = vrot.slane %v3233_v5, 3 }
 0x575   : > { %v2812_v20 = vpop.f32.mrf.mxu0 }
 0x584   : > { %460 = vrot.lane.b32.xlu1 %v3233_v5, %s3182_s19 }
 0x588   : > { %515 = vrot.lane.b32.xlu1 %v3228_v4, %s3183_s20 }
 0x58c   : > { %511 = vrot.lane.b32.xlu1 %v3253_v16, %s3184_s21 }
 0x5fc   : > { %v449_v21 = vpop.xlane.xlu1 %448 }
 0x5fd   : > { %v450_v22 = vsub.f32 %v446_v15, %v449_v21 }
 0x5ff   : > { %v451_v23 = vmul.f32 1.442695, %v450_v22 }
 0x600   : > { %v461_v16 = vpop.permute.xlu1 %460 }
 0x601   : > { %3093 = vpow2.f32 %v451_v23 }
 0x604   : > { %v516_v30 = vpop.permute.xlu1 %515 }
 0x605   : > { %v524_v32 = vsel %vm152_vm1, %v516_v30, 0 }
 0x608   : > { %v512_v36 = vpop.permute.xlu1 %511 }
 0x60e   : > { %v3094_v24 = vpop.eup %3093 }
 0x60f   : > { %v453_v25 = vsel %vm203_vm8, %v3094_v24, 0.0 }
 0x610   : > { %454 = vadd.xlane.f32.xlu0 %v453_v25 }
 0x626   : > { %462 = vrot.lane.b32.xlu0 %v3228_v4, %s3182_s19 }
 0x62a   : > { %513 = vrot.lane.b32.xlu0 %v3233_v5, %s3183_s20 }
 0x699   : > { %v455_v26 = vpop.xlane.xlu0 %454 }
 0x69a   : > { %3095 = vrcp.f32 %v455_v26 }
 0x69d   : > { %v463_v27 = vpop.permute.xlu0 %462 }
 0x69e   : > { %v469_v28 = vsel %vm140_vm5, %v463_v27, 0 }
 0x69f   : > { %2814 = vmatpush3.bf16.msra.mxu1 %v469_v28 }
 0x6a0   : > { %2815 = vmatprep.subr.bf16.mxu1 %v3173_v0 }
 0x6a1   : > { %v514_v34 = vpop.permute.xlu0 %513 }
 0x6a2   : > { %v521_v35 = vsel %vm152_vm1, %v514_v34, 0 }
 0x6a3   : > { %2816 = vmatpush3.bf16.msra.mxu1 %v461_v16 }
 0x6a4   : > { %2821 = vmatprep.subr.bf16.mxu1 %v3173_v0 }
 0x6a7   : > { %v3096_v29 = vpop.eup %3095 }
 0x6a8   : > { %v458_v31 = vmul.f32 %v3096_v29, %v3094_v24 }
 0x6aa   : > { %v459_v33 = vpack.c.bf16 %v458_v31, %v458_v31 }
 0x6ac   : > { %2818 = vmatmul.mubr.msk.bf16.vlgmr.msra.gmra.mxu1 %vm222_vm9, %v459_v33 }
 0x6ad   : > { %2822 = vmatpush3.bf16.xpose.msra.mxu1 %v524_v32  ;;  %2825 = vmatprep.mubr.msk.bf16.mxu1 %vm3174_vm0, %v3173_v0 }
 0x6ae   : > { %2823 = vmatprep.subr.bf16.mxu1 %v3173_v0 }
 0x6b5   : > { %2824 = vmatpush3.bf16.xpose.msra.mxu1 %v521_v35 }
 0x6b6   : > { %2843 = vmatprep.subr.bf16.mxu1 %v3173_v0 }
 0x6bc   : > { %2826 = vmatmul.mubr.msk.bf16.vlgmr.msra.gmra.mxu1 %vm152_vm1, %v512_v36 }
 0x6bd   : > { %2845 = vmatprep.mubr.msk.bf16.mxu1 %vm3174_vm0, %v3173_v0 }
 0x76c   : > { %v3338_v37 = vpop.f32.mrf.mxu1 }
 0x76e   : > { %v2819_v38 = vpop.f32.mrf.mxu1 }
 0x770   : > { %v508_v39 = vpop.f32.mrf.mxu1 }
 0x772   : > { %v2820_v41 = vpop.f32.mrf.mxu1 }
 0x77c   : > { %v560_v42 = vpop.f32.mrf.mxu1 }
 0x77d   : > { %v566_v43 = vmul.f32 0.35355338, %v560_v42 }
 0x77e   : > { %v2827_v44 = vpop.f32.mrf.mxu1 }
 0x77f   : > { %v567_v45 = vsel %vm203_vm8, %v566_v43, -inf }
 0x780   : > { %568 = vmax.xlane.f32.xlu0 %v567_v45  ;;  %v563_v46 = vpop.f32.mrf.mxu1 }
 0x782   : > { %v2828_v47 = vpop.f32.mrf.mxu1 }
 0x796   : > { %582 = vrot.lane.b32.xlu0 %v3228_v4, %s3185_s22 }
 0x79a   : > { %655 = vrot.lane.b32.xlu0 %v3237_v6, %s3175_s12 }
 0x79e   : > { %770 = vrot.lane.b32.xlu0 %v3347_v51, %s3178_s15 }
 0x7a2   : > { %882 = vrot.lane.b32.xlu0 %v3347_v51, %s3181_s18 }
 0x7a6   : > { %994 = vrot.lane.b32.xlu0 %v3347_v51, %s3184_s21 }
 0x7aa   : > { %1242 = vrot.lane.b32.xlu0 %v3357_v56, %s3177_s14 }
 0x7ae   : > { %1354 = vrot.lane.b32.xlu0 %v3357_v56, %s3180_s17 }
 0x7b2   : > { %1466 = vrot.lane.b32.xlu0 %v3357_v56, %s3183_s20 }
 0x7b6   : > { %1600 = vrot.lane.b32.xlu0 %v3366_v59, %s3175_s12 }
 0x7ba   : > { %1710 = vrot.lane.b32.xlu0 %v3372_v62, %s3178_s15 }
 0x7be   : > { %1822 = vrot.lane.b32.xlu0 %v3372_v62, %s3181_s18 }
 0x7c2   : > { %1934 = vrot.lane.b32.xlu0 %v3372_v62, %s3184_s21 }
 0x7c6   : > { %2182 = vrot.lane.b32.xlu0 %v3382_v10, %s3177_s14 }
 0x7ca   : > { %2294 = vrot.lane.b32.xlu0 %v3382_v10, %s3180_s17 }
 0x7ce   : > { %2406 = vrot.lane.b32.xlu0 %v3382_v10, %s3183_s20 }
 0x809   : > { %v569_v3 = vpop.xlane.xlu0 %568 }
 0x80a   : > { %v570_v12 = vsub.f32 %v566_v43, %v569_v3 }
 0x80c   : > { %v571_v13 = vmul.f32 1.442695, %v570_v12 }
 0x80d   : > { %v583_v17 = vpop.permute.xlu0 %582 }
 0x80e   : > { %3097 = vpow2.f32 %v571_v13  ;;  %v589_v18 = vsel %vm140_vm5, %v583_v17, 0 }
 0x80f   : > { %2830 = vmatpush3.bf16.msra.mxu0 %v589_v18 }
 0x810   : > { %2831 = vmatprep.subr.bf16.mxu0 %v3173_v0 }
 0x811   : > { %v656_v22 = vpop.permute.xlu0 %655 }
 0x812   : > { %v661_v24 = vsel %vm152_vm1, %v656_v22, 0 }
 0x815   : > { %v771_v28 = vpop.permute.xlu0 %770 }
 0x819   : > { %v883_v30 = vpop.permute.xlu0 %882 }
 0x81b   : > { %v3098_v14 = vpop.eup %3097 }
 0x81c   : > { %v573_v15 = vsel %vm203_vm8, %v3098_v14, 0.0 }
 0x81d   : > { %574 = vadd.xlane.f32.xlu1 %v573_v15  ;;  %v995_v33 = vpop.permute.xlu0 %994 }
 0x821   : > { %v1243_v35 = vpop.permute.xlu0 %1242 }
 0x822   : > { %v1248_v36 = vsel %vm152_vm1, %v1243_v35, 0 }
 0x825   : > { %v1355_v38 = vpop.permute.xlu0 %1354 }
 0x826   : > { %v1360_v41 = vsel %vm152_vm1, %v1355_v38, 0 }
 0x829   : > { %v1467_v42 = vpop.permute.xlu0 %1466 }
 0x82a   : > { %v1472_v44 = vsel %vm152_vm1, %v1467_v42, 0 }
 0x82d   : > { %v1601_v45 = vpop.permute.xlu0 %1600 }
 0x82e   : > { %580 = vrot.lane.b32.xlu1 %v3233_v5, %s3185_s22  ;;  %v1606_v47 = vsel %vm152_vm1, %v1601_v45, 0 }
 0x832   : > { %772 = vrot.lane.b32.xlu1 %v3237_v6, %s3177_s14 }
 0x836   : > { %884 = vrot.lane.b32.xlu1 %v3237_v6, %s3180_s17 }
 0x83a   : > { %996 = vrot.lane.b32.xlu1 %v3237_v6, %s3183_s20 }
 0x83e   : > { %1130 = vrot.lane.b32.xlu1 %v3357_v56, %s3175_s12 }
 0x842   : > { %1240 = vrot.lane.b32.xlu1 %v1121_v19, %s3178_s15 }
 0x846   : > { %1352 = vrot.lane.b32.xlu1 %v1121_v19, %s3181_s18 }
 0x84a   : > { %1464 = vrot.lane.b32.xlu1 %v1121_v19, %s3184_s21 }
 0x84e   : > { %1712 = vrot.lane.b32.xlu1 %v3366_v59, %s3177_s14 }
 0x852   : > { %1824 = vrot.lane.b32.xlu1 %v3366_v59, %s3180_s17 }
 0x856   : > { %1936 = vrot.lane.b32.xlu1 %v3366_v59, %s3183_s20 }
 0x85a   : > { %2070 = vrot.lane.b32.xlu1 %v3382_v10, %s3175_s12 }
 0x85e   : > { %2180 = vrot.lane.b32.xlu1 %v3228_v4, %s3178_s15 }
 0x862   : > { %2292 = vrot.lane.b32.xlu1 %v3228_v4, %s3181_s18 }
 0x866   : > { %2404 = vrot.lane.b32.xlu1 %v3228_v4, %s3184_s21 }
 0x8a6   : > { %v575_v5 = vpop.xlane.xlu1 %574 }
 0x8a7   : > { %3099 = vrcp.f32 %v575_v5 }
 0x8aa   : > { %v581_v20 = vpop.permute.xlu1 %580 }
 0x8ab   : > { %2832 = vmatpush3.bf16.msra.mxu0 %v581_v20 }
 0x8ac   : > { %2837 = vmatprep.subr.bf16.mxu0 %v3173_v0 }
 0x8ae   : > { %v773_v4 = vpop.permute.xlu1 %772 }
 0x8af   : > { %v778_v26 = vsel %vm152_vm1, %v773_v4, 0 }
 0x8b2   : > { %v885_v27 = vpop.permute.xlu1 %884 }
 0x8b3   : > { %v890_v16 = vsel %vm152_vm1, %v885_v27, 0 }
 0x8b4   : > { %v3100_v21 = vpop.eup %3099 }
 0x8b5   : > { %v578_v23 = vmul.f32 %v3100_v21, %v3098_v14 }
 0x8b6   : > { %v997_v29 = vpop.permute.xlu1 %996 }
 0x8b7   : > { %v579_v25 = vpack.c.bf16 %v578_v23, %v578_v23  ;;  %v1002_v31 = vsel %vm152_vm1, %v997_v29, 0 }
 0x8b9   : > { %2834 = vmatmul.mubr.msk.bf16.vlgmr.msra.gmra.mxu0 %vm222_vm9, %v579_v25 }
 0x8ba   : > { %2838 = vmatpush3.bf16.xpose.msra.mxu0 %v661_v24  ;;  %2839 = vmatprep.mubr.msk.bf16.mxu0 %vm3174_vm0, %v3173_v0  ;;  %v1131_v32 = vpop.permute.xlu1 %1130 }
 0x8bb   : > { %2849 = vmatprep.subr.bf16.mxu0 %v3173_v0  ;;  %v1136_v34 = vsel %vm152_vm1, %v1131_v32, 0 }
 0x8be   : > { %v1241_v39 = vpop.permute.xlu1 %1240 }
 0x8c1   : > { %2840 = vmatmul.mubr.msk.bf16.vlgmr.msra.gmra.mxu0 %vm152_vm1, %v3347_v51  ;;  %v1711_v51 = vpop.permute.xlu0 %1710 }
 0x8c2   : > { %2850 = vmatpush3.bf16.xpose.msra.mxu0 %v778_v26  ;;  %2851 = vmatprep.mubr.msk.bf16.mxu0 %vm3174_vm0, %v3173_v0  ;;  %v1353_v43 = vpop.permute.xlu1 %1352 }
 0x8c3   : > { %2861 = vmatprep.subr.bf16.mxu0 %v3173_v0 }
 0x8c5   : > { %v1823_v54 = vpop.permute.xlu0 %1822 }
 0x8c6   : > { %v1465_v46 = vpop.permute.xlu1 %1464 }
 0x8c9   : > { %2852 = vmatmul.mubr.msk.bf16.vlgmr.msra.gmra.mxu0 %vm152_vm1, %v771_v28  ;;  %v1935_v58 = vpop.permute.xlu0 %1934 }
 0x8ca   : > { %2862 = vmatpush3.bf16.xpose.msra.mxu0 %v890_v16  ;;  %2863 = vmatprep.mubr.msk.bf16.mxu0 %vm3174_vm0, %v3173_v0  ;;  %v1713_v48 = vpop.permute.xlu1 %1712 }
 0x8cb   : > { %2873 = vmatprep.subr.bf16.mxu0 %v3173_v0  ;;  %v1718_v49 = vsel %vm152_vm1, %v1713_v48, 0 }
 0x8cd   : > { %v2183_v61 = vpop.permute.xlu0 %2182 }
 0x8ce   : > { %v1825_v50 = vpop.permute.xlu1 %1824 }
 0x8cf   : > { %v1830_v52 = vsel %vm152_vm1, %v1825_v50, 0 }
 0x8d1   : > { %2864 = vmatmul.mubr.msk.bf16.vlgmr.msra.gmra.mxu0 %vm152_vm1, %v883_v30  ;;  %v2295_v63 = vpop.permute.xlu0 %2294 }
 0x8d2   : > { %2874 = vmatpush3.bf16.xpose.msra.mxu0 %v1002_v31  ;;  %2875 = vmatprep.mubr.msk.bf16.mxu0 %vm3174_vm0, %v3173_v0  ;;  %v1937_v53 = vpop.permute.xlu1 %1936  ;;  %v2300_v7 = vsel %vm152_vm1, %v2295_v63, 0 }
 0x8d3   : > { %2885 = vmatprep.subr.bf16.mxu0 %v3173_v0  ;;  %v1942_v55 = vsel %vm152_vm1, %v1937_v53, 0 }
 0x8d5   : > { %v2407_v11 = vpop.permute.xlu0 %2406 }
 0x8d6   : > { %v2071_v57 = vpop.permute.xlu1 %2070  ;;  %v2412_v8 = vsel %vm152_vm1, %v2407_v11, 0 }
 0x8d7   : > { %v2076_v60 = vsel %vm152_vm1, %v2071_v57, 0 }
 0x8d9   : > { %2876 = vmatmul.mubr.msk.bf16.vlgmr.msra.gmra.mxu0 %vm152_vm1, %v995_v33 }
 0x8da   : > { %2886 = vmatpush3.bf16.xpose.msra.mxu0 %v1136_v34  ;;  %2887 = vmatprep.mubr.msk.bf16.mxu0 %vm3174_vm0, %v3173_v0  ;;  %v2181_v2 = vpop.permute.xlu1 %2180 }
 0x8db   : > { %2897 = vmatprep.subr.bf16.mxu0 %v3173_v0 }
 0x8e1   : > { %2888 = vmatmul.mubr.msk.bf16.vlgmr.msra.gmra.mxu0 %vm152_vm1, %v1121_v19 }
 0x8e2   : > { %2898 = vmatpush3.bf16.xpose.msra.mxu0 %v1248_v36  ;;  %2899 = vmatprep.mubr.msk.bf16.mxu0 %vm3174_vm0, %v3173_v0 }
 0x8e3   : > { %2909 = vmatprep.subr.bf16.mxu0 %v3173_v0 }
 0x8e9   : > { %2900 = vmatmul.mubr.msk.bf16.vlgmr.msra.gmra.mxu0 %vm152_vm1, %v1241_v39 }
 0x8ea   : > { %2910 = vmatpush3.bf16.xpose.msra.mxu0 %v1360_v41  ;;  %2911 = vmatprep.mubr.msk.bf16.mxu0 %vm3174_vm0, %v3173_v0 }
 0x8eb   : > { %2921 = vmatprep.subr.bf16.mxu0 %v3173_v0 }
 0x8f1   : > { %2912 = vmatmul.mubr.msk.bf16.vlgmr.msra.gmra.mxu0 %vm152_vm1, %v1353_v43 }
 0x8f2   : > { %2922 = vmatpush3.bf16.xpose.msra.mxu0 %v1472_v44  ;;  %2923 = vmatprep.mubr.msk.bf16.mxu0 %vm3174_vm0, %v3173_v0 }
 0x8f3   : > { %2933 = vmatprep.subr.bf16.mxu0 %v3173_v0 }
 0x8f9   : > { %2924 = vmatmul.mubr.msk.bf16.vlgmr.msra.gmra.mxu0 %vm152_vm1, %v1465_v46 }
 0x8fa   : > { %2934 = vmatpush3.bf16.xpose.msra.mxu0 %v1606_v47  ;;  %2935 = vmatprep.mubr.msk.bf16.mxu0 %vm3174_vm0, %v3173_v0 }
 0x8fb   : > { %2945 = vmatprep.subr.bf16.mxu0 %v3173_v0 }
 0x901   : > { %2936 = vmatmul.mubr.msk.bf16.vlgmr.msra.gmra.mxu0 %vm152_vm1, %v3372_v62  ;;  %v2188_v62 = vsel %vm152_vm1, %v2183_v61, 0 }
 0x902   : > { %2946 = vmatpush3.bf16.xpose.msra.mxu0 %v1718_v49  ;;  %2947 = vmatprep.mubr.msk.bf16.mxu0 %vm3174_vm0, %v3173_v0 }
 0x903   : > { %2957 = vmatprep.subr.bf16.mxu0 %v3173_v0 }
 0x909   : > { %2948 = vmatmul.mubr.msk.bf16.vlgmr.msra.gmra.mxu0 %vm152_vm1, %v1711_v51 }
 0x90a   : > { %2958 = vmatpush3.bf16.xpose.msra.mxu0 %v1830_v52  ;;  %2959 = vmatprep.mubr.msk.bf16.mxu0 %vm3174_vm0, %v3173_v0 }
 0x90b   : > { %2969 = vmatprep.subr.bf16.mxu0 %v3173_v0 }
 0x911   : > { %2960 = vmatmul.mubr.msk.bf16.vlgmr.msra.gmra.mxu0 %vm152_vm1, %v1823_v54 }
 0x912   : > { %2970 = vmatpush3.bf16.xpose.msra.mxu0 %v1942_v55  ;;  %2971 = vmatprep.mubr.msk.bf16.mxu0 %vm3174_vm0, %v3173_v0 }
 0x913   : > { %2981 = vmatprep.subr.bf16.mxu0 %v3173_v0 }
 0x919   : > { %2972 = vmatmul.mubr.msk.bf16.vlgmr.msra.gmra.mxu0 %vm152_vm1, %v1935_v58 }
 0x91a   : > { %2982 = vmatpush3.bf16.xpose.msra.mxu0 %v2076_v60  ;;  %2983 = vmatprep.mubr.msk.bf16.mxu0 %vm3174_vm0, %v3173_v0 }
 0x91b   : > { %2993 = vmatprep.subr.bf16.mxu0 %v3173_v0 }
 0x921   : > { %2984 = vmatmul.mubr.msk.bf16.vlgmr.msra.gmra.mxu0 %vm152_vm1, %v3218_v1  ;;  %v2293_v1 = vpop.permute.xlu1 %2292 }
 0x922   : > { %2994 = vmatpush3.bf16.xpose.msra.mxu0 %v2188_v62  ;;  %2995 = vmatprep.mubr.msk.bf16.mxu0 %vm3174_vm0, %v3173_v0 }
 0x923   : > { %3005 = vmatprep.subr.bf16.mxu0 %v3173_v0 }
 0x925   : > { %v2405_v3 = vpop.permute.xlu1 %2404 }
 0x929   : > { %2996 = vmatmul.mubr.msk.bf16.vlgmr.msra.gmra.mxu0 %vm152_vm1, %v2181_v2 }
 0x92a   : > { %3006 = vmatpush3.bf16.xpose.msra.mxu0 %v2300_v7  ;;  %3007 = vmatprep.mubr.msk.bf16.mxu0 %vm3174_vm0, %v3173_v0 }
 0x92b   : > { %3017 = vmatprep.subr.bf16.mxu0 %v3173_v0 }
 0x931   : > { %3008 = vmatmul.mubr.msk.bf16.vlgmr.msra.gmra.mxu0 %vm152_vm1, %v2293_v1 }
 0x932   : > { %3018 = vmatpush3.bf16.xpose.msra.mxu0 %v2412_v8  ;;  %3019 = vmatprep.mubr.msk.bf16.mxu0 %vm3174_vm0, %v3173_v0 }
 0x939   : > { %3020 = vmatmul.mubr.msk.bf16.vlgmr.msra.gmra.mxu0 %vm152_vm1, %v2405_v3 }
 0x979   : > { %v3505_v12 = vpop.f32.mrf.mxu0 }
 0x97b   : > { %v2835_v13 = vpop.f32.mrf.mxu0 }
 0x97d   : > { %v628_v14 = vpop.f32.mrf.mxu0 }
 0x97f   : > { %v2836_v15 = vpop.f32.mrf.mxu0 }
 0x981   : > { %v697_v17 = vpop.f32.mrf.mxu0 }
 0x982   : > { %v3507_v18 = vmul.f32 0.35355338, %v697_v17 }
 0x983   : > { %v2841_v19 = vpop.f32.mrf.mxu0 }
 0x984   : > { %v705_v5 = vsel %vm704_vm10, %v3507_v18, -inf }
 0x985   : > { %706 = vmax.xlane.f32.xlu0 %v705_v5  ;;  %v700_v20 = vpop.f32.mrf.mxu0 }
 0x987   : > { %v2842_v21 = vpop.f32.mrf.mxu0 }
 0x989   : > { %v814_v22 = vpop.f32.mrf.mxu0 }
 0x98a   : > { %v3511_v23 = vmul.f32 0.35355338, %v814_v22 }
 0x98b   : > { %v2853_v24 = vpop.f32.mrf.mxu0 }
 0x98c   : > { %v821_v25 = vsel %vm704_vm10, %v3511_v23, -inf }
 0x98d   : > { %822 = vmax.xlane.f32.xlu1 %v821_v25  ;;  %v817_v4 = vpop.f32.mrf.mxu0 }
 0x98f   : > { %v2854_v26 = vpop.f32.mrf.mxu0 }
 0x991   : > { %v926_v27 = vpop.f32.mrf.mxu0 }
 0x992   : > { %v3515_v28 = vmul.f32 0.35355338, %v926_v27 }
 0x993   : > { %v2865_v16 = vpop.f32.mrf.mxu0 }
 0x994   : > { %v933_v29 = vsel %vm704_vm10, %v3515_v28, -inf }
 0x995   : > { %934 = vmax.xlane.f32.xlu0 %v933_v29  ;;  %v929_v30 = vpop.f32.mrf.mxu0 }
 0x997   : > { %v2866_v31 = vpop.f32.mrf.mxu0 }
 0x999   : > { %v1038_v32 = vpop.f32.mrf.mxu0 }
 0x99a   : > { %v3519_v33 = vmul.f32 0.35355338, %v1038_v32 }
 0x99b   : > { %v2877_v34 = vpop.f32.mrf.mxu0 }
 0x99c   : > { %v1045_v35 = vsel %vm704_vm10, %v3519_v33, -inf }
 0x99d   : > { %1046 = vmax.xlane.f32.xlu0 %v1045_v35  ;;  %v1041_v36 = vpop.f32.mrf.mxu0 }
 0x99f   : > { %v2878_v38 = vpop.f32.mrf.mxu0 }
 0x9a1   : > { %v1172_v39 = vpop.f32.mrf.mxu0 }
 0x9a2   : > { %v3523_v41 = vmul.f32 0.35355338, %v1172_v39 }
 0x9a3   : > { %v2889_v42 = vpop.f32.mrf.mxu0 }
 0x9a4   : > { %v1179_v43 = vsel %vm704_vm10, %v3523_v41, -inf }
 0x9a5   : > { %1180 = vmax.xlane.f32.xlu1 %v1179_v43  ;;  %v1175_v44 = vpop.f32.mrf.mxu0 }
 0x9a7   : > { %v2890_v45 = vpop.f32.mrf.mxu0 }
 0x9a9   : > { %v1284_v46 = vpop.f32.mrf.mxu0 }
 0x9aa   : > { %v3527_v47 = vmul.f32 0.35355338, %v1284_v46 }
 0x9ab   : > { %v2901_v48 = vpop.f32.mrf.mxu0 }
 0x9ac   : > { %v1291_v49 = vsel %vm704_vm10, %v3527_v47, -inf }
 0x9ad   : > { %1292 = vmax.xlane.f32.xlu0 %v1291_v49  ;;  %v1287_v50 = vpop.f32.mrf.mxu0 }
 0x9af   : > { %v2902_v51 = vpop.f32.mrf.mxu0 }
 0x9b1   : > { %v1396_v52 = vpop.f32.mrf.mxu0 }
 0x9b2   : > { %v3531_v53 = vmul.f32 0.35355338, %v1396_v52 }
 0x9b3   : > { %v2913_v54 = vpop.f32.mrf.mxu0 }
 0x9b4   : > { %v1403_v55 = vsel %vm704_vm10, %v3531_v53, -inf }
 0x9b5   : > { %1404 = vmax.xlane.f32.xlu1 %v1403_v55  ;;  %v1399_v57 = vpop.f32.mrf.mxu0 }
 0x9b7   : > { %v2914_v58 = vpop.f32.mrf.mxu0 }
 0x9b9   : > { %v1508_v60 = vpop.f32.mrf.mxu0 }
 0x9ba   : > { %v3535_v61 = vmul.f32 0.35355338, %v1508_v60 }
 0x9bb   : > { %v2925_v62 = vpop.f32.mrf.mxu0 }
 0x9bc   : > { %v1515_v63 = vsel %vm704_vm10, %v3535_v61, -inf }
 0x9bd   : > { %1516 = vmax.xlane.f32.xlu0 %v1515_v63  ;;  %v1511_v2 = vpop.f32.mrf.mxu0 }
 0x9bf   : > { %v2926_v7 = vpop.f32.mrf.mxu0 }
 0x9c1   : > { %v1642_v11 = vpop.f32.mrf.mxu0 }
 0x9c2   : > { %v3539_v1 = vmul.f32 0.35355338, %v1642_v11 }
 0x9c3   : > { %v2937_v8 = vpop.f32.mrf.mxu0 }
 0x9c4   : > { %v1649_v3 = vsel %vm704_vm10, %v3539_v1, -inf }
 0x9c5   : > { %1650 = vmax.xlane.f32.xlu1 %v1649_v3  ;;  %v1645_v13 = vpop.f32.mrf.mxu0 }
 0x9c7   : > { %v2938_v14 = vpop.f32.mrf.mxu0 }
 0x9c9   : > { %v1754_v15 = vpop.f32.mrf.mxu0 }
 0x9ca   : > { %v3543_v17 = vmul.f32 0.35355338, %v1754_v15 }
 0x9cb   : > { %v2949_v19 = vpop.f32.mrf.mxu0 }
 0x9cc   : > { %v1761_v5 = vsel %vm704_vm10, %v3543_v17, -inf }
 0x9cd   : > { %1762 = vmax.xlane.f32.xlu0 %v1761_v5  ;;  %v1757_v20 = vpop.f32.mrf.mxu0 }
 0x9cf   : > { %v2950_v21 = vpop.f32.mrf.mxu0 }
 0x9d1   : > { %v1866_v22 = vpop.f32.mrf.mxu0 }
 0x9d2   : > { %v3547_v24 = vmul.f32 0.35355338, %v1866_v22 }
 0x9d3   : > { %v2961_v25 = vpop.f32.mrf.mxu0 }
 0x9d4   : > { %v1873_v4 = vsel %vm704_vm10, %v3547_v24, -inf }
 0x9d5   : > { %1874 = vmax.xlane.f32.xlu1 %v1873_v4  ;;  %v1869_v26 = vpop.f32.mrf.mxu0 }
 0x9d7   : > { %v2962_v27 = vpop.f32.mrf.mxu0 }
 0x9d9   : > { %v1978_v16 = vpop.f32.mrf.mxu0 }
 0x9da   : > { %v3561_v54 = vmul.f32 0.35355338, %v1978_v16 }
 0x9db   : > { %v2973_v29 = vpop.f32.mrf.mxu0 }
 0x9dc   : > { %v1985_v60 = vsel %vm704_vm10, %v3561_v54, -inf }
 0x9dd   : > { %v1981_v30 = vpop.f32.mrf.mxu0 }
 0x9df   : > { %v2974_v31 = vpop.f32.mrf.mxu0 }
 0x9e1   : > { %v2112_v32 = vpop.f32.mrf.mxu0 }
 0x9e2   : > { %v3563_v58 = vmul.f32 0.35355338, %v2112_v32 }
 0x9e3   : > { %632 = vrot.lane.b32.xlu0 %v3311_v9, %s3186_s23  ;;  %v2985_v34 = vpop.f32.mrf.mxu0 }
 0x9e4   : > { %v2119_v63 = vsel %vm704_vm10, %v3563_v58, -inf }
 0x9e5   : > { %v2115_v35 = vpop.f32.mrf.mxu0 }
 0x9e7   : > { %v2986_v36 = vpop.f32.mrf.mxu0 }
 0x9e9   : > { %v2224_v38 = vpop.f32.mrf.mxu0 }
 0x9ea   : > { %v3553_v39 = vmul.f32 0.35355338, %v2224_v38 }
 0x9eb   : > { %v2997_v42 = vpop.f32.mrf.mxu0 }
 0x9ec   : > { %v2231_v43 = vsel %vm704_vm10, %v3553_v39, -inf }
 0x9ed   : > { %2232 = vmax.xlane.f32.xlu1 %v2231_v43  ;;  %v2227_v44 = vpop.f32.mrf.mxu0 }
 0x9ef   : > { %v2998_v45 = vpop.f32.mrf.mxu0 }
 0x9f1   : > { %v2336_v46 = vpop.f32.mrf.mxu0 }
 0x9f2   : > { %v3557_v48 = vmul.f32 0.35355338, %v2336_v46 }
 0x9f3   : > { %v3009_v49 = vpop.f32.mrf.mxu0 }
 0x9f4   : > { %v2343_v9 = vsel %vm704_vm10, %v3557_v48, -inf }
 0x9f5   : > { %2344 = vmax.xlane.f32.xlu1 %v2343_v9  ;;  %v2339_v50 = vpop.f32.mrf.mxu0 }
 0x9f7   : > { %v3010_v51 = vpop.f32.mrf.mxu0 }
 0x9f9   : > { %v2448_v52 = vpop.f32.mrf.mxu0 }
 0x9fa   : > { %v3569_v2 = vmul.f32 0.35355338, %v2448_v52 }
 0x9fb   : > { %v3021_v55 = vpop.f32.mrf.mxu0 }
 0x9fc   : > { %v2455_v7 = vsel %vm704_vm10, %v3569_v2, -inf }
 0x9fd   : > { %v2451_v57 = vpop.f32.mrf.mxu0 }
 0x9ff   : > { %v3022_v62 = vpop.f32.mrf.mxu0 }
 0xa02   : > { %1986 = vmax.xlane.f32.xlu0 %v1985_v60 }
 0xa06   : > { %2120 = vmax.xlane.f32.xlu0 %v2119_v63 }
 0xa0a   : > { %2456 = vmax.xlane.f32.xlu0 %v2455_v7 }
 0xa0e   : > { %v707_v11 = vpop.xlane.xlu0 %706 }
 0xa0f   : > { %v708_v8 = vsub.f32 %v3507_v18, %v707_v11 }
 0xa11   : > { %v709_v3 = vmul.f32 1.442695, %v708_v8 }
 0xa13   : > { %3101 = vpow2.f32 %v709_v3 }
 0xa16   : > { %v823_v13 = vpop.xlane.xlu1 %822 }
 0xa17   : > { %v824_v14 = vsub.f32 %v3511_v23, %v823_v13 }
 0xa19   : > { %v825_v15 = vmul.f32 1.442695, %v824_v14 }
 0xa1b   : > { %3103 = vpow2.f32 %v825_v15 }
 0xa1e   : > { %v935_v19 = vpop.xlane.xlu0 %934 }
 0xa1f   : > { %v936_v5 = vsub.f32 %v3515_v28, %v935_v19 }
 0xa20   : > { %v3576_v20 = vpop.eup %3101  ;;  %834 = vrot.lane.b32.xlu0 %v3237_v6, %s3179_s16 }
 0xa21   : > { %v937_v21 = vmul.f32 1.442695, %v936_v5  ;;  %v711_v22 = vsel %vm704_vm10, %v3576_v20, 0.0 }
 0xa22   : > { %712 = vadd.xlane.f32.xlu1 %v711_v22 }
 0xa23   : > { %3105 = vpow2.f32 %v937_v21 }
 0xa24   : > { %946 = vrot.lane.b32.xlu0 %v3237_v6, %s3182_s19 }
 0xa26   : > { %v1047_v18 = vpop.xlane.xlu0 %1046 }
 0xa27   : > { %v1048_v23 = vsub.f32 %v3519_v33, %v1047_v18 }
 0xa28   : > { %v3585_v25 = vpop.eup %3103  ;;  %1058 = vrot.lane.b32.xlu0 %v3237_v6, %s3185_s22 }
 0xa29   : > { %v1049_v28 = vmul.f32 1.442695, %v1048_v23  ;;  %v827_v4 = vsel %vm704_vm10, %v3585_v25, 0.0 }
 0xa2a   : > { %828 = vadd.xlane.f32.xlu1 %v827_v4 }
 0xa2b   : > { %3107 = vpow2.f32 %v1049_v28 }
 0xa2c   : > { %1192 = vrot.lane.b32.xlu0 %v3357_v56, %s3176_s13 }
 0xa30   : > { %v3593_v26 = vpop.eup %3105  ;;  %1304 = vrot.lane.b32.xlu0 %v3357_v56, %s3179_s16 }
 0xa31   : > { %v939_v33 = vsel %vm704_vm10, %v3593_v26, 0.0 }
 0xa32   : > { %940 = vadd.xlane.f32.xlu1 %v939_v33 }
 0xa34   : > { %1416 = vrot.lane.b32.xlu0 %v3357_v56, %s3182_s19 }
 0xa36   : > { %v1293_v30 = vpop.xlane.xlu0 %1292 }
 0xa37   : > { %v1294_v32 = vsub.f32 %v3527_v47, %v1293_v30 }
 0xa38   : > { %v3601_v27 = vpop.eup %3107  ;;  %1528 = vrot.lane.b32.xlu0 %v3357_v56, %s3185_s22  ;;  %v1181_v56 = vpop.xlane.xlu1 %1180 }
 0xa39   : > { %v1051_v16 = vsel %vm704_vm10, %v3601_v27, 0.0  ;;  %v1182_v29 = vsub.f32 %v3523_v41, %v1181_v56  ;;  %v1295_v34 = vmul.f32 1.442695, %v1294_v32 }
 0xa3a   : > { %1052 = vadd.xlane.f32.xlu1 %v1051_v16 }
 0xa3b   : > { %v1183_v31 = vmul.f32 1.442695, %v1182_v29 }
 0xa3c   : > { %1662 = vrot.lane.b32.xlu0 %v3366_v59, %s3176_s13 }
 0xa3d   : > { %3109 = vpow2.f32 %v1183_v31 }
 0xa3e   : > { %3111 = vpow2.f32 %v1295_v34 }
 0xa40   : > { %1774 = vrot.lane.b32.xlu0 %v3366_v59, %s3179_s16 }
 0xa44   : > { %1886 = vrot.lane.b32.xlu0 %v3366_v59, %s3182_s19 }
 0xa46   : > { %v1517_v35 = vpop.xlane.xlu0 %1516 }
 0xa47   : > { %v1518_v38 = vsub.f32 %v3535_v61, %v1517_v35 }
 0xa48   : > { %1998 = vrot.lane.b32.xlu0 %v3366_v59, %s3185_s22  ;;  %v1405_v59 = vpop.xlane.xlu1 %1404 }
 0xa49   : > { %v1519_v43 = vmul.f32 1.442695, %v1518_v38 }
 0xa4a   : > { %v3629_v46 = vpop.eup %3109 }
 0xa4b   : > { %718 = vrot.lane.b32.xlu1 %v3237_v6, %s3176_s13  ;;  %v1406_v6 = vsub.f32 %v3531_v53, %v1405_v59  ;;  %v1185_v61 = vsel %vm704_vm10, %v3629_v46, 0.0  ;;  %v3634_v50 = vpop.eup %3111 }
 0xa4c   : > { %2132 = vrot.lane.b32.xlu0 %v3382_v10, %s3176_s13  ;;  %v1297_v51 = vsel %vm704_vm10, %v3634_v50, 0.0 }
 0xa4d   : > { %v1407_v36 = vmul.f32 1.442695, %v1406_v6 }
 0xa4e   : > { %v1651_v42 = vpop.xlane.xlu1 %1650 }
 0xa4f   : > { %3113 = vpow2.f32 %v1407_v36  ;;  %v1652_v44 = vsub.f32 %v3539_v1, %v1651_v42  ;;  %v3187_v36 = vmov 65535  }
 0xa50   : > { %2356 = vrot.lane.b32.xlu0 %v3382_v10, %s3182_s19  ;;  %3115 = vpow2.f32 %v1519_v43  ;;  %v725_v38 = vsel %vm140_vm5, 4294967295, %v3187_v36 }
 0xa51   : > { %v1653_v45 = vmul.f32 1.442695, %v1652_v44  ;;  %v3689_v44 = vsel %vm724_vm11, %v725_v38, 0 }
 0xa53   : > { %3117 = vpow2.f32 %v1653_v45 }
 0xa54   : > { %2468 = vrot.lane.b32.xlu0 %v3382_v10, %s3185_s22 }
 0xa56   : > { %v1763_v41 = vpop.xlane.xlu0 %1762 }
 0xa57   : > { %v1764_v47 = vsub.f32 %v3543_v17, %v1763_v41 }
 0xa59   : > { %v1765_v53 = vmul.f32 1.442695, %v1764_v47 }
 0xa5a   : > { %v3658_v8 = vpop.permute.xlu0 %632 }
 0xa5b   : > { %3119 = vpow2.f32 %v1765_v53 }
 0xa5c   : > { %v3638_v52 = vpop.eup %3113 }
 0xa5d   : > { %v1409_v17 = vsel %vm704_vm10, %v3638_v52, 0.0  ;;  %v3642_v55 = vpop.eup %3115 }
 0xa5e   : > { %v1875_v49 = vpop.xlane.xlu1 %1874 }
 0xa5f   : > { %v1876_v9 = vsub.f32 %v3547_v24, %v1875_v49  ;;  %v1521_v24 = vsel %vm704_vm10, %v3642_v55, 0.0 }
 0xa60   : > { %v3646_v57 = vpop.eup %3117 }
 0xa61   : > { %v1877_v1 = vmul.f32 1.442695, %v1876_v9  ;;  %v1655_v60 = vsel %vm704_vm10, %v3646_v57, 0.0 }
 0xa63   : > { %3121 = vpow2.f32 %v1877_v1 }
 0xa68   : > { %v3650_v62 = vpop.eup %3119 }
 0xa69   : > { %v1767_v63 = vsel %vm704_vm10, %v3650_v62, 0.0 }
 0xa6f   : > { %1186 = vadd.xlane.f32.xlu1 %v1185_v61 }
 0xa70   : > { %v3654_v7 = vpop.eup %3121 }
 0xa71   : > { %v1879_v11 = vsel %vm704_vm10, %v3654_v7, 0.0 }
 0xa73   : > { %1298 = vadd.xlane.f32.xlu1 %v1297_v51 }
 0xa76   : > { %v2233_v3 = vpop.xlane.xlu1 %2232 }
 0xa77   : > { %1410 = vadd.xlane.f32.xlu1 %v1409_v17  ;;  %v2234_v15 = vsub.f32 %v3553_v39, %v2233_v3 }
 0xa79   : > { %v2235_v18 = vmul.f32 1.442695, %v2234_v15 }
 0xa7b   : > { %1522 = vadd.xlane.f32.xlu1 %v1521_v24 }
 0xa7e   : > { %v2345_v5 = vpop.xlane.xlu1 %2344 }
 0xa7f   : > { %1656 = vadd.xlane.f32.xlu1 %v1655_v60  ;;  %v2346_v23 = vsub.f32 %v3557_v48, %v2345_v5 }
 0xa81   : > { %v2347_v33 = vmul.f32 1.442695, %v2346_v23 }
 0xa83   : > { %1768 = vadd.xlane.f32.xlu1 %v1767_v63 }
 0xa87   : > { %1880 = vadd.xlane.f32.xlu1 %v1879_v11 }
 0xa8b   : > { %v1987_v13 = vpop.xlane.xlu0 %1986 }
 0xa8c   : > { %v1988_v14 = vsub.f32 %v3561_v54, %v1987_v13 }
 0xa8e   : > { %v1989_v19 = vmul.f32 1.442695, %v1988_v14 }
 0xa8f   : > { %v2121_v21 = vpop.xlane.xlu0 %2120 }
 0xa90   : > { %3123 = vpow2.f32 %v1989_v19  ;;  %v2122_v22 = vsub.f32 %v3563_v58, %v2121_v21 }
 0xa92   : > { %v2123_v28 = vmul.f32 1.442695, %v2122_v22 }
 0xa93   : > { %v2457_v4 = vpop.xlane.xlu0 %2456 }
 0xa94   : > { %3125 = vpow2.f32 %v2123_v28  ;;  %v2458_v16 = vsub.f32 %v3569_v2, %v2457_v4 }
 0xa95   : > { %3127 = vpow2.f32 %v2235_v18 }
 0xa96   : > { %3129 = vpow2.f32 %v2347_v33  ;;  %v2459_v54 = vmul.f32 1.442695, %v2458_v16 }
 0xa97   : > { %v835_v47 = vpop.permute.xlu0 %834 }
 0xa98   : > { %3131 = vpow2.f32 %v2459_v54 }
 0xa9b   : > { %v947_v61 = vpop.permute.xlu0 %946 }
 0xa9c   : > { %v952_v1 = vand.u32 %v947_v61, %v3689_v44 }
 0xa9d   : > { %v3665_v56 = vpop.eup %3123 }
 0xa9e   : > { %v1991_v39 = vsel %vm704_vm10, %v3665_v56, 0.0 }
 0xa9f   : > { %1992 = vadd.xlane.f32.xlu1 %v1991_v39  ;;  %v1059_v60 = vpop.permute.xlu0 %1058 }
 0xaa1   : > { %v3669_v58 = vpop.eup %3125 }
 0xaa2   : > { %v2125_v48 = vsel %vm704_vm10, %v3669_v58, 0.0  ;;  %v3673_v29 = vpop.eup %3127 }
 0xaa3   : > { %2126 = vadd.xlane.f32.xlu1 %v2125_v48  ;;  %v2237_v2 = vsel %vm704_vm10, %v3673_v29, 0.0  ;;  %v3677_v30 = vpop.eup %3129  ;;  %v1193_v13 = vpop.permute.xlu0 %1192 }
 0xaa4   : > { %v2349_v31 = vsel %vm704_vm10, %v3677_v30, 0.0 }
 0xaa5   : > { %v3681_v32 = vpop.eup %3131 }
 0xaa6   : > { %v2461_v59 = vsel %vm704_vm10, %v3681_v32, 0.0 }
 0xaa7   : > { %2238 = vadd.xlane.f32.xlu1 %v2237_v2 }
 0xaab   : > { %2350 = vadd.xlane.f32.xlu1 %v2349_v31  ;;  %v713_v34 = vpop.xlane.xlu1 %712 }
 0xaac   : > { %3133 = vrcp.f32 %v713_v34 }
 0xaaf   : > { %2462 = vadd.xlane.f32.xlu1 %v2461_v59 }
 0xab3   : > { %v829_v6 = vpop.xlane.xlu1 %828 }
 0xab4   : > { %3135 = vrcp.f32 %v829_v6 }
 0xab9   : > { %v3134_v43 = vpop.eup %3133 }
 0xaba   : > { %v716_v45 = vmul.f32 %v3134_v43, %v3576_v20 }
 0xabb   : > { %v941_v35 = vpop.xlane.xlu1 %940 }
 0xabc   : > { %3137 = vrcp.f32 %v941_v35  ;;  %v717_v53 = vpack.c.bf16 %v716_v45, %v716_v45 }
 0xac0   : > { %2244 = vrot.lane.b32.xlu1 %v3382_v10, %s3179_s16  ;;  %v840_v10 = vand.u32 %v835_v47, %v3689_v44 }
 0xac1   : > { %v3136_v9 = vpop.eup %3135 }
 0xac2   : > { %v832_v20 = vmul.f32 %v3136_v9, %v3585_v25  ;;  %v1064_v25 = vand.u32 %v1059_v60, %v3689_v44 }
 0xac3   : > { %v1053_v42 = vpop.xlane.xlu1 %1052 }
 0xac4   : > { %3139 = vrcp.f32 %v1053_v42  ;;  %v833_v51 = vpack.c.bf16 %v832_v20, %v832_v20 }
 0xac7   : > { %v719_v41 = vpop.permute.xlu1 %718 }
 0xac8   : > { %v728_v49 = vand.u32 %v3689_v44, %v719_v41 }
 0xac9   : > { %v3138_v17 = vpop.eup %3137 }
 0xaca   : > { %2844 = vmatpush3.bf16.msra.mxu1 %v728_v49  ;;  %v944_v24 = vmul.f32 %v3138_v17, %v3593_v26  ;;  %v1198_v26 = vand.u32 %v1193_v13, %v3689_v44 }
 0xacb   : > { %2855 = vmatprep.subr.bf16.mxu1 %v3173_v0 }
 0xacc   : > { %v945_v63 = vpack.c.bf16 %v944_v24, %v944_v24 }
 0xacd   : > { %2846 = vmatmul.mubr.msk.bf16.vlgmr.msra.gmra.mxu1 %vm720_vm12, %v717_v53 }
 0xace   : > { %2856 = vmatpush3.bf16.msra.mxu1 %v840_v10  ;;  %2857 = vmatprep.mubr.msk.bf16.mxu1 %vm3174_vm0, %v3173_v0 }
 0xacf   : > { %2867 = vmatprep.subr.bf16.mxu1 %v3173_v0 }
 0xad1   : > { %v3140_v11 = vpop.eup %3139 }
 0xad2   : > { %v1056_v3 = vmul.f32 %v3140_v11, %v3601_v27  ;;  %v1305_v27 = vpop.permute.xlu0 %1304 }
 0xad3   : > { %v1310_v18 = vand.u32 %v1305_v27, %v3689_v44 }
 0xad4   : > { %v1057_v14 = vpack.c.bf16 %v1056_v3, %v1056_v3 }
 0xad5   : > { %2858 = vmatmul.mubr.msk.bf16.vlgmr.msra.gmra.mxu1 %vm720_vm12, %v833_v51 }
 0xad6   : > { %2868 = vmatpush3.bf16.msra.mxu1 %v952_v1  ;;  %2869 = vmatprep.mubr.msk.bf16.mxu1 %vm3174_vm0, %v3173_v0  ;;  %v1417_v33 = vpop.permute.xlu0 %1416 }
 0xad7   : > { %2879 = vmatprep.subr.bf16.mxu1 %v3173_v0  ;;  %v1422_v54 = vand.u32 %v1417_v33, %v3689_v44 }
 0xada   : > { %v1529_v2 = vpop.permute.xlu0 %1528 }
 0xadb   : > { %v1534_v59 = vand.u32 %v1529_v2, %v3689_v44 }
 0xadd   : > { %2870 = vmatmul.mubr.msk.bf16.vlgmr.msra.gmra.mxu1 %vm720_vm12, %v945_v63 }
 0xade   : > { %2880 = vmatpush3.bf16.msra.mxu1 %v1064_v25  ;;  %2881 = vmatprep.mubr.msk.bf16.mxu1 %vm3174_vm0, %v3173_v0  ;;  %v1663_v35 = vpop.permute.xlu0 %1662 }
 0xadf   : > { %2891 = vmatprep.subr.bf16.mxu1 %v3173_v0  ;;  %v1668_v38 = vand.u32 %v1663_v35, %v3689_v44 }
 0xae2   : > { %v1775_v41 = vpop.permute.xlu0 %1774 }
 0xae3   : > { %v1780_v47 = vand.u32 %v1775_v41, %v3689_v44 }
 0xae5   : > { %2882 = vmatmul.mubr.msk.bf16.vlgmr.msra.gmra.mxu1 %vm720_vm12, %v1057_v14 }
 0xae6   : > { %2892 = vmatpush3.bf16.msra.mxu1 %v1198_v26  ;;  %2893 = vmatprep.mubr.msk.bf16.mxu1 %vm3174_vm0, %v3173_v0  ;;  %v1887_v53 = vpop.permute.xlu0 %1886 }
 0xae7   : > { %2903 = vmatprep.subr.bf16.mxu1 %v3173_v0 }
 0xaea   : > { %v1999_v17 = vpop.permute.xlu0 %1998 }
 0xaee   : > { %v2133_v11 = vpop.permute.xlu0 %2132 }
 0xaef   : > { %v2138_v13 = vand.u32 %v2133_v11, %v3689_v44 }
 0xaf8   : > { %v1187_v15 = vpop.xlane.xlu1 %1186 }
 0xaf9   : > { %3141 = vrcp.f32 %v1187_v15 }
 0xafc   : > { %v1299_v19 = vpop.xlane.xlu1 %1298 }
 0xafd   : > { %3143 = vrcp.f32 %v1299_v19 }
 0xb00   : > { %v1411_v5 = vpop.xlane.xlu1 %1410 }
 0xb01   : > { %3145 = vrcp.f32 %v1411_v5 }
 0xb04   : > { %v1523_v4 = vpop.xlane.xlu1 %1522 }
 0xb05   : > { %3147 = vrcp.f32 %v1523_v4 }
 0xb06   : > { %v3142_v21 = vpop.eup %3141 }
 0xb07   : > { %v1190_v22 = vmul.f32 %v3142_v21, %v3629_v46  ;;  %v2357_v21 = vpop.permute.xlu0 %2356 }
 0xb08   : > { %v1657_v48 = vpop.xlane.xlu1 %1656 }
 0xb09   : > { %v1191_v23 = vpack.c.bf16 %v1190_v22, %v1190_v22  ;;  %3149 = vrcp.f32 %v1657_v48 }
 0xb0a   : > { %v3144_v28 = vpop.eup %3143 }
 0xb0b   : > { %2894 = vmatmul.mubr.msk.bf16.vlgmr.msra.gmra.mxu1 %vm720_vm12, %v1191_v23  ;;  %v1302_v16 = vmul.f32 %v3144_v28, %v3634_v50  ;;  %v2469_v28 = vpop.permute.xlu0 %2468 }
 0xb0c   : > { %2904 = vmatpush3.bf16.msra.mxu1 %v1310_v18  ;;  %2905 = vmatprep.mubr.msk.bf16.mxu1 %vm3174_vm0, %v3173_v0  ;;  %v1769_v6 = vpop.xlane.xlu1 %1768  ;;  %v2362_v18 = vand.u32 %v2357_v21, %v3689_v44  ;;  %v2474_v33 = vand.u32 %v2469_v28, %v3689_v44 }
 0xb0d   : > { %2915 = vmatprep.subr.bf16.mxu1 %v3173_v0  ;;  %v1303_v46 = vpack.c.bf16 %v1302_v16, %v1302_v16  ;;  %3151 = vrcp.f32 %v1769_v6 }
 0xb0e   : > { %v3146_v39 = vpop.eup %3145 }
 0xb0f   : > { %v1414_v31 = vmul.f32 %v3146_v39, %v3638_v52 }
 0xb10   : > { %v1881_v43 = vpop.xlane.xlu1 %1880 }
 0xb11   : > { %v1415_v50 = vpack.c.bf16 %v1414_v31, %v1414_v31  ;;  %3153 = vrcp.f32 %v1881_v43 }
 0xb12   : > { %v3148_v34 = vpop.eup %3147 }
 0xb13   : > { %2906 = vmatmul.mubr.msk.bf16.vlgmr.msra.gmra.mxu1 %vm720_vm12, %v1303_v46  ;;  %v1526_v36 = vmul.f32 %v3148_v34, %v3642_v55 }
 0xb14   : > { %2916 = vmatpush3.bf16.msra.mxu1 %v1422_v54  ;;  %2917 = vmatprep.mubr.msk.bf16.mxu1 %vm3174_vm0, %v3173_v0 }
 0xb15   : > { %2927 = vmatprep.subr.bf16.mxu1 %v3173_v0  ;;  %v1527_v52 = vpack.c.bf16 %v1526_v36, %v1526_v36 }
 0xb16   : > { %v3150_v42 = vpop.eup %3149 }
 0xb17   : > { %v1660_v45 = vmul.f32 %v3150_v42, %v3646_v57  ;;  %v1892_v57 = vand.u32 %v1887_v53, %v3689_v44 }
 0xb19   : > { %v1661_v49 = vpack.c.bf16 %v1660_v45, %v1660_v45 }
 0xb1a   : > { %v3152_v10 = vpop.eup %3151 }
 0xb1b   : > { %2918 = vmatmul.mubr.msk.bf16.vlgmr.msra.gmra.mxu1 %vm720_vm12, %v1415_v50  ;;  %v1772_v9 = vmul.f32 %v3152_v10, %v3650_v62  ;;  %v2004_v62 = vand.u32 %v1999_v17, %v3689_v44 }
 0xb1c   : > { %2928 = vmatpush3.bf16.msra.mxu1 %v1534_v59  ;;  %2929 = vmatprep.mubr.msk.bf16.mxu1 %vm3174_vm0, %v3173_v0 }
 0xb1d   : > { %2939 = vmatprep.subr.bf16.mxu1 %v3173_v0  ;;  %v1773_v61 = vpack.c.bf16 %v1772_v9, %v1772_v9 }
 0xb1e   : > { %v3154_v1 = vpop.eup %3153 }
 0xb1f   : > { %v1884_v24 = vmul.f32 %v3154_v1, %v3654_v7 }
 0xb21   : > { %v1885_v60 = vpack.c.bf16 %v1884_v24, %v1884_v24 }
 0xb23   : > { %2930 = vmatmul.mubr.msk.bf16.vlgmr.msra.gmra.mxu1 %vm720_vm12, %v1527_v52 }
 0xb24   : > { %2940 = vmatpush3.bf16.msra.mxu1 %v1668_v38  ;;  %2941 = vmatprep.mubr.msk.bf16.mxu1 %vm3174_vm0, %v3173_v0 }
 0xb25   : > { %2951 = vmatprep.subr.bf16.mxu1 %v3173_v0 }
 0xb28   : > { %v1993_v55 = vpop.xlane.xlu1 %1992 }
 0xb29   : > { %3155 = vrcp.f32 %v1993_v55 }
 0xb2b   : > { %2942 = vmatmul.mubr.msk.bf16.vlgmr.msra.gmra.mxu1 %vm720_vm12, %v1661_v49 }
 0xb2c   : > { %2952 = vmatpush3.bf16.msra.mxu1 %v1780_v47  ;;  %2953 = vmatprep.mubr.msk.bf16.mxu1 %vm3174_vm0, %v3173_v0  ;;  %v2127_v20 = vpop.xlane.xlu1 %2126 }
 0xb2d   : > { %2963 = vmatprep.subr.bf16.mxu1 %v3173_v0  ;;  %3157 = vrcp.f32 %v2127_v20 }
 0xb30   : > { %v2239_v51 = vpop.xlane.xlu1 %2238 }
 0xb31   : > { %3159 = vrcp.f32 %v2239_v51 }
 0xb33   : > { %2954 = vmatmul.mubr.msk.bf16.vlgmr.msra.gmra.mxu1 %vm720_vm12, %v1773_v61 }
 0xb34   : > { %2964 = vmatpush3.bf16.msra.mxu1 %v1892_v57  ;;  %2965 = vmatprep.mubr.msk.bf16.mxu1 %vm3174_vm0, %v3173_v0  ;;  %v2351_v63 = vpop.xlane.xlu1 %2350 }
 0xb35   : > { %2975 = vmatprep.subr.bf16.mxu1 %v3173_v0  ;;  %3161 = vrcp.f32 %v2351_v63 }
 0xb36   : > { %v3156_v25 = vpop.eup %3155 }
 0xb37   : > { %v1996_v3 = vmul.f32 %v3156_v25, %v3665_v56 }
 0xb38   : > { %v2463_v7 = vpop.xlane.xlu1 %2462 }
 0xb39   : > { %v1997_v26 = vpack.c.bf16 %v1996_v3, %v1996_v3  ;;  %3163 = vrcp.f32 %v2463_v7 }
 0xb3a   : > { %v3158_v14 = vpop.eup %3157 }
 0xb3b   : > { %2966 = vmatmul.mubr.msk.bf16.vlgmr.msra.gmra.mxu1 %vm720_vm12, %v1885_v60  ;;  %v2130_v19 = vmul.f32 %v3158_v14, %v3669_v58 }
 0xb3c   : > { %2976 = vmatpush3.bf16.msra.mxu1 %v2004_v62  ;;  %2977 = vmatprep.mubr.msk.bf16.mxu1 %vm3174_vm0, %v3173_v0  ;;  %v2245_v15 = vpop.permute.xlu1 %2244 }
 0xb3d   : > { %2987 = vmatprep.subr.bf16.mxu1 %v3173_v0  ;;  %v2250_v5 = vand.u32 %v2245_v15, %v3689_v44  ;;  %v2131_v56 = vpack.c.bf16 %v2130_v19, %v2130_v19 }
 0xb3e   : > { %v3160_v27 = vpop.eup %3159 }
 0xb3f   : > { %v2242_v22 = vmul.f32 %v3160_v27, %v3673_v29 }
 0xb41   : > { %v2243_v23 = vpack.c.bf16 %v2242_v22, %v2242_v22 }
 0xb42   : > { %v3162_v58 = vpop.eup %3161 }
 0xb43   : > { %2978 = vmatmul.mubr.msk.bf16.vlgmr.msra.gmra.mxu1 %vm720_vm12, %v1997_v26  ;;  %v2354_v4 = vmul.f32 %v3162_v58, %v3677_v30 }
 0xb44   : > { %2988 = vmatpush3.bf16.msra.mxu1 %v2138_v13  ;;  %2989 = vmatprep.mubr.msk.bf16.mxu1 %vm3174_vm0, %v3173_v0 }
 0xb45   : > { %2999 = vmatprep.subr.bf16.mxu1 %v3173_v0  ;;  %v2355_v16 = vpack.c.bf16 %v2354_v4, %v2354_v4 }
 0xb46   : > { %v3164_v54 = vpop.eup %3163 }
 0xb47   : > { %v2466_v29 = vmul.f32 %v3164_v54, %v3681_v32 }
 0xb49   : > { %v2467_v46 = vpack.c.bf16 %v2466_v29, %v2466_v29 }
 0xb4b   : > { %2990 = vmatmul.mubr.msk.bf16.vlgmr.msra.gmra.mxu1 %vm720_vm12, %v2131_v56 }
 0xb4c   : > { %3000 = vmatpush3.bf16.msra.mxu1 %v2250_v5  ;;  %3001 = vmatprep.mubr.msk.bf16.mxu1 %vm3174_vm0, %v3173_v0 }
 0xb4d   : > { %3011 = vmatprep.subr.bf16.mxu1 %v3173_v0 }
 0xb53   : > { %3002 = vmatmul.mubr.msk.bf16.vlgmr.msra.gmra.mxu1 %vm720_vm12, %v2243_v23 }
 0xb54   : > { %3012 = vmatpush3.bf16.msra.mxu1 %v2362_v18  ;;  %3013 = vmatprep.mubr.msk.bf16.mxu1 %vm3174_vm0, %v3173_v0 }
 0xb55   : > { %3023 = vmatprep.subr.bf16.mxu1 %v3173_v0 }
 0xb5b   : > { %3014 = vmatmul.mubr.msk.bf16.vlgmr.msra.gmra.mxu1 %vm720_vm12, %v2355_v16 }
 0xb5c   : > { %3024 = vmatpush3.bf16.msra.mxu1 %v2474_v33  ;;  %3025 = vmatprep.mubr.msk.bf16.mxu1 %vm3174_vm0, %v3173_v0  ;;  %vm2546_vm0 = vcmask 1045504  }
 0xb63   : > { %3026 = vmatmul.mubr.msk.bf16.vlgmr.msra.gmra.mxu1 %vm720_vm12, %v2467_v46 }
 0xb8d   : > { %v3784_v39 = vpop.f32.mrf.mxu1 }
 0xb8f   : > { %v2847_v48 = vpop.f32.mrf.mxu1 }
 0xb91   : > { %v767_v2 = vpop.f32.mrf.mxu1 }
 0xb93   : > { %v2848_v30 = vpop.f32.mrf.mxu1 }
 0xb95   : > { %v876_v31 = vpop.f32.mrf.mxu1 }
 0xb97   : > { %v2859_v44 = vpop.f32.mrf.mxu1 }
 0xb99   : > { %v879_v59 = vpop.f32.mrf.mxu1 }
 0xb9b   : > { %v2860_v50 = vpop.f32.mrf.mxu1 }
 0xb9d   : > { %v988_v34 = vpop.f32.mrf.mxu1 }
 0xb9e   : > { %v3055_v6 = vpack.i.bf16 %v988_v34, %v3338_v37 }
 0xb9f   : > { %v2871_v35 = vpop.f32.mrf.mxu1 }
 0xba0   : > { %3056 = vrot.lane.b32.xlu0 %v3055_v6, %s3188_s24 }
 0xba1   : > { %v991_v0 = vpop.f32.mrf.mxu1 }
 0xba3   : > { %v2872_v32 = vpop.f32.mrf.mxu1 }
 0xba5   : > { %v1100_v36 = vpop.f32.mrf.mxu1 }
 0xba6   : > { %v3060_v38 = vpack.i.bf16 %v1100_v36, %v3505_v12 }
 0xba7   : > { %v2883_v52 = vpop.f32.mrf.mxu1 }
 0xba8   : > { %3061 = vrot.lane.b32.xlu0 %v3060_v38, %s3189_s25 }
 0xba9   : > { %v1103_v42 = vpop.f32.mrf.mxu1 }
 0xbab   : > { %v2884_v43 = vpop.f32.mrf.mxu1 }
 0xbcb   : > { %v3790_v41 = vpop.f32.mrf.mxu1 }
 0xbcd   : > { %v2895_v45 = vpop.f32.mrf.mxu1 }
 0xbcf   : > { %v1237_v47 = vpop.f32.mrf.mxu1 }
 0xbd1   : > { %v2896_v37 = vpop.f32.mrf.mxu1 }
 0xbd3   : > { %v1346_v55 = vpop.f32.mrf.mxu1 }
 0xbd4   : > { %v3065_v49 = vpack.i.bf16 %v1346_v55, %v876_v31  ;;  %v643_v55 = vsel %vm152_vm1, %v3284_v40, %v3658_v8 }
 0xbd5   : > { %v2907_v10 = vpop.f32.mrf.mxu1 }
 0xbd6   : > { %3066 = vrot.lane.b32.xlu1 %v3065_v49, %s3186_s23 }
 0xbd7   : > { %v1349_v53 = vpop.f32.mrf.mxu1 }
 0xbd9   : > { %v2908_v9 = vpop.f32.mrf.mxu1 }
 0xbdb   : > { %v1458_v20 = vpop.f32.mrf.mxu1 }
 0xbdd   : > { %v2919_v12 = vpop.f32.mrf.mxu1 }
 0xbdf   : > { %v1461_v57 = vpop.f32.mrf.mxu1 }
 0xbe1   : > { %v2920_v61 = vpop.f32.mrf.mxu1 }
 0xbe3   : > { %v1570_v1 = vpop.f32.mrf.mxu1 }
 0xbe5   : > { %v2931_v51 = vpop.f32.mrf.mxu1 }
 0xbe7   : > { %v1573_v17 = vpop.f32.mrf.mxu1 }
 0xbe9   : > { %v2932_v24 = vpop.f32.mrf.mxu1 }
 0xbeb   : > { %v3793_v62 = vpop.f32.mrf.mxu1 }
 0xbed   : > { %v2943_v60 = vpop.f32.mrf.mxu1 }
 0xbef   : > { %v1707_v25 = vpop.f32.mrf.mxu1 }
 0xbf1   : > { %v2944_v63 = vpop.f32.mrf.mxu1 }
 0xbf3   : > { %v1816_v11 = vpop.f32.mrf.mxu1 }
 0xbf4   : > { %2047 = vrot.lane.b32.xlu1 %v1816_v11, %s3186_s23 }
 0xbf5   : > { %v2955_v3 = vpop.f32.mrf.mxu1 }
 0xbf7   : > { %v1819_v13 = vpop.f32.mrf.mxu1 }
 0xbf9   : > { %v2956_v7 = vpop.f32.mrf.mxu1 }
 0xbfb   : > { %v1928_v26 = vpop.f32.mrf.mxu1 }
 0xbfc   : > { %v3070_v14 = vpack.i.bf16 %v1928_v26, %v1458_v20 }
 0xbfd   : > { %v2967_v15 = vpop.f32.mrf.mxu1 }
 0xbfe   : > { %3071 = vrot.lane.b32.xlu0 %v3070_v14, %s3188_s24 }
 0xbff   : > { %v1931_v19 = vpop.f32.mrf.mxu1 }
 0xc01   : > { %v2968_v5 = vpop.f32.mrf.mxu1 }
 0xc03   : > { %v2040_v56 = vpop.f32.mrf.mxu1 }
 0xc04   : > { %v3075_v27 = vpack.i.bf16 %v2040_v56, %v1570_v1 }
 0xc05   : > { %v2979_v21 = vpop.f32.mrf.mxu1 }
 0xc06   : > { %3076 = vrot.lane.b32.xlu0 %v3075_v27, %s3189_s25 }
 0xc07   : > { %v2043_v22 = vpop.f32.mrf.mxu1 }
 0xc09   : > { %v2980_v18 = vpop.f32.mrf.mxu1 }
 0xc0b   : > { %v3798_v23 = vpop.f32.mrf.mxu1 }
 0xc0d   : > { %v2991_v58 = vpop.f32.mrf.mxu1 }
 0xc0f   : > { %v2177_v28 = vpop.f32.mrf.mxu1 }
 0xc11   : > { %v2992_v4 = vpop.f32.mrf.mxu1 }
 0xc12   : > { %v3057_v35 = vpop.permute.xlu0 %3056 }
 0xc13   : > { %v2286_v33 = vpop.f32.mrf.mxu1  ;;  %v3059_v32 = vunpack.i.h.bf16 %v3057_v35  ;;  %v3058_v42 = vunpack.i.l.bf16 %v3057_v35 }
 0xc14   : > { %2517 = vrot.lane.b32.xlu1 %v2286_v33, %s3186_s23 }
 0xc15   : > { %v3003_v16 = vpop.f32.mrf.mxu1  ;;  %v645_v9 = vsel %vm644_vm13, %v643_v55, %v3058_v42 }
 0xc17   : > { %v2289_v54 = vpop.f32.mrf.mxu1 }
 0xc19   : > { %v3004_v29 = vpop.f32.mrf.mxu1 }
 0xc1a   : > { %v3062_v36 = vpop.permute.xlu0 %3061 }
 0xc1b   : > { %v2398_v46 = vpop.f32.mrf.mxu1  ;;  %v3064_v52 = vunpack.i.h.bf16 %v3062_v36  ;;  %v3063_v47 = vunpack.i.l.bf16 %v3062_v36 }
 0xc1c   : > { %2521 = vrot.lane.b32.xlu0 %v2398_v46, %s3188_s24 }
 0xc1d   : > { %v3015_v48 = vpop.f32.mrf.mxu1  ;;  %v647_v20 = vsel %vm646_vm14, %v645_v9, %v3063_v47 }
 0xc1e   : > { %v2535_v24 = vrot.slane %v647_v20, 4 }
 0xc1f   : > { %v2401_v2 = vpop.f32.mrf.mxu1 }
 0xc21   : > { %v3016_v30 = vpop.f32.mrf.mxu1 }
 0xc23   : > { %v2510_v31 = vpop.f32.mrf.mxu1 }
 0xc24   : > { %2525 = vrot.lane.b32.xlu1 %v2510_v31, %s3189_s25 }
 0xc25   : > { %v3027_v44 = vpop.f32.mrf.mxu1 }
 0xc27   : > { %v2513_v59 = vpop.f32.mrf.mxu1 }
 0xc29   : > { %v3028_v50 = vpop.f32.mrf.mxu1 }
 0xc48   : > { %v3067_v34 = vpop.permute.xlu1 %3066 }
 0xc49   : > { %v3068_v6 = vunpack.i.l.bf16 %v3067_v34  ;;  %v3069_v37 = vunpack.i.h.bf16 %v3067_v34 }
 0xc4b   : > { %v1118_v0 = vsel %vm152_vm1, %v3784_v39, %v3068_v6  ;;  %v1588_v57 = vsel %vm152_vm1, %v3790_v41, %v3069_v37 }
 0xc4c   : > { %v1119_v38 = vsel %vm644_vm13, %v1118_v0, %v3059_v32 }
 0xc4d   : > { %v1120_v43 = vsel %vm646_vm14, %v1119_v38, %v3064_v52 }
 0xc4e   : > { %v2532_v49 = vrot.slane %v1120_v43, 7 }
 0xc50   : > { %v2543_v17 = vsel %vm131_vm2, %v647_v20, %v2532_v49  ;;  %vm2568_vm2 = vcmask 254976  }
 0xc66   : > { %v2048_v10 = vpop.permute.xlu1 %2047 }
 0xc67   : > { %v2058_v61 = vsel %vm152_vm1, %v3793_v62, %v2048_v10  ;;  %v2545_v62 = vsel %vm2544_vm15, %v2543_v17, %v2535_v24 }
 0xc70   : > { %v3072_v45 = vpop.permute.xlu0 %3071 }
 0xc71   : > { %v3074_v39 = vunpack.i.h.bf16 %v3072_v45  ;;  %v3073_v53 = vunpack.i.l.bf16 %v3072_v45 }
 0xc73   : > { %v2059_v40 = vsel %vm644_vm13, %v2058_v61, %v3074_v39  ;;  %v1589_v8 = vsel %vm644_vm13, %v1588_v57, %v3073_v53 }
 0xc78   : > { %v3077_v12 = vpop.permute.xlu0 %3076 }
 0xc79   : > { %v3079_v1 = vunpack.i.h.bf16 %v3077_v12  ;;  %v3078_v51 = vunpack.i.l.bf16 %v3077_v12 }
 0xc7b   : > { %v1590_v60 = vsel %vm646_vm14, %v1589_v8, %v3078_v51  ;;  %v2060_v25 = vsel %vm646_vm14, %v2059_v40, %v3079_v1 }
 0xc7c   : > { %v2538_v41 = vrot.slane %v1590_v60, 2  ;;  %v2541_v63 = vrot.slane %v2060_v25, 5 }
 0xc7e   : > { %v2547_v11 = vsel %vm2546_vm0, %v2545_v62, %v2538_v41  ;;  %v2548_v3 = vsel %vm140_vm5, %v2538_v41, %v647_v20 }
 0xc7f   : > { %v2549_v13 = vsel %vm724_vm11, %v2548_v3, %v2541_v63  ;;  %v2682_v7 = vpack.c.bf16 %v2547_v11, %v2547_v11 }
 0xc80   : > { %v2551_v26 = vsel %vm2550_vm3, %v2549_v13, %v2535_v24 }
 0xc81   : > { %v2683_v14 = vpack.c.bf16 %v2551_v26, %v2551_v26  ;;  %2566 = vst.msk [vmem:[%s116_s28] sm:$0xf] %vm2565_vm4, %v2682_v7 }
 0xc83   : > { %2567 = vst.msk [vmem:[%s116_s28 + $0x4] sm:$0xf] %vm2565_vm4, %v2683_v14 }
 0xc86   : > { %v2518_v15 = vpop.permute.xlu1 %2517 }
 0xc87   : > { %v2528_v5 = vsel %vm152_vm1, %v3798_v23, %v2518_v15 }
 0xc8e   : > { %v2522_v19 = vpop.permute.xlu0 %2521 }
 0xc8f   : > { %v2529_v56 = vsel %vm644_vm13, %v2528_v5, %v2522_v19 }
 0xc96   : > { %v2526_v27 = vpop.permute.xlu1 %2525 }
 0xc97   : > { %v2530_v21 = vsel %vm646_vm14, %v2529_v56, %v2526_v27 }
 0xc98   : > { %v2684_v22 = vpack.c.bf16 %v2530_v21, %v2530_v21 }
 0xc9a   : > { %2569 = vst.msk [vmem:[%s116_s28 + $0x8] sm:$0x3] %vm2568_vm2, %v2684_v22 }
 0xc9b PF: > { %s11_s6 = sadd.s32 1, %s3171_s6  }
 0xc9c   : > { %p8_p4 = scmp.ge.s32.totalorder %s11_s6, 4  }
 0xc9e   :  { %10 = sbr.rel (!%p8_p4) target bundleno = 1 (0x1), region = 54 }

</bundles_post_ra>
